<compile_context>
chip_gen: v5e
topology: v5e:2x2
jax: 0.10.0
libtpu: 0.0.40
codegen_flags: <defaults>
</compile_context>

<pallas_src>
import functools

import jax
import jax.numpy as jnp
from jax import lax
from jax.experimental import pallas as pl
from jax.experimental.pallas import tpu as pltpu

_GRAY_R, _GRAY_G, _GRAY_B = 0.2989, 0.587, 0.114


# ---------------------------------------------------------------------------
# Pallas kernel: fused ColorJitter for one block of Bt images.
#   img_ref / out_ref : (Bt, C, R, L)  -- spatial dims (R, L) are the minor,
#                        vreg-tiled dims; the channel dim is non-minor so
#                        channel slices are pure tile offsets.
#   r_s / g_s / b_s   : (Bt, 1, R, L) float32 VMEM scratch (working RGB planes)
#   perm_ref          : (4,) int32 SMEM  -- random op order (0=b,1=c,2=s,3=h)
#   fparams_ref       : (4,) float32 SMEM -- brightness, contrast, sat, hue
# ---------------------------------------------------------------------------
def _color_jitter_kernel(perm_ref, fparams_ref, img_ref, out_ref,
                         r_s, g_s, b_s, *,
                         use_b, use_c, use_s, use_h, inv_npix):
    # Load the three channel planes once (free slices: channel is non-minor).
    r_s[...] = img_ref[:, 0:1, :, :].astype(jnp.float32)
    g_s[...] = img_ref[:, 1:2, :, :].astype(jnp.float32)
    b_s[...] = img_ref[:, 2:3, :, :].astype(jnp.float32)

    bf = fparams_ref[0]
    cf = fparams_ref[1]
    sf = fparams_ref[2]
    hf = fparams_ref[3]

    def _clip01(v):
        return jnp.clip(v, 0.0, 1.0)

    def _gray(r, g, b):                      # torchvision grayscale weights
        return _GRAY_R * r + _GRAY_G * g + _GRAY_B * b

    def _per_image_mean(v):                  # (Bt,1,R,L) -> (Bt,1,1,1)
        row = jnp.sum(v, axis=-1, keepdims=True)      # lane reduce
        return jnp.sum(row, axis=-2, keepdims=True) * inv_npix

    def _apply_brightness():
        r_s[...] = _clip01(r_s[...] * bf)
        g_s[...] = _clip01(g_s[...] * bf)
        b_s[...] = _clip01(b_s[...] * bf)

    def _apply_contrast():
        r, g, b = r_s[...], g_s[...], b_s[...]
        mean = _per_image_mean(_gray(r, g, b))        # per-image gray mean
        w = 1.0 - cf
        r_s[...] = _clip01(cf * r + w * mean)
        g_s[...] = _clip01(cf * g + w * mean)
        b_s[...] = _clip01(cf * b + w * mean)

    def _apply_saturation():
        r, g, b = r_s[...], g_s[...], b_s[...]
        gray = _gray(r, g, b)
        w = 1.0 - sf
        r_s[...] = _clip01(sf * r + w * gray)
        g_s[...] = _clip01(sf * g + w * gray)
        b_s[...] = _clip01(sf * b + w * gray)

    def _apply_hue():
        r, g, b = r_s[...], g_s[...], b_s[...]
        # RGB -> HSV (torchvision _rgb2hsv, float path).
        maxc = jnp.maximum(jnp.maximum(r, g), b)
        minc = jnp.minimum(jnp.minimum(r, g), b)
        eqc = maxc == minc
        cr = maxc - minc
        # EUP reciprocals instead of 4 VALU divides (the VALU is the bound slot).
        inv_max = pl.reciprocal(jnp.where(eqc, 1.0, maxc), approx=True)
        inv_crd = pl.reciprocal(jnp.where(eqc, 1.0, cr), approx=True)
        # Clamping s <= 1 keeps p/q/t below in [0,1] without per-term clips.
        s = jnp.minimum(cr * inv_max, 1.0)
        rc = (maxc - r) * inv_crd
        gc = (maxc - g) * inv_crd
        bc = (maxc - b) * inv_crd
        max_r = maxc == r
        max_g = maxc == g
        hr = jnp.where(max_r, bc - gc, 0.0)
        hg = jnp.where(max_g & (~max_r), 2.0 + rc - bc, 0.0)
        hb = jnp.where((~max_g) & (~max_r), 4.0 + gc - rc, 0.0)
        h = (hr + hg + hb) * (1.0 / 6.0) + 1.0
        h = h - jnp.floor(h)                 # fmod(h, 1), h >= 0
        h = h + hf                           # hue shift
        h = h - jnp.floor(h)                 # wrap to [0, 1)
        # HSV -> RGB (torchvision _hsv2rgb).
        h6 = h * 6.0
        i_f = jnp.floor(h6)
        f = h6 - i_f
        i = i_f.astype(jnp.int32)
        i = jnp.where(i > 5, 0, i)           # == i % 6 for i in [0, 6]
        p_ = maxc * (1.0 - s)
        q_ = maxc * (1.0 - s * f)
        t_ = maxc * (1.0 - s * (1.0 - f))
        is0 = i == 0
        is1 = i == 1
        is2 = i == 2
        is3 = i == 3
        is4 = i == 4

        def sel(c0, c1, c2, c3, c4, c5):     # hoisted/shared one-hot compares
            o = jnp.where(is4, c4, c5)
            o = jnp.where(is3, c3, o)
            o = jnp.where(is2, c2, o)
            o = jnp.where(is1, c1, o)
            return jnp.where(is0, c0, o)

        r_s[...] = sel(maxc, q_, p_, p_, t_, maxc)
        g_s[...] = sel(t_, maxc, maxc, q_, p_, p_)
        b_s[...] = sel(p_, p_, t_, maxc, maxc, q_)

    # Apply the enabled ops in the randomly permuted order.  pl.when dispatch
    # runs only the selected op at each step, so total work == one pass of
    # each enabled adjustment (the previous kernel did 4x this).
    for step in range(4):
        op = perm_ref[step]
        if use_b:
            pl.when(op == 0)(_apply_brightness)
        if use_c:
            pl.when(op == 1)(_apply_contrast)
        if use_s:
            pl.when(op == 2)(_apply_saturation)
        if use_h:
            pl.when(op == 3)(_apply_hue)

    # Direct per-plane stores (lane-dense, no iota stitch / concatenate).
    out_ref[:, 0:1, :, :] = r_s[...].astype(out_ref.dtype)
    out_ref[:, 1:2, :, :] = g_s[...].astype(out_ref.dtype)
    out_ref[:, 2:3, :, :] = b_s[...].astype(out_ref.dtype)


# ---------------------------------------------------------------------------
# Wrapper
# ---------------------------------------------------------------------------
def _spatial_view(h, w):
    """Pick a lane-dense 2D view of the flattened spatial axis."""
    s = h * w
    if s % 128 == 0:
        return s // 128, 128                 # (sublane-rows, 128 lanes)
    return h, w                              # fallback: full dims as the tile


def _pick_group_size(n, per_image_bytes, max_block_bytes=1 << 20):
    """Largest divisor of n whose block fits the byte budget; keep >= 2 grid
    steps when possible so the 'parallel' batch axis shards across megacores."""
    cap = max(1, max_block_bytes // max(per_image_bytes, 1))
    if n >= 2:
        cap = min(cap, n // 2)
    best = 1
    for d in range(1, n + 1):
        if d <= cap and n % d == 0:
            best = d
    return best


def _jitter_pallas(img4, perm, fparams, enables):
    """img4: (N, C, R, L) float image batch; returns same shape/dtype."""
    n, c, r, l = img4.shape
    bt = _pick_group_size(n, c * r * l * img4.dtype.itemsize)
    # TODO(synk): for very large images (> ~600x600 f32 RGB) add a spatial grid
    # axis (with a contrast-mean pre-pass) so the block fits v7x/v5e VMEM.
    kernel = functools.partial(
        _color_jitter_kernel,
        use_b=enables[0], use_c=enables[1], use_s=enables[2], use_h=enables[3],
        inv_npix=1.0 / float(r * l))
    return pl.pallas_call(
        kernel,
        out_shape=jax.ShapeDtypeStruct((n, c, r, l), img4.dtype),
        grid_spec=pltpu.PrefetchScalarGridSpec(
            num_scalar_prefetch=0,
            grid=(n // bt,),
            in_specs=[
                pl.BlockSpec(memory_space=pltpu.MemorySpace.SMEM),   # perm (4,)
                pl.BlockSpec(memory_space=pltpu.MemorySpace.SMEM),   # fparams (4,)
                pl.BlockSpec((bt, c, r, l), lambda i: (i, 0, 0, 0)),
            ],
            out_specs=pl.BlockSpec((bt, c, r, l), lambda i: (i, 0, 0, 0)),
            scratch_shapes=[pltpu.VMEM((bt, 1, r, l), jnp.float32)] * 3,
        ),
        compiler_params=pltpu.CompilerParams(
            dimension_semantics=("parallel",),
            vmem_limit_bytes=32 * 1024 * 1024),
    )(perm, fparams, img4)


def color_jitter_batch(img_nchw, gate, perm, fparams, *, enables):
    """Apply ColorJitter with the given (traced) per-call parameters,
    gated by `gate` (bool scalar).  Float NCHW images in [0, 1]."""
    n, c, h, w = img_nchw.shape
    if not any(enables):
        return img_nchw
    if not jnp.issubdtype(img_nchw.dtype, jnp.floating):
        raise TypeError("expected a float image tensor in [0, 1]")
    if c != 3:
        # contrast / saturation / hue require RGB; brightness is channel-generic.
        assert not any(enables[1:]), "contrast/saturation/hue require C == 3"
        bf = fparams[0]
        return lax.cond(gate,
                        lambda x: jnp.clip(x * bf, 0.0, 1.0).astype(x.dtype),
                        lambda x: x,
                        img_nchw)
    r, l = _spatial_view(h, w)
    img4 = img_nchw.reshape(n, c, r, l)      # pure row-major reshape (no copy)
    out4 = lax.cond(                          # gate skips compute + HBM entirely
        gate,
        lambda x: _jitter_pallas(x, perm, fparams, enables),
        lambda x: x,
        img4)
    return out4.reshape(n, c, h, w)


# ---------------------------------------------------------------------------
# Module: torchvision-style parameter ranges + probability gate.
# ---------------------------------------------------------------------------
class ActuallyRandomColorJitter:
    """JAX/Pallas port of the PyTorch ActuallyRandomColorJitter.

    With probability p the call gets one randomly sampled ColorJitter
    (brightness/contrast/saturation/hue applied in a random order, factors
    shared across the batch exactly like torchvision on a batched tensor);
    otherwise the input is returned unchanged.  Float NCHW images in [0, 1].
    """

    def __init__(self, brightness=0, contrast=0, saturation=0, hue=0, p=0.5):
        self.p = float(p)
        self.brightness = self._make_range(brightness, center=1.0)
        self.contrast = self._make_range(contrast, center=1.0)
        self.saturation = self._make_range(saturation, center=1.0)
        self.hue = self._make_range(hue, center=0.0, clip_first_zero=False)

    @staticmethod
    def _make_range(value, center, clip_first_zero=True):
        if isinstance(value, (tuple, list)):
            lo, hi = float(value[0]), float(value[1])
        else:
            value = float(value)
            lo, hi = center - value, center + value
            if clip_first_zero:
                lo = max(lo, 0.0)
        if lo == hi == center:
            return None                      # op disabled (torchvision behavior)
        return (lo, hi)

    def __call__(self, key, img_nchw):
        k_gate, k_perm, kb, kc, ks, kh = jax.random.split(key, 6)

        def samp(k, rng, default):
            if rng is None:
                return jnp.asarray(default, jnp.float32)
            return jax.random.uniform(k, (), minval=rng[0], maxval=rng[1],
                                      dtype=jnp.float32)

        fparams = jnp.stack([samp(kb, self.brightness, 1.0),
                             samp(kc, self.contrast, 1.0),
                             samp(ks, self.saturation, 1.0),
                             samp(kh, self.hue, 0.0)]).astype(jnp.float32)
        perm = jax.random.permutation(k_perm, 4).astype(jnp.int32)
        gate = jax.random.uniform(k_gate, ()) < self.p
        enables = (self.brightness is not None, self.contrast is not None,
                   self.saturation is not None, self.hue is not None)
        return color_jitter_batch(img_nchw, gate, perm, fparams,
                                  enables=enables)

    def __repr__(self):
        return self.__class__.__name__ + f"(p={self.p})"


if __name__ == "__main__":
    key = jax.random.PRNGKey(0)
    k_img, k_call = jax.random.split(key)
    # RGB image batch in [0, 1] (torchvision float image convention).
    x = jax.random.uniform(k_img, (2, 3, 16, 16), dtype=jnp.float32)

    module = ActuallyRandomColorJitter(
        brightness=0.4, contrast=0.4, saturation=0.4, hue=0.1, p=0.5)
    fn = jax.jit(module.__call__)            # fully traced: no host syncs
    y = fn(k_call, x)
    jax.block_until_ready(y)
    assert y.shape == x.shape and y.dtype == x.dtype
    assert bool(jnp.all(jnp.isfinite(y)))
    assert bool(jnp.all(y >= -1e-5)) and bool(jnp.all(y <= 1.0 + 1e-5))
    print("KERNEL_OK")
</pallas_src>

<mosaic_0001>
module attributes {stable_mosaic.version = 11 : i64} {
  func.func @_color_jitter_kernel(%arg0: i32, %arg1: memref<4xi32, #tpu.memory_space<smem>>, %arg2: memref<4xf32, #tpu.memory_space<smem>>, %arg3: memref<1x3x2x128xf32, #tpu.memory_space<vmem>>, %arg4: memref<1x3x2x128xf32, #tpu.memory_space<vmem>>, %arg5: memref<1x1x2x128xf32, #tpu.memory_space<vmem>>, %arg6: memref<1x1x2x128xf32, #tpu.memory_space<vmem>>, %arg7: memref<1x1x2x128xf32, #tpu.memory_space<vmem>>) attributes {dimension_semantics = [#tpu.dimension_semantics<parallel>], iteration_bounds = array<i64: 2>, scalar_prefetch = 0 : i64, scratch_operands = 3 : i64, tpu.core_type = #tpu.core_type<tc>, window_params = [{transform_indices = @transform_0, window_bounds = array<i64: 4>}, {transform_indices = @transform_1, window_bounds = array<i64: 4>}, {transform_indices = @transform_2, window_bounds = array<i64: 1, 3, 2, 128>}, {transform_indices = @transform_3, window_bounds = array<i64: 1, 3, 2, 128>}]} {
    %c0 = arith.constant 0 : index
    %c0_0 = arith.constant 0 : index
    %c0_1 = arith.constant 0 : index
    %c0_2 = arith.constant 0 : index
    %0 = vector.load %arg3[%c0, %c0_0, %c0_1, %c0_2] : memref<1x3x2x128xf32, #tpu.memory_space<vmem>>, vector<1x1x2x128xf32>
    %c0_3 = arith.constant 0 : index
    %c0_4 = arith.constant 0 : index
    %c0_5 = arith.constant 0 : index
    %c0_6 = arith.constant 0 : index
    %1 = vector.load %arg5[%c0_3, %c0_4, %c0_5, %c0_6] : memref<1x1x2x128xf32, #tpu.memory_space<vmem>>, vector<1x1x2x128xf32>
    tpu.vector_store %arg5[%c0_3, %c0_4, %c0_5, %c0_6], %0 {strides = array<i32>} : memref<1x1x2x128xf32, #tpu.memory_space<vmem>>, vector<1x1x2x128xf32>,
    %c0_7 = arith.constant 0 : index
    %c1 = arith.constant 1 : index
    %c0_8 = arith.constant 0 : index
    %c0_9 = arith.constant 0 : index
    %2 = vector.load %arg3[%c0_7, %c1, %c0_8, %c0_9] : memref<1x3x2x128xf32, #tpu.memory_space<vmem>>, vector<1x1x2x128xf32>
    %c0_10 = arith.constant 0 : index
    %c0_11 = arith.constant 0 : index
    %c0_12 = arith.constant 0 : index
    %c0_13 = arith.constant 0 : index
    %3 = vector.load %arg6[%c0_10, %c0_11, %c0_12, %c0_13] : memref<1x1x2x128xf32, #tpu.memory_space<vmem>>, vector<1x1x2x128xf32>
    tpu.vector_store %arg6[%c0_10, %c0_11, %c0_12, %c0_13], %2 {strides = array<i32>} : memref<1x1x2x128xf32, #tpu.memory_space<vmem>>, vector<1x1x2x128xf32>,
    %c0_14 = arith.constant 0 : index
    %c2 = arith.constant 2 : index
    %c0_15 = arith.constant 0 : index
    %c0_16 = arith.constant 0 : index
    %4 = vector.load %arg3[%c0_14, %c2, %c0_15, %c0_16] : memref<1x3x2x128xf32, #tpu.memory_space<vmem>>, vector<1x1x2x128xf32>
    %c0_17 = arith.constant 0 : index
    %c0_18 = arith.constant 0 : index
    %c0_19 = arith.constant 0 : index
    %c0_20 = arith.constant 0 : index
    %5 = vector.load %arg7[%c0_17, %c0_18, %c0_19, %c0_20] : memref<1x1x2x128xf32, #tpu.memory_space<vmem>>, vector<1x1x2x128xf32>
    tpu.vector_store %arg7[%c0_17, %c0_18, %c0_19, %c0_20], %4 {strides = array<i32>} : memref<1x1x2x128xf32, #tpu.memory_space<vmem>>, vector<1x1x2x128xf32>,
    %c0_21 = arith.constant 0 : index
    %6 = memref.load %arg2[%c0_21] : memref<4xf32, #tpu.memory_space<smem>>
    %c1_22 = arith.constant 1 : index
    %7 = memref.load %arg2[%c1_22] : memref<4xf32, #tpu.memory_space<smem>>
    %c2_23 = arith.constant 2 : index
    %8 = memref.load %arg2[%c2_23] : memref<4xf32, #tpu.memory_space<smem>>
    %c3 = arith.constant 3 : index
    %9 = memref.load %arg2[%c3] : memref<4xf32, #tpu.memory_space<smem>>
    %c0_24 = arith.constant 0 : index
    %10 = memref.load %arg1[%c0_24] : memref<4xi32, #tpu.memory_space<smem>>
    %c0_i32 = arith.constant 0 : i32
    %11 = arith.cmpi eq, %10, %c0_i32 : i32
    %12 = arith.extui %11 : i1 to i32
    %c0_i32_25 = arith.constant 0 : i32
    %13 = arith.cmpi ne, %12, %c0_i32_25 : i32
    scf.if %13 {
      %c0_80 = arith.constant 0 : index
      %c0_81 = arith.constant 0 : index
      %c0_82 = arith.constant 0 : index
      %c0_83 = arith.constant 0 : index
      %68 = vector.load %arg5[%c0_80, %c0_81, %c0_82, %c0_83] : memref<1x1x2x128xf32, #tpu.memory_space<vmem>>, vector<1x1x2x128xf32>
      %69 = vector.broadcast %6 : f32 to vector<1x1x2x128xf32>
      %70 = arith.mulf %68, %69 : vector<1x1x2x128xf32>
      %cst = arith.constant 0.000000e+00 : f32
      %cst_84 = arith.constant 1.000000e+00 : f32
      %71 = vector.broadcast %cst : f32 to vector<1x1x2x128xf32>
      %72 = arith.maximumf %71, %70 : vector<1x1x2x128xf32>
      %73 = vector.broadcast %cst_84 : f32 to vector<1x1x2x128xf32>
      %74 = arith.minimumf %73, %72 : vector<1x1x2x128xf32>
      %c0_85 = arith.constant 0 : index
      %c0_86 = arith.constant 0 : index
      %c0_87 = arith.constant 0 : index
      %c0_88 = arith.constant 0 : index
      %75 = vector.load %arg5[%c0_85, %c0_86, %c0_87, %c0_88] : memref<1x1x2x128xf32, #tpu.memory_space<vmem>>, vector<1x1x2x128xf32>
      tpu.vector_store %arg5[%c0_85, %c0_86, %c0_87, %c0_88], %74 {strides = array<i32>} : memref<1x1x2x128xf32, #tpu.memory_space<vmem>>, vector<1x1x2x128xf32>,
      %c0_89 = arith.constant 0 : index
      %c0_90 = arith.constant 0 : index
      %c0_91 = arith.constant 0 : index
      %c0_92 = arith.constant 0 : index
      %76 = vector.load %arg6[%c0_89, %c0_90, %c0_91, %c0_92] : memref<1x1x2x128xf32, #tpu.memory_space<vmem>>, vector<1x1x2x128xf32>
      %77 = vector.broadcast %6 : f32 to vector<1x1x2x128xf32>
      %78 = arith.mulf %76, %77 : vector<1x1x2x128xf32>
      %cst_93 = arith.constant 0.000000e+00 : f32
      %cst_94 = arith.constant 1.000000e+00 : f32
      %79 = vector.broadcast %cst_93 : f32 to vector<1x1x2x128xf32>
      %80 = arith.maximumf %79, %78 : vector<1x1x2x128xf32>
      %81 = vector.broadcast %cst_94 : f32 to vector<1x1x2x128xf32>
      %82 = arith.minimumf %81, %80 : vector<1x1x2x128xf32>
      %c0_95 = arith.constant 0 : index
      %c0_96 = arith.constant 0 : index
      %c0_97 = arith.constant 0 : index
      %c0_98 = arith.constant 0 : index
      %83 = vector.load %arg6[%c0_95, %c0_96, %c0_97, %c0_98] : memref<1x1x2x128xf32, #tpu.memory_space<vmem>>, vector<1x1x2x128xf32>
      tpu.vector_store %arg6[%c0_95, %c0_96, %c0_97, %c0_98], %82 {strides = array<i32>} : memref<1x1x2x128xf32, #tpu.memory_space<vmem>>, vector<1x1x2x128xf32>,
      %c0_99 = arith.constant 0 : index
      %c0_100 = arith.constant 0 : index
      %c0_101 = arith.constant 0 : index
      %c0_102 = arith.constant 0 : index
      %84 = vector.load %arg7[%c0_99, %c0_100, %c0_101, %c0_102] : memref<1x1x2x128xf32, #tpu.memory_space<vmem>>, vector<1x1x2x128xf32>
      %85 = vector.broadcast %6 : f32 to vector<1x1x2x128xf32>
      %86 = arith.mulf %84, %85 : vector<1x1x2x128xf32>
      %cst_103 = arith.constant 0.000000e+00 : f32
      %cst_104 = arith.constant 1.000000e+00 : f32
      %87 = vector.broadcast %cst_103 : f32 to vector<1x1x2x128xf32>
      %88 = arith.maximumf %87, %86 : vector<1x1x2x128xf32>
      %89 = vector.broadcast %cst_104 : f32 to vector<1x1x2x128xf32>
      %90 = arith.minimumf %89, %88 : vector<1x1x2x128xf32>
      %c0_105 = arith.constant 0 : index
      %c0_106 = arith.constant 0 : index
      %c0_107 = arith.constant 0 : index
      %c0_108 = arith.constant 0 : index
      %91 = vector.load %arg7[%c0_105, %c0_106, %c0_107, %c0_108] : memref<1x1x2x128xf32, #tpu.memory_space<vmem>>, vector<1x1x2x128xf32>
      tpu.vector_store %arg7[%c0_105, %c0_106, %c0_107, %c0_108], %90 {strides = array<i32>} : memref<1x1x2x128xf32, #tpu.memory_space<vmem>>, vector<1x1x2x128xf32>,
    } else {
    }
    %c1_i32 = arith.constant 1 : i32
    %14 = arith.cmpi eq, %10, %c1_i32 : i32
    %15 = arith.extui %14 : i1 to i32
    %c0_i32_26 = arith.constant 0 : i32
    %16 = arith.cmpi ne, %15, %c0_i32_26 : i32
    scf.if %16 {
      %c0_80 = arith.constant 0 : index
      %c0_81 = arith.constant 0 : index
      %c0_82 = arith.constant 0 : index
      %c0_83 = arith.constant 0 : index
      %68 = vector.load %arg5[%c0_80, %c0_81, %c0_82, %c0_83] : memref<1x1x2x128xf32, #tpu.memory_space<vmem>>, vector<1x1x2x128xf32>
      %c0_84 = arith.constant 0 : index
      %c0_85 = arith.constant 0 : index
      %c0_86 = arith.constant 0 : index
      %c0_87 = arith.constant 0 : index
      %69 = vector.load %arg6[%c0_84, %c0_85, %c0_86, %c0_87] : memref<1x1x2x128xf32, #tpu.memory_space<vmem>>, vector<1x1x2x128xf32>
      %c0_88 = arith.constant 0 : index
      %c0_89 = arith.constant 0 : index
      %c0_90 = arith.constant 0 : index
      %c0_91 = arith.constant 0 : index
      %70 = vector.load %arg7[%c0_88, %c0_89, %c0_90, %c0_91] : memref<1x1x2x128xf32, #tpu.memory_space<vmem>>, vector<1x1x2x128xf32>
      %cst = arith.constant 2.989000e-01 : f32
      %71 = vector.broadcast %cst : f32 to vector<1x1x2x128xf32>
      %72 = arith.mulf %71, %68 : vector<1x1x2x128xf32>
      %cst_92 = arith.constant 5.870000e-01 : f32
      %73 = vector.broadcast %cst_92 : f32 to vector<1x1x2x128xf32>
      %74 = arith.mulf %73, %69 : vector<1x1x2x128xf32>
      %75 = arith.addf %72, %74 : vector<1x1x2x128xf32>
      %cst_93 = arith.constant 1.140000e-01 : f32
      %76 = vector.broadcast %cst_93 : f32 to vector<1x1x2x128xf32>
      %77 = arith.mulf %76, %70 : vector<1x1x2x128xf32>
      %78 = arith.addf %75, %77 : vector<1x1x2x128xf32>
      %cst_94 = arith.constant dense<0.000000e+00> : vector<1x1x2xf32>
      %79 = vector.multi_reduction <add>, %78, %cst_94 [3] : vector<1x1x2x128xf32> to vector<1x1x2xf32>
      %80 = vector.shape_cast %79 : vector<1x1x2xf32> to vector<1x1x2x1xf32>
      %cst_95 = arith.constant dense<0.000000e+00> : vector<1x1x1xf32>
      %81 = vector.multi_reduction <add>, %80, %cst_95 [2] : vector<1x1x2x1xf32> to vector<1x1x1xf32>
      %82 = vector.shape_cast %81 : vector<1x1x1xf32> to vector<1x1x1x1xf32>
      %cst_96 = arith.constant 3.906250e-03 : f32
      %83 = vector.broadcast %cst_96 : f32 to vector<1x1x1x1xf32>
      %84 = arith.mulf %82, %83 : vector<1x1x1x1xf32>
      %cst_97 = arith.constant 1.000000e+00 : f32
      %85 = arith.subf %cst_97, %7 : f32
      %86 = vector.broadcast %7 : f32 to vector<1x1x2x128xf32>
      %87 = arith.mulf %86, %68 : vector<1x1x2x128xf32>
      %88 = vector.broadcast %85 : f32 to vector<1x1x1x1xf32>
      %89 = arith.mulf %88, %84 : vector<1x1x1x1xf32>
      %90 = vector.broadcast %89 : vector<1x1x1x1xf32> to vector<1x1x2x128xf32>
      %91 = arith.addf %87, %90 : vector<1x1x2x128xf32>
      %cst_98 = arith.constant 0.000000e+00 : f32
      %cst_99 = arith.constant 1.000000e+00 : f32
      %92 = vector.broadcast %cst_98 : f32 to vector<1x1x2x128xf32>
      %93 = arith.maximumf %92, %91 : vector<1x1x2x128xf32>
      %94 = vector.broadcast %cst_99 : f32 to vector<1x1x2x128xf32>
      %95 = arith.minimumf %94, %93 : vector<1x1x2x128xf32>
      %c0_100 = arith.constant 0 : index
      %c0_101 = arith.constant 0 : index
      %c0_102 = arith.constant 0 : index
      %c0_103 = arith.constant 0 : index
      %96 = vector.load %arg5[%c0_100, %c0_101, %c0_102, %c0_103] : memref<1x1x2x128xf32, #tpu.memory_space<vmem>>, vector<1x1x2x128xf32>
      tpu.vector_store %arg5[%c0_100, %c0_101, %c0_102, %c0_103], %95 {strides = array<i32>} : memref<1x1x2x128xf32, #tpu.memory_space<vmem>>, vector<1x1x2x128xf32>,
      %97 = vector.broadcast %7 : f32 to vector<1x1x2x128xf32>
      %98 = arith.mulf %97, %69 : vector<1x1x2x128xf32>
      %99 = vector.broadcast %85 : f32 to vector<1x1x1x1xf32>
      %100 = arith.mulf %99, %84 : vector<1x1x1x1xf32>
      %101 = vector.broadcast %100 : vector<1x1x1x1xf32> to vector<1x1x2x128xf32>
      %102 = arith.addf %98, %101 : vector<1x1x2x128xf32>
      %cst_104 = arith.constant 0.000000e+00 : f32
      %cst_105 = arith.constant 1.000000e+00 : f32
      %103 = vector.broadcast %cst_104 : f32 to vector<1x1x2x128xf32>
      %104 = arith.maximumf %103, %102 : vector<1x1x2x128xf32>
      %105 = vector.broadcast %cst_105 : f32 to vector<1x1x2x128xf32>
      %106 = arith.minimumf %105, %104 : vector<1x1x2x128xf32>
      %c0_106 = arith.constant 0 : index
      %c0_107 = arith.constant 0 : index
      %c0_108 = arith.constant 0 : index
      %c0_109 = arith.constant 0 : index
      %107 = vector.load %arg6[%c0_106, %c0_107, %c0_108, %c0_109] : memref<1x1x2x128xf32, #tpu.memory_space<vmem>>, vector<1x1x2x128xf32>
      tpu.vector_store %arg6[%c0_106, %c0_107, %c0_108, %c0_109], %106 {strides = array<i32>} : memref<1x1x2x128xf32, #tpu.memory_space<vmem>>, vector<1x1x2x128xf32>,
      %108 = vector.broadcast %7 : f32 to vector<1x1x2x128xf32>
      %109 = arith.mulf %108, %70 : vector<1x1x2x128xf32>
      %110 = vector.broadcast %85 : f32 to vector<1x1x1x1xf32>
      %111 = arith.mulf %110, %84 : vector<1x1x1x1xf32>
      %112 = vector.broadcast %111 : vector<1x1x1x1xf32> to vector<1x1x2x128xf32>
      %113 = arith.addf %109, %112 : vector<1x1x2x128xf32>
      %cst_110 = arith.constant 0.000000e+00 : f32
      %cst_111 = arith.constant 1.000000e+00 : f32
      %114 = vector.broadcast %cst_110 : f32 to vector<1x1x2x128xf32>
      %115 = arith.maximumf %114, %113 : vector<1x1x2x128xf32>
      %116 = vector.broadcast %cst_111 : f32 to vector<1x1x2x128xf32>
      %117 = arith.minimumf %116, %115 : vector<1x1x2x128xf32>
      %c0_112 = arith.constant 0 : index
      %c0_113 = arith.constant 0 : index
      %c0_114 = arith.constant 0 : index
      %c0_115 = arith.constant 0 : index
      %118 = vector.load %arg7[%c0_112, %c0_113, %c0_114, %c0_115] : memref<1x1x2x128xf32, #tpu.memory_space<vmem>>, vector<1x1x2x128xf32>
      tpu.vector_store %arg7[%c0_112, %c0_113, %c0_114, %c0_115], %117 {strides = array<i32>} : memref<1x1x2x128xf32, #tpu.memory_space<vmem>>, vector<1x1x2x128xf32>,
    } else {
    }
    %c2_i32 = arith.constant 2 : i32
    %17 = arith.cmpi eq, %10, %c2_i32 : i32
    %18 = arith.extui %17 : i1 to i32
    %c0_i32_27 = arith.constant 0 : i32
    %19 = arith.cmpi ne, %18, %c0_i32_27 : i32
    scf.if %19 {
      %c0_80 = arith.constant 0 : index
      %c0_81 = arith.constant 0 : index
      %c0_82 = arith.constant 0 : index
      %c0_83 = arith.constant 0 : index
      %68 = vector.load %arg5[%c0_80, %c0_81, %c0_82, %c0_83] : memref<1x1x2x128xf32, #tpu.memory_space<vmem>>, vector<1x1x2x128xf32>
      %c0_84 = arith.constant 0 : index
      %c0_85 = arith.constant 0 : index
      %c0_86 = arith.constant 0 : index
      %c0_87 = arith.constant 0 : index
      %69 = vector.load %arg6[%c0_84, %c0_85, %c0_86, %c0_87] : memref<1x1x2x128xf32, #tpu.memory_space<vmem>>, vector<1x1x2x128xf32>
      %c0_88 = arith.constant 0 : index
      %c0_89 = arith.constant 0 : index
      %c0_90 = arith.constant 0 : index
      %c0_91 = arith.constant 0 : index
      %70 = vector.load %arg7[%c0_88, %c0_89, %c0_90, %c0_91] : memref<1x1x2x128xf32, #tpu.memory_space<vmem>>, vector<1x1x2x128xf32>
      %cst = arith.constant 2.989000e-01 : f32
      %71 = vector.broadcast %cst : f32 to vector<1x1x2x128xf32>
      %72 = arith.mulf %71, %68 : vector<1x1x2x128xf32>
      %cst_92 = arith.constant 5.870000e-01 : f32
      %73 = vector.broadcast %cst_92 : f32 to vector<1x1x2x128xf32>
      %74 = arith.mulf %73, %69 : vector<1x1x2x128xf32>
      %75 = arith.addf %72, %74 : vector<1x1x2x128xf32>
      %cst_93 = arith.constant 1.140000e-01 : f32
      %76 = vector.broadcast %cst_93 : f32 to vector<1x1x2x128xf32>
      %77 = arith.mulf %76, %70 : vector<1x1x2x128xf32>
      %78 = arith.addf %75, %77 : vector<1x1x2x128xf32>
      %cst_94 = arith.constant 1.000000e+00 : f32
      %79 = arith.subf %cst_94, %8 : f32
      %80 = vector.broadcast %8 : f32 to vector<1x1x2x128xf32>
      %81 = arith.mulf %80, %68 : vector<1x1x2x128xf32>
      %82 = vector.broadcast %79 : f32 to vector<1x1x2x128xf32>
      %83 = arith.mulf %82, %78 : vector<1x1x2x128xf32>
      %84 = arith.addf %81, %83 : vector<1x1x2x128xf32>
      %cst_95 = arith.constant 0.000000e+00 : f32
      %cst_96 = arith.constant 1.000000e+00 : f32
      %85 = vector.broadcast %cst_95 : f32 to vector<1x1x2x128xf32>
      %86 = arith.maximumf %85, %84 : vector<1x1x2x128xf32>
      %87 = vector.broadcast %cst_96 : f32 to vector<1x1x2x128xf32>
      %88 = arith.minimumf %87, %86 : vector<1x1x2x128xf32>
      %c0_97 = arith.constant 0 : index
      %c0_98 = arith.constant 0 : index
      %c0_99 = arith.constant 0 : index
      %c0_100 = arith.constant 0 : index
      %89 = vector.load %arg5[%c0_97, %c0_98, %c0_99, %c0_100] : memref<1x1x2x128xf32, #tpu.memory_space<vmem>>, vector<1x1x2x128xf32>
      tpu.vector_store %arg5[%c0_97, %c0_98, %c0_99, %c0_100], %88 {strides = array<i32>} : memref<1x1x2x128xf32, #tpu.memory_space<vmem>>, vector<1x1x2x128xf32>,
      %90 = vector.broadcast %8 : f32 to vector<1x1x2x128xf32>
      %91 = arith.mulf %90, %69 : vector<1x1x2x128xf32>
      %92 = vector.broadcast %79 : f32 to vector<1x1x2x128xf32>
      %93 = arith.mulf %92, %78 : vector<1x1x2x128xf32>
      %94 = arith.addf %91, %93 : vector<1x1x2x128xf32>
      %cst_101 = arith.constant 0.000000e+00 : f32
      %cst_102 = arith.constant 1.000000e+00 : f32
      %95 = vector.broadcast %cst_101 : f32 to vector<1x1x2x128xf32>
      %96 = arith.maximumf %95, %94 : vector<1x1x2x128xf32>
      %97 = vector.broadcast %cst_102 : f32 to vector<1x1x2x128xf32>
      %98 = arith.minimumf %97, %96 : vector<1x1x2x128xf32>
      %c0_103 = arith.constant 0 : index
      %c0_104 = arith.constant 0 : index
      %c0_105 = arith.constant 0 : index
      %c0_106 = arith.constant 0 : index
      %99 = vector.load %arg6[%c0_103, %c0_104, %c0_105, %c0_106] : memref<1x1x2x128xf32, #tpu.memory_space<vmem>>, vector<1x1x2x128xf32>
      tpu.vector_store %arg6[%c0_103, %c0_104, %c0_105, %c0_106], %98 {strides = array<i32>} : memref<1x1x2x128xf32, #tpu.memory_space<vmem>>, vector<1x1x2x128xf32>,
      %100 = vector.broadcast %8 : f32 to vector<1x1x2x128xf32>
      %101 = arith.mulf %100, %70 : vector<1x1x2x128xf32>
      %102 = vector.broadcast %79 : f32 to vector<1x1x2x128xf32>
      %103 = arith.mulf %102, %78 : vector<1x1x2x128xf32>
      %104 = arith.addf %101, %103 : vector<1x1x2x128xf32>
      %cst_107 = arith.constant 0.000000e+00 : f32
      %cst_108 = arith.constant 1.000000e+00 : f32
      %105 = vector.broadcast %cst_107 : f32 to vector<1x1x2x128xf32>
      %106 = arith.maximumf %105, %104 : vector<1x1x2x128xf32>
      %107 = vector.broadcast %cst_108 : f32 to vector<1x1x2x128xf32>
      %108 = arith.minimumf %107, %106 : vector<1x1x2x128xf32>
      %c0_109 = arith.constant 0 : index
      %c0_110 = arith.constant 0 : index
      %c0_111 = arith.constant 0 : index
      %c0_112 = arith.constant 0 : index
      %109 = vector.load %arg7[%c0_109, %c0_110, %c0_111, %c0_112] : memref<1x1x2x128xf32, #tpu.memory_space<vmem>>, vector<1x1x2x128xf32>
      tpu.vector_store %arg7[%c0_109, %c0_110, %c0_111, %c0_112], %108 {strides = array<i32>} : memref<1x1x2x128xf32, #tpu.memory_space<vmem>>, vector<1x1x2x128xf32>,
    } else {
    }
    %c3_i32 = arith.constant 3 : i32
    %20 = arith.cmpi eq, %10, %c3_i32 : i32
    %21 = arith.extui %20 : i1 to i32
    %c0_i32_28 = arith.constant 0 : i32
    %22 = arith.cmpi ne, %21, %c0_i32_28 : i32
    scf.if %22 {
      %c0_80 = arith.constant 0 : index
      %c0_81 = arith.constant 0 : index
      %c0_82 = arith.constant 0 : index
      %c0_83 = arith.constant 0 : index
      %68 = vector.load %arg5[%c0_80, %c0_81, %c0_82, %c0_83] : memref<1x1x2x128xf32, #tpu.memory_space<vmem>>, vector<1x1x2x128xf32>
      %c0_84 = arith.constant 0 : index
      %c0_85 = arith.constant 0 : index
      %c0_86 = arith.constant 0 : index
      %c0_87 = arith.constant 0 : index
      %69 = vector.load %arg6[%c0_84, %c0_85, %c0_86, %c0_87] : memref<1x1x2x128xf32, #tpu.memory_space<vmem>>, vector<1x1x2x128xf32>
      %c0_88 = arith.constant 0 : index
      %c0_89 = arith.constant 0 : index
      %c0_90 = arith.constant 0 : index
      %c0_91 = arith.constant 0 : index
      %70 = vector.load %arg7[%c0_88, %c0_89, %c0_90, %c0_91] : memref<1x1x2x128xf32, #tpu.memory_space<vmem>>, vector<1x1x2x128xf32>
      %71 = arith.maximumf %68, %69 : vector<1x1x2x128xf32>
      %72 = arith.maximumf %71, %70 : vector<1x1x2x128xf32>
      %73 = arith.minimumf %68, %69 : vector<1x1x2x128xf32>
      %74 = arith.minimumf %73, %70 : vector<1x1x2x128xf32>
      %75 = arith.cmpf oeq, %72, %74 : vector<1x1x2x128xf32>
      %76 = arith.subf %72, %74 : vector<1x1x2x128xf32>
      %cst = arith.constant 1.000000e+00 : f32
      %77 = vector.broadcast %cst : f32 to vector<1x1x2x128xf32>
      %78 = arith.select %75, %77, %72 : vector<1x1x2x128xi1>, vector<1x1x2x128xf32>
      %79 = tpu.reciprocal %78 {approx = true} : vector<1x1x2x128xf32> -> vector<1x1x2x128xf32>
      %cst_92 = arith.constant 1.000000e+00 : f32
      %80 = vector.broadcast %cst_92 : f32 to vector<1x1x2x128xf32>
      %81 = arith.select %75, %80, %76 : vector<1x1x2x128xi1>, vector<1x1x2x128xf32>
      %82 = tpu.reciprocal %81 {approx = true} : vector<1x1x2x128xf32> -> vector<1x1x2x128xf32>
      %83 = arith.mulf %76, %79 : vector<1x1x2x128xf32>
      %cst_93 = arith.constant 1.000000e+00 : f32
      %84 = vector.broadcast %cst_93 : f32 to vector<1x1x2x128xf32>
      %85 = arith.minimumf %83, %84 : vector<1x1x2x128xf32>
      %86 = arith.subf %72, %68 : vector<1x1x2x128xf32>
      %87 = arith.mulf %86, %82 : vector<1x1x2x128xf32>
      %88 = arith.subf %72, %69 : vector<1x1x2x128xf32>
      %89 = arith.mulf %88, %82 : vector<1x1x2x128xf32>
      %90 = arith.subf %72, %70 : vector<1x1x2x128xf32>
      %91 = arith.mulf %90, %82 : vector<1x1x2x128xf32>
      %92 = arith.cmpf oeq, %72, %68 : vector<1x1x2x128xf32>
      %93 = arith.cmpf oeq, %72, %69 : vector<1x1x2x128xf32>
      %94 = arith.subf %91, %89 : vector<1x1x2x128xf32>
      %cst_94 = arith.constant 0.000000e+00 : f32
      %95 = vector.broadcast %cst_94 : f32 to vector<1x1x2x128xf32>
      %96 = arith.select %92, %94, %95 : vector<1x1x2x128xi1>, vector<1x1x2x128xf32>
      %cst_95 = arith.constant dense<true> : vector<1x1x2x128xi1>
      %97 = arith.xori %92, %cst_95 : vector<1x1x2x128xi1>
      %98 = arith.andi %93, %97 : vector<1x1x2x128xi1>
      %cst_96 = arith.constant 2.000000e+00 : f32
      %99 = vector.broadcast %cst_96 : f32 to vector<1x1x2x128xf32>
      %100 = arith.addf %99, %87 : vector<1x1x2x128xf32>
      %101 = arith.subf %100, %91 : vector<1x1x2x128xf32>
      %cst_97 = arith.constant 0.000000e+00 : f32
      %102 = vector.broadcast %cst_97 : f32 to vector<1x1x2x128xf32>
      %103 = arith.select %98, %101, %102 : vector<1x1x2x128xi1>, vector<1x1x2x128xf32>
      %cst_98 = arith.constant dense<true> : vector<1x1x2x128xi1>
      %104 = arith.xori %93, %cst_98 : vector<1x1x2x128xi1>
      %cst_99 = arith.constant dense<true> : vector<1x1x2x128xi1>
      %105 = arith.xori %92, %cst_99 : vector<1x1x2x128xi1>
      %106 = arith.andi %104, %105 : vector<1x1x2x128xi1>
      %cst_100 = arith.constant 4.000000e+00 : f32
      %107 = vector.broadcast %cst_100 : f32 to vector<1x1x2x128xf32>
      %108 = arith.addf %107, %89 : vector<1x1x2x128xf32>
      %109 = arith.subf %108, %87 : vector<1x1x2x128xf32>
      %cst_101 = arith.constant 0.000000e+00 : f32
      %110 = vector.broadcast %cst_101 : f32 to vector<1x1x2x128xf32>
      %111 = arith.select %106, %109, %110 : vector<1x1x2x128xi1>, vector<1x1x2x128xf32>
      %112 = arith.addf %96, %103 : vector<1x1x2x128xf32>
      %113 = arith.addf %112, %111 : vector<1x1x2x128xf32>
      %cst_102 = arith.constant 0.166666672 : f32
      %114 = vector.broadcast %cst_102 : f32 to vector<1x1x2x128xf32>
      %115 = arith.mulf %113, %114 : vector<1x1x2x128xf32>
      %cst_103 = arith.constant 1.000000e+00 : f32
      %116 = vector.broadcast %cst_103 : f32 to vector<1x1x2x128xf32>
      %117 = arith.addf %115, %116 : vector<1x1x2x128xf32>
      %118 = math.floor %117 : vector<1x1x2x128xf32>
      %119 = arith.subf %117, %118 : vector<1x1x2x128xf32>
      %120 = vector.broadcast %9 : f32 to vector<1x1x2x128xf32>
      %121 = arith.addf %119, %120 : vector<1x1x2x128xf32>
      %122 = math.floor %121 : vector<1x1x2x128xf32>
      %123 = arith.subf %121, %122 : vector<1x1x2x128xf32>
      %cst_104 = arith.constant 6.000000e+00 : f32
      %124 = vector.broadcast %cst_104 : f32 to vector<1x1x2x128xf32>
      %125 = arith.mulf %123, %124 : vector<1x1x2x128xf32>
      %126 = math.floor %125 : vector<1x1x2x128xf32>
      %127 = arith.subf %125, %126 : vector<1x1x2x128xf32>
      %128 = arith.fptosi %126 : vector<1x1x2x128xf32> to vector<1x1x2x128xi32>
      %c5_i32 = arith.constant 5 : i32
      %129 = vector.broadcast %c5_i32 : i32 to vector<1x1x2x128xi32>
      %130 = arith.cmpi sgt, %128, %129 : vector<1x1x2x128xi32>
      %c0_i32_105 = arith.constant 0 : i32
      %131 = vector.broadcast %c0_i32_105 : i32 to vector<1x1x2x128xi32>
      %132 = arith.select %130, %131, %128 : vector<1x1x2x128xi1>, vector<1x1x2x128xi32>
      %cst_106 = arith.constant 1.000000e+00 : f32
      %133 = vector.broadcast %cst_106 : f32 to vector<1x1x2x128xf32>
      %134 = arith.subf %133, %85 : vector<1x1x2x128xf32>
      %135 = arith.mulf %72, %134 : vector<1x1x2x128xf32>
      %136 = arith.mulf %85, %127 : vector<1x1x2x128xf32>
      %cst_107 = arith.constant 1.000000e+00 : f32
      %137 = vector.broadcast %cst_107 : f32 to vector<1x1x2x128xf32>
      %138 = arith.subf %137, %136 : vector<1x1x2x128xf32>
      %139 = arith.mulf %72, %138 : vector<1x1x2x128xf32>
      %cst_108 = arith.constant 1.000000e+00 : f32
      %140 = vector.broadcast %cst_108 : f32 to vector<1x1x2x128xf32>
      %141 = arith.subf %140, %127 : vector<1x1x2x128xf32>
      %142 = arith.mulf %85, %141 : vector<1x1x2x128xf32>
      %cst_109 = arith.constant 1.000000e+00 : f32
      %143 = vector.broadcast %cst_109 : f32 to vector<1x1x2x128xf32>
      %144 = arith.subf %143, %142 : vector<1x1x2x128xf32>
      %145 = arith.mulf %72, %144 : vector<1x1x2x128xf32>
      %c0_i32_110 = arith.constant 0 : i32
      %146 = vector.broadcast %c0_i32_110 : i32 to vector<1x1x2x128xi32>
      %147 = arith.cmpi eq, %132, %146 : vector<1x1x2x128xi32>
      %c1_i32_111 = arith.constant 1 : i32
      %148 = vector.broadcast %c1_i32_111 : i32 to vector<1x1x2x128xi32>
      %149 = arith.cmpi eq, %132, %148 : vector<1x1x2x128xi32>
      %c2_i32_112 = arith.constant 2 : i32
      %150 = vector.broadcast %c2_i32_112 : i32 to vector<1x1x2x128xi32>
      %151 = arith.cmpi eq, %132, %150 : vector<1x1x2x128xi32>
      %c3_i32_113 = arith.constant 3 : i32
      %152 = vector.broadcast %c3_i32_113 : i32 to vector<1x1x2x128xi32>
      %153 = arith.cmpi eq, %132, %152 : vector<1x1x2x128xi32>
      %c4_i32 = arith.constant 4 : i32
      %154 = vector.broadcast %c4_i32 : i32 to vector<1x1x2x128xi32>
      %155 = arith.cmpi eq, %132, %154 : vector<1x1x2x128xi32>
      %156 = arith.select %155, %145, %72 : vector<1x1x2x128xi1>, vector<1x1x2x128xf32>
      %157 = arith.select %153, %135, %156 : vector<1x1x2x128xi1>, vector<1x1x2x128xf32>
      %158 = arith.select %151, %135, %157 : vector<1x1x2x128xi1>, vector<1x1x2x128xf32>
      %159 = arith.select %149, %139, %158 : vector<1x1x2x128xi1>, vector<1x1x2x128xf32>
      %160 = arith.select %147, %72, %159 : vector<1x1x2x128xi1>, vector<1x1x2x128xf32>
      %c0_114 = arith.constant 0 : index
      %c0_115 = arith.constant 0 : index
      %c0_116 = arith.constant 0 : index
      %c0_117 = arith.constant 0 : index
      %161 = vector.load %arg5[%c0_114, %c0_115, %c0_116, %c0_117] : memref<1x1x2x128xf32, #tpu.memory_space<vmem>>, vector<1x1x2x128xf32>
      tpu.vector_store %arg5[%c0_114, %c0_115, %c0_116, %c0_117], %160 {strides = array<i32>} : memref<1x1x2x128xf32, #tpu.memory_space<vmem>>, vector<1x1x2x128xf32>,
      %162 = arith.select %155, %135, %135 : vector<1x1x2x128xi1>, vector<1x1x2x128xf32>
      %163 = arith.select %153, %139, %162 : vector<1x1x2x128xi1>, vector<1x1x2x128xf32>
      %164 = arith.select %151, %72, %163 : vector<1x1x2x128xi1>, vector<1x1x2x128xf32>
      %165 = arith.select %149, %72, %164 : vector<1x1x2x128xi1>, vector<1x1x2x128xf32>
      %166 = arith.select %147, %145, %165 : vector<1x1x2x128xi1>, vector<1x1x2x128xf32>
      %c0_118 = arith.constant 0 : index
      %c0_119 = arith.constant 0 : index
      %c0_120 = arith.constant 0 : index
      %c0_121 = arith.constant 0 : index
      %167 = vector.load %arg6[%c0_118, %c0_119, %c0_120, %c0_121] : memref<1x1x2x128xf32, #tpu.memory_space<vmem>>, vector<1x1x2x128xf32>
      tpu.vector_store %arg6[%c0_118, %c0_119, %c0_120, %c0_121], %166 {strides = array<i32>} : memref<1x1x2x128xf32, #tpu.memory_space<vmem>>, vector<1x1x2x128xf32>,
      %168 = arith.select %155, %72, %139 : vector<1x1x2x128xi1>, vector<1x1x2x128xf32>
      %169 = arith.select %153, %72, %168 : vector<1x1x2x128xi1>, vector<1x1x2x128xf32>
      %170 = arith.select %151, %145, %169 : vector<1x1x2x128xi1>, vector<1x1x2x128xf32>
      %171 = arith.select %149, %135, %170 : vector<1x1x2x128xi1>, vector<1x1x2x128xf32>
      %172 = arith.select %147, %135, %171 : vector<1x1x2x128xi1>, vector<1x1x2x128xf32>
      %c0_122 = arith.constant 0 : index
      %c0_123 = arith.constant 0 : index
      %c0_124 = arith.constant 0 : index
      %c0_125 = arith.constant 0 : index
      %173 = vector.load %arg7[%c0_122, %c0_123, %c0_124, %c0_125] : memref<1x1x2x128xf32, #tpu.memory_space<vmem>>, vector<1x1x2x128xf32>
      tpu.vector_store %arg7[%c0_122, %c0_123, %c0_124, %c0_125], %172 {strides = array<i32>} : memref<1x1x2x128xf32, #tpu.memory_space<vmem>>, vector<1x1x2x128xf32>,
    } else {
    }
    %c1_29 = arith.constant 1 : index
    %23 = memref.load %arg1[%c1_29] : memref<4xi32, #tpu.memory_space<smem>>
    %c0_i32_30 = arith.constant 0 : i32
    %24 = arith.cmpi eq, %23, %c0_i32_30 : i32
    %25 = arith.extui %24 : i1 to i32
    %c0_i32_31 = arith.constant 0 : i32
    %26 = arith.cmpi ne, %25, %c0_i32_31 : i32
    scf.if %26 {
      %c0_80 = arith.constant 0 : index
      %c0_81 = arith.constant 0 : index
      %c0_82 = arith.constant 0 : index
      %c0_83 = arith.constant 0 : index
      %68 = vector.load %arg5[%c0_80, %c0_81, %c0_82, %c0_83] : memref<1x1x2x128xf32, #tpu.memory_space<vmem>>, vector<1x1x2x128xf32>
      %69 = vector.broadcast %6 : f32 to vector<1x1x2x128xf32>
      %70 = arith.mulf %68, %69 : vector<1x1x2x128xf32>
      %cst = arith.constant 0.000000e+00 : f32
      %cst_84 = arith.constant 1.000000e+00 : f32
      %71 = vector.broadcast %cst : f32 to vector<1x1x2x128xf32>
      %72 = arith.maximumf %71, %70 : vector<1x1x2x128xf32>
      %73 = vector.broadcast %cst_84 : f32 to vector<1x1x2x128xf32>
      %74 = arith.minimumf %73, %72 : vector<1x1x2x128xf32>
      %c0_85 = arith.constant 0 : index
      %c0_86 = arith.constant 0 : index
      %c0_87 = arith.constant 0 : index
      %c0_88 = arith.constant 0 : index
      %75 = vector.load %arg5[%c0_85, %c0_86, %c0_87, %c0_88] : memref<1x1x2x128xf32, #tpu.memory_space<vmem>>, vector<1x1x2x128xf32>
      tpu.vector_store %arg5[%c0_85, %c0_86, %c0_87, %c0_88], %74 {strides = array<i32>} : memref<1x1x2x128xf32, #tpu.memory_space<vmem>>, vector<1x1x2x128xf32>,
      %c0_89 = arith.constant 0 : index
      %c0_90 = arith.constant 0 : index
      %c0_91 = arith.constant 0 : index
      %c0_92 = arith.constant 0 : index
      %76 = vector.load %arg6[%c0_89, %c0_90, %c0_91, %c0_92] : memref<1x1x2x128xf32, #tpu.memory_space<vmem>>, vector<1x1x2x128xf32>
      %77 = vector.broadcast %6 : f32 to vector<1x1x2x128xf32>
      %78 = arith.mulf %76, %77 : vector<1x1x2x128xf32>
      %cst_93 = arith.constant 0.000000e+00 : f32
      %cst_94 = arith.constant 1.000000e+00 : f32
      %79 = vector.broadcast %cst_93 : f32 to vector<1x1x2x128xf32>
      %80 = arith.maximumf %79, %78 : vector<1x1x2x128xf32>
      %81 = vector.broadcast %cst_94 : f32 to vector<1x1x2x128xf32>
      %82 = arith.minimumf %81, %80 : vector<1x1x2x128xf32>
      %c0_95 = arith.constant 0 : index
      %c0_96 = arith.constant 0 : index
      %c0_97 = arith.constant 0 : index
      %c0_98 = arith.constant 0 : index
      %83 = vector.load %arg6[%c0_95, %c0_96, %c0_97, %c0_98] : memref<1x1x2x128xf32, #tpu.memory_space<vmem>>, vector<1x1x2x128xf32>
      tpu.vector_store %arg6[%c0_95, %c0_96, %c0_97, %c0_98], %82 {strides = array<i32>} : memref<1x1x2x128xf32, #tpu.memory_space<vmem>>, vector<1x1x2x128xf32>,
      %c0_99 = arith.constant 0 : index
      %c0_100 = arith.constant 0 : index
      %c0_101 = arith.constant 0 : index
      %c0_102 = arith.constant 0 : index
      %84 = vector.load %arg7[%c0_99, %c0_100, %c0_101, %c0_102] : memref<1x1x2x128xf32, #tpu.memory_space<vmem>>, vector<1x1x2x128xf32>
      %85 = vector.broadcast %6 : f32 to vector<1x1x2x128xf32>
      %86 = arith.mulf %84, %85 : vector<1x1x2x128xf32>
      %cst_103 = arith.constant 0.000000e+00 : f32
      %cst_104 = arith.constant 1.000000e+00 : f32
      %87 = vector.broadcast %cst_103 : f32 to vector<1x1x2x128xf32>
      %88 = arith.maximumf %87, %86 : vector<1x1x2x128xf32>
      %89 = vector.broadcast %cst_104 : f32 to vector<1x1x2x128xf32>
      %90 = arith.minimumf %89, %88 : vector<1x1x2x128xf32>
      %c0_105 = arith.constant 0 : index
      %c0_106 = arith.constant 0 : index
      %c0_107 = arith.constant 0 : index
      %c0_108 = arith.constant 0 : index
      %91 = vector.load %arg7[%c0_105, %c0_106, %c0_107, %c0_108] : memref<1x1x2x128xf32, #tpu.memory_space<vmem>>, vector<1x1x2x128xf32>
      tpu.vector_store %arg7[%c0_105, %c0_106, %c0_107, %c0_108], %90 {strides = array<i32>} : memref<1x1x2x128xf32, #tpu.memory_space<vmem>>, vector<1x1x2x128xf32>,
    } else {
    }
    %c1_i32_32 = arith.constant 1 : i32
    %27 = arith.cmpi eq, %23, %c1_i32_32 : i32
    %28 = arith.extui %27 : i1 to i32
    %c0_i32_33 = arith.constant 0 : i32
    %29 = arith.cmpi ne, %28, %c0_i32_33 : i32
    scf.if %29 {
      %c0_80 = arith.constant 0 : index
      %c0_81 = arith.constant 0 : index
      %c0_82 = arith.constant 0 : index
      %c0_83 = arith.constant 0 : index
      %68 = vector.load %arg5[%c0_80, %c0_81, %c0_82, %c0_83] : memref<1x1x2x128xf32, #tpu.memory_space<vmem>>, vector<1x1x2x128xf32>
      %c0_84 = arith.constant 0 : index
      %c0_85 = arith.constant 0 : index
      %c0_86 = arith.constant 0 : index
      %c0_87 = arith.constant 0 : index
      %69 = vector.load %arg6[%c0_84, %c0_85, %c0_86, %c0_87] : memref<1x1x2x128xf32, #tpu.memory_space<vmem>>, vector<1x1x2x128xf32>
      %c0_88 = arith.constant 0 : index
      %c0_89 = arith.constant 0 : index
      %c0_90 = arith.constant 0 : index
      %c0_91 = arith.constant 0 : index
      %70 = vector.load %arg7[%c0_88, %c0_89, %c0_90, %c0_91] : memref<1x1x2x128xf32, #tpu.memory_space<vmem>>, vector<1x1x2x128xf32>
      %cst = arith.constant 2.989000e-01 : f32
      %71 = vector.broadcast %cst : f32 to vector<1x1x2x128xf32>
      %72 = arith.mulf %71, %68 : vector<1x1x2x128xf32>
      %cst_92 = arith.constant 5.870000e-01 : f32
      %73 = vector.broadcast %cst_92 : f32 to vector<1x1x2x128xf32>
      %74 = arith.mulf %73, %69 : vector<1x1x2x128xf32>
      %75 = arith.addf %72, %74 : vector<1x1x2x128xf32>
      %cst_93 = arith.constant 1.140000e-01 : f32
      %76 = vector.broadcast %cst_93 : f32 to vector<1x1x2x128xf32>
      %77 = arith.mulf %76, %70 : vector<1x1x2x128xf32>
      %78 = arith.addf %75, %77 : vector<1x1x2x128xf32>
      %cst_94 = arith.constant dense<0.000000e+00> : vector<1x1x2xf32>
      %79 = vector.multi_reduction <add>, %78, %cst_94 [3] : vector<1x1x2x128xf32> to vector<1x1x2xf32>
      %80 = vector.shape_cast %79 : vector<1x1x2xf32> to vector<1x1x2x1xf32>
      %cst_95 = arith.constant dense<0.000000e+00> : vector<1x1x1xf32>
      %81 = vector.multi_reduction <add>, %80, %cst_95 [2] : vector<1x1x2x1xf32> to vector<1x1x1xf32>
      %82 = vector.shape_cast %81 : vector<1x1x1xf32> to vector<1x1x1x1xf32>
      %cst_96 = arith.constant 3.906250e-03 : f32
      %83 = vector.broadcast %cst_96 : f32 to vector<1x1x1x1xf32>
      %84 = arith.mulf %82, %83 : vector<1x1x1x1xf32>
      %cst_97 = arith.constant 1.000000e+00 : f32
      %85 = arith.subf %cst_97, %7 : f32
      %86 = vector.broadcast %7 : f32 to vector<1x1x2x128xf32>
      %87 = arith.mulf %86, %68 : vector<1x1x2x128xf32>
      %88 = vector.broadcast %85 : f32 to vector<1x1x1x1xf32>
      %89 = arith.mulf %88, %84 : vector<1x1x1x1xf32>
      %90 = vector.broadcast %89 : vector<1x1x1x1xf32> to vector<1x1x2x128xf32>
      %91 = arith.addf %87, %90 : vector<1x1x2x128xf32>
      %cst_98 = arith.constant 0.000000e+00 : f32
      %cst_99 = arith.constant 1.000000e+00 : f32
      %92 = vector.broadcast %cst_98 : f32 to vector<1x1x2x128xf32>
      %93 = arith.maximumf %92, %91 : vector<1x1x2x128xf32>
      %94 = vector.broadcast %cst_99 : f32 to vector<1x1x2x128xf32>
      %95 = arith.minimumf %94, %93 : vector<1x1x2x128xf32>
      %c0_100 = arith.constant 0 : index
      %c0_101 = arith.constant 0 : index
      %c0_102 = arith.constant 0 : index
      %c0_103 = arith.constant 0 : index
      %96 = vector.load %arg5[%c0_100, %c0_101, %c0_102, %c0_103] : memref<1x1x2x128xf32, #tpu.memory_space<vmem>>, vector<1x1x2x128xf32>
      tpu.vector_store %arg5[%c0_100, %c0_101, %c0_102, %c0_103], %95 {strides = array<i32>} : memref<1x1x2x128xf32, #tpu.memory_space<vmem>>, vector<1x1x2x128xf32>,
      %97 = vector.broadcast %7 : f32 to vector<1x1x2x128xf32>
      %98 = arith.mulf %97, %69 : vector<1x1x2x128xf32>
      %99 = vector.broadcast %85 : f32 to vector<1x1x1x1xf32>
      %100 = arith.mulf %99, %84 : vector<1x1x1x1xf32>
      %101 = vector.broadcast %100 : vector<1x1x1x1xf32> to vector<1x1x2x128xf32>
      %102 = arith.addf %98, %101 : vector<1x1x2x128xf32>
      %cst_104 = arith.constant 0.000000e+00 : f32
      %cst_105 = arith.constant 1.000000e+00 : f32
      %103 = vector.broadcast %cst_104 : f32 to vector<1x1x2x128xf32>
      %104 = arith.maximumf %103, %102 : vector<1x1x2x128xf32>
      %105 = vector.broadcast %cst_105 : f32 to vector<1x1x2x128xf32>
      %106 = arith.minimumf %105, %104 : vector<1x1x2x128xf32>
      %c0_106 = arith.constant 0 : index
      %c0_107 = arith.constant 0 : index
      %c0_108 = arith.constant 0 : index
      %c0_109 = arith.constant 0 : index
      %107 = vector.load %arg6[%c0_106, %c0_107, %c0_108, %c0_109] : memref<1x1x2x128xf32, #tpu.memory_space<vmem>>, vector<1x1x2x128xf32>
      tpu.vector_store %arg6[%c0_106, %c0_107, %c0_108, %c0_109], %106 {strides = array<i32>} : memref<1x1x2x128xf32, #tpu.memory_space<vmem>>, vector<1x1x2x128xf32>,
      %108 = vector.broadcast %7 : f32 to vector<1x1x2x128xf32>
      %109 = arith.mulf %108, %70 : vector<1x1x2x128xf32>
      %110 = vector.broadcast %85 : f32 to vector<1x1x1x1xf32>
      %111 = arith.mulf %110, %84 : vector<1x1x1x1xf32>
      %112 = vector.broadcast %111 : vector<1x1x1x1xf32> to vector<1x1x2x128xf32>
      %113 = arith.addf %109, %112 : vector<1x1x2x128xf32>
      %cst_110 = arith.constant 0.000000e+00 : f32
      %cst_111 = arith.constant 1.000000e+00 : f32
      %114 = vector.broadcast %cst_110 : f32 to vector<1x1x2x128xf32>
      %115 = arith.maximumf %114, %113 : vector<1x1x2x128xf32>
      %116 = vector.broadcast %cst_111 : f32 to vector<1x1x2x128xf32>
      %117 = arith.minimumf %116, %115 : vector<1x1x2x128xf32>
      %c0_112 = arith.constant 0 : index
      %c0_113 = arith.constant 0 : index
      %c0_114 = arith.constant 0 : index
      %c0_115 = arith.constant 0 : index
      %118 = vector.load %arg7[%c0_112, %c0_113, %c0_114, %c0_115] : memref<1x1x2x128xf32, #tpu.memory_space<vmem>>, vector<1x1x2x128xf32>
      tpu.vector_store %arg7[%c0_112, %c0_113, %c0_114, %c0_115], %117 {strides = array<i32>} : memref<1x1x2x128xf32, #tpu.memory_space<vmem>>, vector<1x1x2x128xf32>,
    } else {
    }
    %c2_i32_34 = arith.constant 2 : i32
    %30 = arith.cmpi eq, %23, %c2_i32_34 : i32
    %31 = arith.extui %30 : i1 to i32
    %c0_i32_35 = arith.constant 0 : i32
    %32 = arith.cmpi ne, %31, %c0_i32_35 : i32
    scf.if %32 {
      %c0_80 = arith.constant 0 : index
      %c0_81 = arith.constant 0 : index
      %c0_82 = arith.constant 0 : index
      %c0_83 = arith.constant 0 : index
      %68 = vector.load %arg5[%c0_80, %c0_81, %c0_82, %c0_83] : memref<1x1x2x128xf32, #tpu.memory_space<vmem>>, vector<1x1x2x128xf32>
      %c0_84 = arith.constant 0 : index
      %c0_85 = arith.constant 0 : index
      %c0_86 = arith.constant 0 : index
      %c0_87 = arith.constant 0 : index
      %69 = vector.load %arg6[%c0_84, %c0_85, %c0_86, %c0_87] : memref<1x1x2x128xf32, #tpu.memory_space<vmem>>, vector<1x1x2x128xf32>
      %c0_88 = arith.constant 0 : index
      %c0_89 = arith.constant 0 : index
      %c0_90 = arith.constant 0 : index
      %c0_91 = arith.constant 0 : index
      %70 = vector.load %arg7[%c0_88, %c0_89, %c0_90, %c0_91] : memref<1x1x2x128xf32, #tpu.memory_space<vmem>>, vector<1x1x2x128xf32>
      %cst = arith.constant 2.989000e-01 : f32
      %71 = vector.broadcast %cst : f32 to vector<1x1x2x128xf32>
      %72 = arith.mulf %71, %68 : vector<1x1x2x128xf32>
      %cst_92 = arith.constant 5.870000e-01 : f32
      %73 = vector.broadcast %cst_92 : f32 to vector<1x1x2x128xf32>
      %74 = arith.mulf %73, %69 : vector<1x1x2x128xf32>
      %75 = arith.addf %72, %74 : vector<1x1x2x128xf32>
      %cst_93 = arith.constant 1.140000e-01 : f32
      %76 = vector.broadcast %cst_93 : f32 to vector<1x1x2x128xf32>
      %77 = arith.mulf %76, %70 : vector<1x1x2x128xf32>
      %78 = arith.addf %75, %77 : vector<1x1x2x128xf32>
      %cst_94 = arith.constant 1.000000e+00 : f32
      %79 = arith.subf %cst_94, %8 : f32
      %80 = vector.broadcast %8 : f32 to vector<1x1x2x128xf32>
      %81 = arith.mulf %80, %68 : vector<1x1x2x128xf32>
      %82 = vector.broadcast %79 : f32 to vector<1x1x2x128xf32>
      %83 = arith.mulf %82, %78 : vector<1x1x2x128xf32>
      %84 = arith.addf %81, %83 : vector<1x1x2x128xf32>
      %cst_95 = arith.constant 0.000000e+00 : f32
      %cst_96 = arith.constant 1.000000e+00 : f32
      %85 = vector.broadcast %cst_95 : f32 to vector<1x1x2x128xf32>
      %86 = arith.maximumf %85, %84 : vector<1x1x2x128xf32>
      %87 = vector.broadcast %cst_96 : f32 to vector<1x1x2x128xf32>
      %88 = arith.minimumf %87, %86 : vector<1x1x2x128xf32>
      %c0_97 = arith.constant 0 : index
      %c0_98 = arith.constant 0 : index
      %c0_99 = arith.constant 0 : index
      %c0_100 = arith.constant 0 : index
      %89 = vector.load %arg5[%c0_97, %c0_98, %c0_99, %c0_100] : memref<1x1x2x128xf32, #tpu.memory_space<vmem>>, vector<1x1x2x128xf32>
      tpu.vector_store %arg5[%c0_97, %c0_98, %c0_99, %c0_100], %88 {strides = array<i32>} : memref<1x1x2x128xf32, #tpu.memory_space<vmem>>, vector<1x1x2x128xf32>,
      %90 = vector.broadcast %8 : f32 to vector<1x1x2x128xf32>
      %91 = arith.mulf %90, %69 : vector<1x1x2x128xf32>
      %92 = vector.broadcast %79 : f32 to vector<1x1x2x128xf32>
      %93 = arith.mulf %92, %78 : vector<1x1x2x128xf32>
      %94 = arith.addf %91, %93 : vector<1x1x2x128xf32>
      %cst_101 = arith.constant 0.000000e+00 : f32
      %cst_102 = arith.constant 1.000000e+00 : f32
      %95 = vector.broadcast %cst_101 : f32 to vector<1x1x2x128xf32>
      %96 = arith.maximumf %95, %94 : vector<1x1x2x128xf32>
      %97 = vector.broadcast %cst_102 : f32 to vector<1x1x2x128xf32>
      %98 = arith.minimumf %97, %96 : vector<1x1x2x128xf32>
      %c0_103 = arith.constant 0 : index
      %c0_104 = arith.constant 0 : index
      %c0_105 = arith.constant 0 : index
      %c0_106 = arith.constant 0 : index
      %99 = vector.load %arg6[%c0_103, %c0_104, %c0_105, %c0_106] : memref<1x1x2x128xf32, #tpu.memory_space<vmem>>, vector<1x1x2x128xf32>
      tpu.vector_store %arg6[%c0_103, %c0_104, %c0_105, %c0_106], %98 {strides = array<i32>} : memref<1x1x2x128xf32, #tpu.memory_space<vmem>>, vector<1x1x2x128xf32>,
      %100 = vector.broadcast %8 : f32 to vector<1x1x2x128xf32>
      %101 = arith.mulf %100, %70 : vector<1x1x2x128xf32>
      %102 = vector.broadcast %79 : f32 to vector<1x1x2x128xf32>
      %103 = arith.mulf %102, %78 : vector<1x1x2x128xf32>
      %104 = arith.addf %101, %103 : vector<1x1x2x128xf32>
      %cst_107 = arith.constant 0.000000e+00 : f32
      %cst_108 = arith.constant 1.000000e+00 : f32
      %105 = vector.broadcast %cst_107 : f32 to vector<1x1x2x128xf32>
      %106 = arith.maximumf %105, %104 : vector<1x1x2x128xf32>
      %107 = vector.broadcast %cst_108 : f32 to vector<1x1x2x128xf32>
      %108 = arith.minimumf %107, %106 : vector<1x1x2x128xf32>
      %c0_109 = arith.constant 0 : index
      %c0_110 = arith.constant 0 : index
      %c0_111 = arith.constant 0 : index
      %c0_112 = arith.constant 0 : index
      %109 = vector.load %arg7[%c0_109, %c0_110, %c0_111, %c0_112] : memref<1x1x2x128xf32, #tpu.memory_space<vmem>>, vector<1x1x2x128xf32>
      tpu.vector_store %arg7[%c0_109, %c0_110, %c0_111, %c0_112], %108 {strides = array<i32>} : memref<1x1x2x128xf32, #tpu.memory_space<vmem>>, vector<1x1x2x128xf32>,
    } else {
    }
    %c3_i32_36 = arith.constant 3 : i32
    %33 = arith.cmpi eq, %23, %c3_i32_36 : i32
    %34 = arith.extui %33 : i1 to i32
    %c0_i32_37 = arith.constant 0 : i32
    %35 = arith.cmpi ne, %34, %c0_i32_37 : i32
    scf.if %35 {
      %c0_80 = arith.constant 0 : index
      %c0_81 = arith.constant 0 : index
      %c0_82 = arith.constant 0 : index
      %c0_83 = arith.constant 0 : index
      %68 = vector.load %arg5[%c0_80, %c0_81, %c0_82, %c0_83] : memref<1x1x2x128xf32, #tpu.memory_space<vmem>>, vector<1x1x2x128xf32>
      %c0_84 = arith.constant 0 : index
      %c0_85 = arith.constant 0 : index
      %c0_86 = arith.constant 0 : index
      %c0_87 = arith.constant 0 : index
      %69 = vector.load %arg6[%c0_84, %c0_85, %c0_86, %c0_87] : memref<1x1x2x128xf32, #tpu.memory_space<vmem>>, vector<1x1x2x128xf32>
      %c0_88 = arith.constant 0 : index
      %c0_89 = arith.constant 0 : index
      %c0_90 = arith.constant 0 : index
      %c0_91 = arith.constant 0 : index
      %70 = vector.load %arg7[%c0_88, %c0_89, %c0_90, %c0_91] : memref<1x1x2x128xf32, #tpu.memory_space<vmem>>, vector<1x1x2x128xf32>
      %71 = arith.maximumf %68, %69 : vector<1x1x2x128xf32>
      %72 = arith.maximumf %71, %70 : vector<1x1x2x128xf32>
      %73 = arith.minimumf %68, %69 : vector<1x1x2x128xf32>
      %74 = arith.minimumf %73, %70 : vector<1x1x2x128xf32>
      %75 = arith.cmpf oeq, %72, %74 : vector<1x1x2x128xf32>
      %76 = arith.subf %72, %74 : vector<1x1x2x128xf32>
      %cst = arith.constant 1.000000e+00 : f32
      %77 = vector.broadcast %cst : f32 to vector<1x1x2x128xf32>
      %78 = arith.select %75, %77, %72 : vector<1x1x2x128xi1>, vector<1x1x2x128xf32>
      %79 = tpu.reciprocal %78 {approx = true} : vector<1x1x2x128xf32> -> vector<1x1x2x128xf32>
      %cst_92 = arith.constant 1.000000e+00 : f32
      %80 = vector.broadcast %cst_92 : f32 to vector<1x1x2x128xf32>
      %81 = arith.select %75, %80, %76 : vector<1x1x2x128xi1>, vector<1x1x2x128xf32>
      %82 = tpu.reciprocal %81 {approx = true} : vector<1x1x2x128xf32> -> vector<1x1x2x128xf32>
      %83 = arith.mulf %76, %79 : vector<1x1x2x128xf32>
      %cst_93 = arith.constant 1.000000e+00 : f32
      %84 = vector.broadcast %cst_93 : f32 to vector<1x1x2x128xf32>
      %85 = arith.minimumf %83, %84 : vector<1x1x2x128xf32>
      %86 = arith.subf %72, %68 : vector<1x1x2x128xf32>
      %87 = arith.mulf %86, %82 : vector<1x1x2x128xf32>
      %88 = arith.subf %72, %69 : vector<1x1x2x128xf32>
      %89 = arith.mulf %88, %82 : vector<1x1x2x128xf32>
      %90 = arith.subf %72, %70 : vector<1x1x2x128xf32>
      %91 = arith.mulf %90, %82 : vector<1x1x2x128xf32>
      %92 = arith.cmpf oeq, %72, %68 : vector<1x1x2x128xf32>
      %93 = arith.cmpf oeq, %72, %69 : vector<1x1x2x128xf32>
      %94 = arith.subf %91, %89 : vector<1x1x2x128xf32>
      %cst_94 = arith.constant 0.000000e+00 : f32
      %95 = vector.broadcast %cst_94 : f32 to vector<1x1x2x128xf32>
      %96 = arith.select %92, %94, %95 : vector<1x1x2x128xi1>, vector<1x1x2x128xf32>
      %cst_95 = arith.constant dense<true> : vector<1x1x2x128xi1>
      %97 = arith.xori %92, %cst_95 : vector<1x1x2x128xi1>
      %98 = arith.andi %93, %97 : vector<1x1x2x128xi1>
      %cst_96 = arith.constant 2.000000e+00 : f32
      %99 = vector.broadcast %cst_96 : f32 to vector<1x1x2x128xf32>
      %100 = arith.addf %99, %87 : vector<1x1x2x128xf32>
      %101 = arith.subf %100, %91 : vector<1x1x2x128xf32>
      %cst_97 = arith.constant 0.000000e+00 : f32
      %102 = vector.broadcast %cst_97 : f32 to vector<1x1x2x128xf32>
      %103 = arith.select %98, %101, %102 : vector<1x1x2x128xi1>, vector<1x1x2x128xf32>
      %cst_98 = arith.constant dense<true> : vector<1x1x2x128xi1>
      %104 = arith.xori %93, %cst_98 : vector<1x1x2x128xi1>
      %cst_99 = arith.constant dense<true> : vector<1x1x2x128xi1>
      %105 = arith.xori %92, %cst_99 : vector<1x1x2x128xi1>
      %106 = arith.andi %104, %105 : vector<1x1x2x128xi1>
      %cst_100 = arith.constant 4.000000e+00 : f32
      %107 = vector.broadcast %cst_100 : f32 to vector<1x1x2x128xf32>
      %108 = arith.addf %107, %89 : vector<1x1x2x128xf32>
      %109 = arith.subf %108, %87 : vector<1x1x2x128xf32>
      %cst_101 = arith.constant 0.000000e+00 : f32
      %110 = vector.broadcast %cst_101 : f32 to vector<1x1x2x128xf32>
      %111 = arith.select %106, %109, %110 : vector<1x1x2x128xi1>, vector<1x1x2x128xf32>
      %112 = arith.addf %96, %103 : vector<1x1x2x128xf32>
      %113 = arith.addf %112, %111 : vector<1x1x2x128xf32>
      %cst_102 = arith.constant 0.166666672 : f32
      %114 = vector.broadcast %cst_102 : f32 to vector<1x1x2x128xf32>
      %115 = arith.mulf %113, %114 : vector<1x1x2x128xf32>
      %cst_103 = arith.constant 1.000000e+00 : f32
      %116 = vector.broadcast %cst_103 : f32 to vector<1x1x2x128xf32>
      %117 = arith.addf %115, %116 : vector<1x1x2x128xf32>
      %118 = math.floor %117 : vector<1x1x2x128xf32>
      %119 = arith.subf %117, %118 : vector<1x1x2x128xf32>
      %120 = vector.broadcast %9 : f32 to vector<1x1x2x128xf32>
      %121 = arith.addf %119, %120 : vector<1x1x2x128xf32>
      %122 = math.floor %121 : vector<1x1x2x128xf32>
      %123 = arith.subf %121, %122 : vector<1x1x2x128xf32>
      %cst_104 = arith.constant 6.000000e+00 : f32
      %124 = vector.broadcast %cst_104 : f32 to vector<1x1x2x128xf32>
      %125 = arith.mulf %123, %124 : vector<1x1x2x128xf32>
      %126 = math.floor %125 : vector<1x1x2x128xf32>
      %127 = arith.subf %125, %126 : vector<1x1x2x128xf32>
      %128 = arith.fptosi %126 : vector<1x1x2x128xf32> to vector<1x1x2x128xi32>
      %c5_i32 = arith.constant 5 : i32
      %129 = vector.broadcast %c5_i32 : i32 to vector<1x1x2x128xi32>
      %130 = arith.cmpi sgt, %128, %129 : vector<1x1x2x128xi32>
      %c0_i32_105 = arith.constant 0 : i32
      %131 = vector.broadcast %c0_i32_105 : i32 to vector<1x1x2x128xi32>
      %132 = arith.select %130, %131, %128 : vector<1x1x2x128xi1>, vector<1x1x2x128xi32>
      %cst_106 = arith.constant 1.000000e+00 : f32
      %133 = vector.broadcast %cst_106 : f32 to vector<1x1x2x128xf32>
      %134 = arith.subf %133, %85 : vector<1x1x2x128xf32>
      %135 = arith.mulf %72, %134 : vector<1x1x2x128xf32>
      %136 = arith.mulf %85, %127 : vector<1x1x2x128xf32>
      %cst_107 = arith.constant 1.000000e+00 : f32
      %137 = vector.broadcast %cst_107 : f32 to vector<1x1x2x128xf32>
      %138 = arith.subf %137, %136 : vector<1x1x2x128xf32>
      %139 = arith.mulf %72, %138 : vector<1x1x2x128xf32>
      %cst_108 = arith.constant 1.000000e+00 : f32
      %140 = vector.broadcast %cst_108 : f32 to vector<1x1x2x128xf32>
      %141 = arith.subf %140, %127 : vector<1x1x2x128xf32>
      %142 = arith.mulf %85, %141 : vector<1x1x2x128xf32>
      %cst_109 = arith.constant 1.000000e+00 : f32
      %143 = vector.broadcast %cst_109 : f32 to vector<1x1x2x128xf32>
      %144 = arith.subf %143, %142 : vector<1x1x2x128xf32>
      %145 = arith.mulf %72, %144 : vector<1x1x2x128xf32>
      %c0_i32_110 = arith.constant 0 : i32
      %146 = vector.broadcast %c0_i32_110 : i32 to vector<1x1x2x128xi32>
      %147 = arith.cmpi eq, %132, %146 : vector<1x1x2x128xi32>
      %c1_i32_111 = arith.constant 1 : i32
      %148 = vector.broadcast %c1_i32_111 : i32 to vector<1x1x2x128xi32>
      %149 = arith.cmpi eq, %132, %148 : vector<1x1x2x128xi32>
      %c2_i32_112 = arith.constant 2 : i32
      %150 = vector.broadcast %c2_i32_112 : i32 to vector<1x1x2x128xi32>
      %151 = arith.cmpi eq, %132, %150 : vector<1x1x2x128xi32>
      %c3_i32_113 = arith.constant 3 : i32
      %152 = vector.broadcast %c3_i32_113 : i32 to vector<1x1x2x128xi32>
      %153 = arith.cmpi eq, %132, %152 : vector<1x1x2x128xi32>
      %c4_i32 = arith.constant 4 : i32
      %154 = vector.broadcast %c4_i32 : i32 to vector<1x1x2x128xi32>
      %155 = arith.cmpi eq, %132, %154 : vector<1x1x2x128xi32>
      %156 = arith.select %155, %145, %72 : vector<1x1x2x128xi1>, vector<1x1x2x128xf32>
      %157 = arith.select %153, %135, %156 : vector<1x1x2x128xi1>, vector<1x1x2x128xf32>
      %158 = arith.select %151, %135, %157 : vector<1x1x2x128xi1>, vector<1x1x2x128xf32>
      %159 = arith.select %149, %139, %158 : vector<1x1x2x128xi1>, vector<1x1x2x128xf32>
      %160 = arith.select %147, %72, %159 : vector<1x1x2x128xi1>, vector<1x1x2x128xf32>
      %c0_114 = arith.constant 0 : index
      %c0_115 = arith.constant 0 : index
      %c0_116 = arith.constant 0 : index
      %c0_117 = arith.constant 0 : index
      %161 = vector.load %arg5[%c0_114, %c0_115, %c0_116, %c0_117] : memref<1x1x2x128xf32, #tpu.memory_space<vmem>>, vector<1x1x2x128xf32>
      tpu.vector_store %arg5[%c0_114, %c0_115, %c0_116, %c0_117], %160 {strides = array<i32>} : memref<1x1x2x128xf32, #tpu.memory_space<vmem>>, vector<1x1x2x128xf32>,
      %162 = arith.select %155, %135, %135 : vector<1x1x2x128xi1>, vector<1x1x2x128xf32>
      %163 = arith.select %153, %139, %162 : vector<1x1x2x128xi1>, vector<1x1x2x128xf32>
      %164 = arith.select %151, %72, %163 : vector<1x1x2x128xi1>, vector<1x1x2x128xf32>
      %165 = arith.select %149, %72, %164 : vector<1x1x2x128xi1>, vector<1x1x2x128xf32>
      %166 = arith.select %147, %145, %165 : vector<1x1x2x128xi1>, vector<1x1x2x128xf32>
      %c0_118 = arith.constant 0 : index
      %c0_119 = arith.constant 0 : index
      %c0_120 = arith.constant 0 : index
      %c0_121 = arith.constant 0 : index
      %167 = vector.load %arg6[%c0_118, %c0_119, %c0_120, %c0_121] : memref<1x1x2x128xf32, #tpu.memory_space<vmem>>, vector<1x1x2x128xf32>
      tpu.vector_store %arg6[%c0_118, %c0_119, %c0_120, %c0_121], %166 {strides = array<i32>} : memref<1x1x2x128xf32, #tpu.memory_space<vmem>>, vector<1x1x2x128xf32>,
      %168 = arith.select %155, %72, %139 : vector<1x1x2x128xi1>, vector<1x1x2x128xf32>
      %169 = arith.select %153, %72, %168 : vector<1x1x2x128xi1>, vector<1x1x2x128xf32>
      %170 = arith.select %151, %145, %169 : vector<1x1x2x128xi1>, vector<1x1x2x128xf32>
      %171 = arith.select %149, %135, %170 : vector<1x1x2x128xi1>, vector<1x1x2x128xf32>
      %172 = arith.select %147, %135, %171 : vector<1x1x2x128xi1>, vector<1x1x2x128xf32>
      %c0_122 = arith.constant 0 : index
      %c0_123 = arith.constant 0 : index
      %c0_124 = arith.constant 0 : index
      %c0_125 = arith.constant 0 : index
      %173 = vector.load %arg7[%c0_122, %c0_123, %c0_124, %c0_125] : memref<1x1x2x128xf32, #tpu.memory_space<vmem>>, vector<1x1x2x128xf32>
      tpu.vector_store %arg7[%c0_122, %c0_123, %c0_124, %c0_125], %172 {strides = array<i32>} : memref<1x1x2x128xf32, #tpu.memory_space<vmem>>, vector<1x1x2x128xf32>,
    } else {
    }
    %c2_38 = arith.constant 2 : index
    %36 = memref.load %arg1[%c2_38] : memref<4xi32, #tpu.memory_space<smem>>
    %c0_i32_39 = arith.constant 0 : i32
    %37 = arith.cmpi eq, %36, %c0_i32_39 : i32
    %38 = arith.extui %37 : i1 to i32
    %c0_i32_40 = arith.constant 0 : i32
    %39 = arith.cmpi ne, %38, %c0_i32_40 : i32
    scf.if %39 {
      %c0_80 = arith.constant 0 : index
      %c0_81 = arith.constant 0 : index
      %c0_82 = arith.constant 0 : index
      %c0_83 = arith.constant 0 : index
      %68 = vector.load %arg5[%c0_80, %c0_81, %c0_82, %c0_83] : memref<1x1x2x128xf32, #tpu.memory_space<vmem>>, vector<1x1x2x128xf32>
      %69 = vector.broadcast %6 : f32 to vector<1x1x2x128xf32>
      %70 = arith.mulf %68, %69 : vector<1x1x2x128xf32>
      %cst = arith.constant 0.000000e+00 : f32
      %cst_84 = arith.constant 1.000000e+00 : f32
      %71 = vector.broadcast %cst : f32 to vector<1x1x2x128xf32>
      %72 = arith.maximumf %71, %70 : vector<1x1x2x128xf32>
      %73 = vector.broadcast %cst_84 : f32 to vector<1x1x2x128xf32>
      %74 = arith.minimumf %73, %72 : vector<1x1x2x128xf32>
      %c0_85 = arith.constant 0 : index
      %c0_86 = arith.constant 0 : index
      %c0_87 = arith.constant 0 : index
      %c0_88 = arith.constant 0 : index
      %75 = vector.load %arg5[%c0_85, %c0_86, %c0_87, %c0_88] : memref<1x1x2x128xf32, #tpu.memory_space<vmem>>, vector<1x1x2x128xf32>
      tpu.vector_store %arg5[%c0_85, %c0_86, %c0_87, %c0_88], %74 {strides = array<i32>} : memref<1x1x2x128xf32, #tpu.memory_space<vmem>>, vector<1x1x2x128xf32>,
      %c0_89 = arith.constant 0 : index
      %c0_90 = arith.constant 0 : index
      %c0_91 = arith.constant 0 : index
      %c0_92 = arith.constant 0 : index
      %76 = vector.load %arg6[%c0_89, %c0_90, %c0_91, %c0_92] : memref<1x1x2x128xf32, #tpu.memory_space<vmem>>, vector<1x1x2x128xf32>
      %77 = vector.broadcast %6 : f32 to vector<1x1x2x128xf32>
      %78 = arith.mulf %76, %77 : vector<1x1x2x128xf32>
      %cst_93 = arith.constant 0.000000e+00 : f32
      %cst_94 = arith.constant 1.000000e+00 : f32
      %79 = vector.broadcast %cst_93 : f32 to vector<1x1x2x128xf32>
      %80 = arith.maximumf %79, %78 : vector<1x1x2x128xf32>
      %81 = vector.broadcast %cst_94 : f32 to vector<1x1x2x128xf32>
      %82 = arith.minimumf %81, %80 : vector<1x1x2x128xf32>
      %c0_95 = arith.constant 0 : index
      %c0_96 = arith.constant 0 : index
      %c0_97 = arith.constant 0 : index
      %c0_98 = arith.constant 0 : index
      %83 = vector.load %arg6[%c0_95, %c0_96, %c0_97, %c0_98] : memref<1x1x2x128xf32, #tpu.memory_space<vmem>>, vector<1x1x2x128xf32>
      tpu.vector_store %arg6[%c0_95, %c0_96, %c0_97, %c0_98], %82 {strides = array<i32>} : memref<1x1x2x128xf32, #tpu.memory_space<vmem>>, vector<1x1x2x128xf32>,
      %c0_99 = arith.constant 0 : index
      %c0_100 = arith.constant 0 : index
      %c0_101 = arith.constant 0 : index
      %c0_102 = arith.constant 0 : index
      %84 = vector.load %arg7[%c0_99, %c0_100, %c0_101, %c0_102] : memref<1x1x2x128xf32, #tpu.memory_space<vmem>>, vector<1x1x2x128xf32>
      %85 = vector.broadcast %6 : f32 to vector<1x1x2x128xf32>
      %86 = arith.mulf %84, %85 : vector<1x1x2x128xf32>
      %cst_103 = arith.constant 0.000000e+00 : f32
      %cst_104 = arith.constant 1.000000e+00 : f32
      %87 = vector.broadcast %cst_103 : f32 to vector<1x1x2x128xf32>
      %88 = arith.maximumf %87, %86 : vector<1x1x2x128xf32>
      %89 = vector.broadcast %cst_104 : f32 to vector<1x1x2x128xf32>
      %90 = arith.minimumf %89, %88 : vector<1x1x2x128xf32>
      %c0_105 = arith.constant 0 : index
      %c0_106 = arith.constant 0 : index
      %c0_107 = arith.constant 0 : index
      %c0_108 = arith.constant 0 : index
      %91 = vector.load %arg7[%c0_105, %c0_106, %c0_107, %c0_108] : memref<1x1x2x128xf32, #tpu.memory_space<vmem>>, vector<1x1x2x128xf32>
      tpu.vector_store %arg7[%c0_105, %c0_106, %c0_107, %c0_108], %90 {strides = array<i32>} : memref<1x1x2x128xf32, #tpu.memory_space<vmem>>, vector<1x1x2x128xf32>,
    } else {
    }
    %c1_i32_41 = arith.constant 1 : i32
    %40 = arith.cmpi eq, %36, %c1_i32_41 : i32
    %41 = arith.extui %40 : i1 to i32
    %c0_i32_42 = arith.constant 0 : i32
    %42 = arith.cmpi ne, %41, %c0_i32_42 : i32
    scf.if %42 {
      %c0_80 = arith.constant 0 : index
      %c0_81 = arith.constant 0 : index
      %c0_82 = arith.constant 0 : index
      %c0_83 = arith.constant 0 : index
      %68 = vector.load %arg5[%c0_80, %c0_81, %c0_82, %c0_83] : memref<1x1x2x128xf32, #tpu.memory_space<vmem>>, vector<1x1x2x128xf32>
      %c0_84 = arith.constant 0 : index
      %c0_85 = arith.constant 0 : index
      %c0_86 = arith.constant 0 : index
      %c0_87 = arith.constant 0 : index
      %69 = vector.load %arg6[%c0_84, %c0_85, %c0_86, %c0_87] : memref<1x1x2x128xf32, #tpu.memory_space<vmem>>, vector<1x1x2x128xf32>
      %c0_88 = arith.constant 0 : index
      %c0_89 = arith.constant 0 : index
      %c0_90 = arith.constant 0 : index
      %c0_91 = arith.constant 0 : index
      %70 = vector.load %arg7[%c0_88, %c0_89, %c0_90, %c0_91] : memref<1x1x2x128xf32, #tpu.memory_space<vmem>>, vector<1x1x2x128xf32>
      %cst = arith.constant 2.989000e-01 : f32
      %71 = vector.broadcast %cst : f32 to vector<1x1x2x128xf32>
      %72 = arith.mulf %71, %68 : vector<1x1x2x128xf32>
      %cst_92 = arith.constant 5.870000e-01 : f32
      %73 = vector.broadcast %cst_92 : f32 to vector<1x1x2x128xf32>
      %74 = arith.mulf %73, %69 : vector<1x1x2x128xf32>
      %75 = arith.addf %72, %74 : vector<1x1x2x128xf32>
      %cst_93 = arith.constant 1.140000e-01 : f32
      %76 = vector.broadcast %cst_93 : f32 to vector<1x1x2x128xf32>
      %77 = arith.mulf %76, %70 : vector<1x1x2x128xf32>
      %78 = arith.addf %75, %77 : vector<1x1x2x128xf32>
      %cst_94 = arith.constant dense<0.000000e+00> : vector<1x1x2xf32>
      %79 = vector.multi_reduction <add>, %78, %cst_94 [3] : vector<1x1x2x128xf32> to vector<1x1x2xf32>
      %80 = vector.shape_cast %79 : vector<1x1x2xf32> to vector<1x1x2x1xf32>
      %cst_95 = arith.constant dense<0.000000e+00> : vector<1x1x1xf32>
      %81 = vector.multi_reduction <add>, %80, %cst_95 [2] : vector<1x1x2x1xf32> to vector<1x1x1xf32>
      %82 = vector.shape_cast %81 : vector<1x1x1xf32> to vector<1x1x1x1xf32>
      %cst_96 = arith.constant 3.906250e-03 : f32
      %83 = vector.broadcast %cst_96 : f32 to vector<1x1x1x1xf32>
      %84 = arith.mulf %82, %83 : vector<1x1x1x1xf32>
      %cst_97 = arith.constant 1.000000e+00 : f32
      %85 = arith.subf %cst_97, %7 : f32
      %86 = vector.broadcast %7 : f32 to vector<1x1x2x128xf32>
      %87 = arith.mulf %86, %68 : vector<1x1x2x128xf32>
      %88 = vector.broadcast %85 : f32 to vector<1x1x1x1xf32>
      %89 = arith.mulf %88, %84 : vector<1x1x1x1xf32>
      %90 = vector.broadcast %89 : vector<1x1x1x1xf32> to vector<1x1x2x128xf32>
      %91 = arith.addf %87, %90 : vector<1x1x2x128xf32>
      %cst_98 = arith.constant 0.000000e+00 : f32
      %cst_99 = arith.constant 1.000000e+00 : f32
      %92 = vector.broadcast %cst_98 : f32 to vector<1x1x2x128xf32>
      %93 = arith.maximumf %92, %91 : vector<1x1x2x128xf32>
      %94 = vector.broadcast %cst_99 : f32 to vector<1x1x2x128xf32>
      %95 = arith.minimumf %94, %93 : vector<1x1x2x128xf32>
      %c0_100 = arith.constant 0 : index
      %c0_101 = arith.constant 0 : index
      %c0_102 = arith.constant 0 : index
      %c0_103 = arith.constant 0 : index
      %96 = vector.load %arg5[%c0_100, %c0_101, %c0_102, %c0_103] : memref<1x1x2x128xf32, #tpu.memory_space<vmem>>, vector<1x1x2x128xf32>
      tpu.vector_store %arg5[%c0_100, %c0_101, %c0_102, %c0_103], %95 {strides = array<i32>} : memref<1x1x2x128xf32, #tpu.memory_space<vmem>>, vector<1x1x2x128xf32>,
      %97 = vector.broadcast %7 : f32 to vector<1x1x2x128xf32>
      %98 = arith.mulf %97, %69 : vector<1x1x2x128xf32>
      %99 = vector.broadcast %85 : f32 to vector<1x1x1x1xf32>
      %100 = arith.mulf %99, %84 : vector<1x1x1x1xf32>
      %101 = vector.broadcast %100 : vector<1x1x1x1xf32> to vector<1x1x2x128xf32>
      %102 = arith.addf %98, %101 : vector<1x1x2x128xf32>
      %cst_104 = arith.constant 0.000000e+00 : f32
      %cst_105 = arith.constant 1.000000e+00 : f32
      %103 = vector.broadcast %cst_104 : f32 to vector<1x1x2x128xf32>
      %104 = arith.maximumf %103, %102 : vector<1x1x2x128xf32>
      %105 = vector.broadcast %cst_105 : f32 to vector<1x1x2x128xf32>
      %106 = arith.minimumf %105, %104 : vector<1x1x2x128xf32>
      %c0_106 = arith.constant 0 : index
      %c0_107 = arith.constant 0 : index
      %c0_108 = arith.constant 0 : index
      %c0_109 = arith.constant 0 : index
      %107 = vector.load %arg6[%c0_106, %c0_107, %c0_108, %c0_109] : memref<1x1x2x128xf32, #tpu.memory_space<vmem>>, vector<1x1x2x128xf32>
      tpu.vector_store %arg6[%c0_106, %c0_107, %c0_108, %c0_109], %106 {strides = array<i32>} : memref<1x1x2x128xf32, #tpu.memory_space<vmem>>, vector<1x1x2x128xf32>,
      %108 = vector.broadcast %7 : f32 to vector<1x1x2x128xf32>
      %109 = arith.mulf %108, %70 : vector<1x1x2x128xf32>
      %110 = vector.broadcast %85 : f32 to vector<1x1x1x1xf32>
      %111 = arith.mulf %110, %84 : vector<1x1x1x1xf32>
      %112 = vector.broadcast %111 : vector<1x1x1x1xf32> to vector<1x1x2x128xf32>
      %113 = arith.addf %109, %112 : vector<1x1x2x128xf32>
      %cst_110 = arith.constant 0.000000e+00 : f32
      %cst_111 = arith.constant 1.000000e+00 : f32
      %114 = vector.broadcast %cst_110 : f32 to vector<1x1x2x128xf32>
      %115 = arith.maximumf %114, %113 : vector<1x1x2x128xf32>
      %116 = vector.broadcast %cst_111 : f32 to vector<1x1x2x128xf32>
      %117 = arith.minimumf %116, %115 : vector<1x1x2x128xf32>
      %c0_112 = arith.constant 0 : index
      %c0_113 = arith.constant 0 : index
      %c0_114 = arith.constant 0 : index
      %c0_115 = arith.constant 0 : index
      %118 = vector.load %arg7[%c0_112, %c0_113, %c0_114, %c0_115] : memref<1x1x2x128xf32, #tpu.memory_space<vmem>>, vector<1x1x2x128xf32>
      tpu.vector_store %arg7[%c0_112, %c0_113, %c0_114, %c0_115], %117 {strides = array<i32>} : memref<1x1x2x128xf32, #tpu.memory_space<vmem>>, vector<1x1x2x128xf32>,
    } else {
    }
    %c2_i32_43 = arith.constant 2 : i32
    %43 = arith.cmpi eq, %36, %c2_i32_43 : i32
    %44 = arith.extui %43 : i1 to i32
    %c0_i32_44 = arith.constant 0 : i32
    %45 = arith.cmpi ne, %44, %c0_i32_44 : i32
    scf.if %45 {
      %c0_80 = arith.constant 0 : index
      %c0_81 = arith.constant 0 : index
      %c0_82 = arith.constant 0 : index
      %c0_83 = arith.constant 0 : index
      %68 = vector.load %arg5[%c0_80, %c0_81, %c0_82, %c0_83] : memref<1x1x2x128xf32, #tpu.memory_space<vmem>>, vector<1x1x2x128xf32>
      %c0_84 = arith.constant 0 : index
      %c0_85 = arith.constant 0 : index
      %c0_86 = arith.constant 0 : index
      %c0_87 = arith.constant 0 : index
      %69 = vector.load %arg6[%c0_84, %c0_85, %c0_86, %c0_87] : memref<1x1x2x128xf32, #tpu.memory_space<vmem>>, vector<1x1x2x128xf32>
      %c0_88 = arith.constant 0 : index
      %c0_89 = arith.constant 0 : index
      %c0_90 = arith.constant 0 : index
      %c0_91 = arith.constant 0 : index
      %70 = vector.load %arg7[%c0_88, %c0_89, %c0_90, %c0_91] : memref<1x1x2x128xf32, #tpu.memory_space<vmem>>, vector<1x1x2x128xf32>
      %cst = arith.constant 2.989000e-01 : f32
      %71 = vector.broadcast %cst : f32 to vector<1x1x2x128xf32>
      %72 = arith.mulf %71, %68 : vector<1x1x2x128xf32>
      %cst_92 = arith.constant 5.870000e-01 : f32
      %73 = vector.broadcast %cst_92 : f32 to vector<1x1x2x128xf32>
      %74 = arith.mulf %73, %69 : vector<1x1x2x128xf32>
      %75 = arith.addf %72, %74 : vector<1x1x2x128xf32>
      %cst_93 = arith.constant 1.140000e-01 : f32
      %76 = vector.broadcast %cst_93 : f32 to vector<1x1x2x128xf32>
      %77 = arith.mulf %76, %70 : vector<1x1x2x128xf32>
      %78 = arith.addf %75, %77 : vector<1x1x2x128xf32>
      %cst_94 = arith.constant 1.000000e+00 : f32
      %79 = arith.subf %cst_94, %8 : f32
      %80 = vector.broadcast %8 : f32 to vector<1x1x2x128xf32>
      %81 = arith.mulf %80, %68 : vector<1x1x2x128xf32>
      %82 = vector.broadcast %79 : f32 to vector<1x1x2x128xf32>
      %83 = arith.mulf %82, %78 : vector<1x1x2x128xf32>
      %84 = arith.addf %81, %83 : vector<1x1x2x128xf32>
      %cst_95 = arith.constant 0.000000e+00 : f32
      %cst_96 = arith.constant 1.000000e+00 : f32
      %85 = vector.broadcast %cst_95 : f32 to vector<1x1x2x128xf32>
      %86 = arith.maximumf %85, %84 : vector<1x1x2x128xf32>
      %87 = vector.broadcast %cst_96 : f32 to vector<1x1x2x128xf32>
      %88 = arith.minimumf %87, %86 : vector<1x1x2x128xf32>
      %c0_97 = arith.constant 0 : index
      %c0_98 = arith.constant 0 : index
      %c0_99 = arith.constant 0 : index
      %c0_100 = arith.constant 0 : index
      %89 = vector.load %arg5[%c0_97, %c0_98, %c0_99, %c0_100] : memref<1x1x2x128xf32, #tpu.memory_space<vmem>>, vector<1x1x2x128xf32>
      tpu.vector_store %arg5[%c0_97, %c0_98, %c0_99, %c0_100], %88 {strides = array<i32>} : memref<1x1x2x128xf32, #tpu.memory_space<vmem>>, vector<1x1x2x128xf32>,
      %90 = vector.broadcast %8 : f32 to vector<1x1x2x128xf32>
      %91 = arith.mulf %90, %69 : vector<1x1x2x128xf32>
      %92 = vector.broadcast %79 : f32 to vector<1x1x2x128xf32>
      %93 = arith.mulf %92, %78 : vector<1x1x2x128xf32>
      %94 = arith.addf %91, %93 : vector<1x1x2x128xf32>
      %cst_101 = arith.constant 0.000000e+00 : f32
      %cst_102 = arith.constant 1.000000e+00 : f32
      %95 = vector.broadcast %cst_101 : f32 to vector<1x1x2x128xf32>
      %96 = arith.maximumf %95, %94 : vector<1x1x2x128xf32>
      %97 = vector.broadcast %cst_102 : f32 to vector<1x1x2x128xf32>
      %98 = arith.minimumf %97, %96 : vector<1x1x2x128xf32>
      %c0_103 = arith.constant 0 : index
      %c0_104 = arith.constant 0 : index
      %c0_105 = arith.constant 0 : index
      %c0_106 = arith.constant 0 : index
      %99 = vector.load %arg6[%c0_103, %c0_104, %c0_105, %c0_106] : memref<1x1x2x128xf32, #tpu.memory_space<vmem>>, vector<1x1x2x128xf32>
      tpu.vector_store %arg6[%c0_103, %c0_104, %c0_105, %c0_106], %98 {strides = array<i32>} : memref<1x1x2x128xf32, #tpu.memory_space<vmem>>, vector<1x1x2x128xf32>,
      %100 = vector.broadcast %8 : f32 to vector<1x1x2x128xf32>
      %101 = arith.mulf %100, %70 : vector<1x1x2x128xf32>
      %102 = vector.broadcast %79 : f32 to vector<1x1x2x128xf32>
      %103 = arith.mulf %102, %78 : vector<1x1x2x128xf32>
      %104 = arith.addf %101, %103 : vector<1x1x2x128xf32>
      %cst_107 = arith.constant 0.000000e+00 : f32
      %cst_108 = arith.constant 1.000000e+00 : f32
      %105 = vector.broadcast %cst_107 : f32 to vector<1x1x2x128xf32>
      %106 = arith.maximumf %105, %104 : vector<1x1x2x128xf32>
      %107 = vector.broadcast %cst_108 : f32 to vector<1x1x2x128xf32>
      %108 = arith.minimumf %107, %106 : vector<1x1x2x128xf32>
      %c0_109 = arith.constant 0 : index
      %c0_110 = arith.constant 0 : index
      %c0_111 = arith.constant 0 : index
      %c0_112 = arith.constant 0 : index
      %109 = vector.load %arg7[%c0_109, %c0_110, %c0_111, %c0_112] : memref<1x1x2x128xf32, #tpu.memory_space<vmem>>, vector<1x1x2x128xf32>
      tpu.vector_store %arg7[%c0_109, %c0_110, %c0_111, %c0_112], %108 {strides = array<i32>} : memref<1x1x2x128xf32, #tpu.memory_space<vmem>>, vector<1x1x2x128xf32>,
    } else {
    }
    %c3_i32_45 = arith.constant 3 : i32
    %46 = arith.cmpi eq, %36, %c3_i32_45 : i32
    %47 = arith.extui %46 : i1 to i32
    %c0_i32_46 = arith.constant 0 : i32
    %48 = arith.cmpi ne, %47, %c0_i32_46 : i32
    scf.if %48 {
      %c0_80 = arith.constant 0 : index
      %c0_81 = arith.constant 0 : index
      %c0_82 = arith.constant 0 : index
      %c0_83 = arith.constant 0 : index
      %68 = vector.load %arg5[%c0_80, %c0_81, %c0_82, %c0_83] : memref<1x1x2x128xf32, #tpu.memory_space<vmem>>, vector<1x1x2x128xf32>
      %c0_84 = arith.constant 0 : index
      %c0_85 = arith.constant 0 : index
      %c0_86 = arith.constant 0 : index
      %c0_87 = arith.constant 0 : index
      %69 = vector.load %arg6[%c0_84, %c0_85, %c0_86, %c0_87] : memref<1x1x2x128xf32, #tpu.memory_space<vmem>>, vector<1x1x2x128xf32>
      %c0_88 = arith.constant 0 : index
      %c0_89 = arith.constant 0 : index
      %c0_90 = arith.constant 0 : index
      %c0_91 = arith.constant 0 : index
      %70 = vector.load %arg7[%c0_88, %c0_89, %c0_90, %c0_91] : memref<1x1x2x128xf32, #tpu.memory_space<vmem>>, vector<1x1x2x128xf32>
      %71 = arith.maximumf %68, %69 : vector<1x1x2x128xf32>
      %72 = arith.maximumf %71, %70 : vector<1x1x2x128xf32>
      %73 = arith.minimumf %68, %69 : vector<1x1x2x128xf32>
      %74 = arith.minimumf %73, %70 : vector<1x1x2x128xf32>
      %75 = arith.cmpf oeq, %72, %74 : vector<1x1x2x128xf32>
      %76 = arith.subf %72, %74 : vector<1x1x2x128xf32>
      %cst = arith.constant 1.000000e+00 : f32
      %77 = vector.broadcast %cst : f32 to vector<1x1x2x128xf32>
      %78 = arith.select %75, %77, %72 : vector<1x1x2x128xi1>, vector<1x1x2x128xf32>
      %79 = tpu.reciprocal %78 {approx = true} : vector<1x1x2x128xf32> -> vector<1x1x2x128xf32>
      %cst_92 = arith.constant 1.000000e+00 : f32
      %80 = vector.broadcast %cst_92 : f32 to vector<1x1x2x128xf32>
      %81 = arith.select %75, %80, %76 : vector<1x1x2x128xi1>, vector<1x1x2x128xf32>
      %82 = tpu.reciprocal %81 {approx = true} : vector<1x1x2x128xf32> -> vector<1x1x2x128xf32>
      %83 = arith.mulf %76, %79 : vector<1x1x2x128xf32>
      %cst_93 = arith.constant 1.000000e+00 : f32
      %84 = vector.broadcast %cst_93 : f32 to vector<1x1x2x128xf32>
      %85 = arith.minimumf %83, %84 : vector<1x1x2x128xf32>
      %86 = arith.subf %72, %68 : vector<1x1x2x128xf32>
      %87 = arith.mulf %86, %82 : vector<1x1x2x128xf32>
      %88 = arith.subf %72, %69 : vector<1x1x2x128xf32>
      %89 = arith.mulf %88, %82 : vector<1x1x2x128xf32>
      %90 = arith.subf %72, %70 : vector<1x1x2x128xf32>
      %91 = arith.mulf %90, %82 : vector<1x1x2x128xf32>
      %92 = arith.cmpf oeq, %72, %68 : vector<1x1x2x128xf32>
      %93 = arith.cmpf oeq, %72, %69 : vector<1x1x2x128xf32>
      %94 = arith.subf %91, %89 : vector<1x1x2x128xf32>
      %cst_94 = arith.constant 0.000000e+00 : f32
      %95 = vector.broadcast %cst_94 : f32 to vector<1x1x2x128xf32>
      %96 = arith.select %92, %94, %95 : vector<1x1x2x128xi1>, vector<1x1x2x128xf32>
      %cst_95 = arith.constant dense<true> : vector<1x1x2x128xi1>
      %97 = arith.xori %92, %cst_95 : vector<1x1x2x128xi1>
      %98 = arith.andi %93, %97 : vector<1x1x2x128xi1>
      %cst_96 = arith.constant 2.000000e+00 : f32
      %99 = vector.broadcast %cst_96 : f32 to vector<1x1x2x128xf32>
      %100 = arith.addf %99, %87 : vector<1x1x2x128xf32>
      %101 = arith.subf %100, %91 : vector<1x1x2x128xf32>
      %cst_97 = arith.constant 0.000000e+00 : f32
      %102 = vector.broadcast %cst_97 : f32 to vector<1x1x2x128xf32>
      %103 = arith.select %98, %101, %102 : vector<1x1x2x128xi1>, vector<1x1x2x128xf32>
      %cst_98 = arith.constant dense<true> : vector<1x1x2x128xi1>
      %104 = arith.xori %93, %cst_98 : vector<1x1x2x128xi1>
      %cst_99 = arith.constant dense<true> : vector<1x1x2x128xi1>
      %105 = arith.xori %92, %cst_99 : vector<1x1x2x128xi1>
      %106 = arith.andi %104, %105 : vector<1x1x2x128xi1>
      %cst_100 = arith.constant 4.000000e+00 : f32
      %107 = vector.broadcast %cst_100 : f32 to vector<1x1x2x128xf32>
      %108 = arith.addf %107, %89 : vector<1x1x2x128xf32>
      %109 = arith.subf %108, %87 : vector<1x1x2x128xf32>
      %cst_101 = arith.constant 0.000000e+00 : f32
      %110 = vector.broadcast %cst_101 : f32 to vector<1x1x2x128xf32>
      %111 = arith.select %106, %109, %110 : vector<1x1x2x128xi1>, vector<1x1x2x128xf32>
      %112 = arith.addf %96, %103 : vector<1x1x2x128xf32>
      %113 = arith.addf %112, %111 : vector<1x1x2x128xf32>
      %cst_102 = arith.constant 0.166666672 : f32
      %114 = vector.broadcast %cst_102 : f32 to vector<1x1x2x128xf32>
      %115 = arith.mulf %113, %114 : vector<1x1x2x128xf32>
      %cst_103 = arith.constant 1.000000e+00 : f32
      %116 = vector.broadcast %cst_103 : f32 to vector<1x1x2x128xf32>
      %117 = arith.addf %115, %116 : vector<1x1x2x128xf32>
      %118 = math.floor %117 : vector<1x1x2x128xf32>
      %119 = arith.subf %117, %118 : vector<1x1x2x128xf32>
      %120 = vector.broadcast %9 : f32 to vector<1x1x2x128xf32>
      %121 = arith.addf %119, %120 : vector<1x1x2x128xf32>
      %122 = math.floor %121 : vector<1x1x2x128xf32>
      %123 = arith.subf %121, %122 : vector<1x1x2x128xf32>
      %cst_104 = arith.constant 6.000000e+00 : f32
      %124 = vector.broadcast %cst_104 : f32 to vector<1x1x2x128xf32>
      %125 = arith.mulf %123, %124 : vector<1x1x2x128xf32>
      %126 = math.floor %125 : vector<1x1x2x128xf32>
      %127 = arith.subf %125, %126 : vector<1x1x2x128xf32>
      %128 = arith.fptosi %126 : vector<1x1x2x128xf32> to vector<1x1x2x128xi32>
      %c5_i32 = arith.constant 5 : i32
      %129 = vector.broadcast %c5_i32 : i32 to vector<1x1x2x128xi32>
      %130 = arith.cmpi sgt, %128, %129 : vector<1x1x2x128xi32>
      %c0_i32_105 = arith.constant 0 : i32
      %131 = vector.broadcast %c0_i32_105 : i32 to vector<1x1x2x128xi32>
      %132 = arith.select %130, %131, %128 : vector<1x1x2x128xi1>, vector<1x1x2x128xi32>
      %cst_106 = arith.constant 1.000000e+00 : f32
      %133 = vector.broadcast %cst_106 : f32 to vector<1x1x2x128xf32>
      %134 = arith.subf %133, %85 : vector<1x1x2x128xf32>
      %135 = arith.mulf %72, %134 : vector<1x1x2x128xf32>
      %136 = arith.mulf %85, %127 : vector<1x1x2x128xf32>
      %cst_107 = arith.constant 1.000000e+00 : f32
      %137 = vector.broadcast %cst_107 : f32 to vector<1x1x2x128xf32>
      %138 = arith.subf %137, %136 : vector<1x1x2x128xf32>
      %139 = arith.mulf %72, %138 : vector<1x1x2x128xf32>
      %cst_108 = arith.constant 1.000000e+00 : f32
      %140 = vector.broadcast %cst_108 : f32 to vector<1x1x2x128xf32>
      %141 = arith.subf %140, %127 : vector<1x1x2x128xf32>
      %142 = arith.mulf %85, %141 : vector<1x1x2x128xf32>
      %cst_109 = arith.constant 1.000000e+00 : f32
      %143 = vector.broadcast %cst_109 : f32 to vector<1x1x2x128xf32>
      %144 = arith.subf %143, %142 : vector<1x1x2x128xf32>
      %145 = arith.mulf %72, %144 : vector<1x1x2x128xf32>
      %c0_i32_110 = arith.constant 0 : i32
      %146 = vector.broadcast %c0_i32_110 : i32 to vector<1x1x2x128xi32>
      %147 = arith.cmpi eq, %132, %146 : vector<1x1x2x128xi32>
      %c1_i32_111 = arith.constant 1 : i32
      %148 = vector.broadcast %c1_i32_111 : i32 to vector<1x1x2x128xi32>
      %149 = arith.cmpi eq, %132, %148 : vector<1x1x2x128xi32>
      %c2_i32_112 = arith.constant 2 : i32
      %150 = vector.broadcast %c2_i32_112 : i32 to vector<1x1x2x128xi32>
      %151 = arith.cmpi eq, %132, %150 : vector<1x1x2x128xi32>
      %c3_i32_113 = arith.constant 3 : i32
      %152 = vector.broadcast %c3_i32_113 : i32 to vector<1x1x2x128xi32>
      %153 = arith.cmpi eq, %132, %152 : vector<1x1x2x128xi32>
      %c4_i32 = arith.constant 4 : i32
      %154 = vector.broadcast %c4_i32 : i32 to vector<1x1x2x128xi32>
      %155 = arith.cmpi eq, %132, %154 : vector<1x1x2x128xi32>
      %156 = arith.select %155, %145, %72 : vector<1x1x2x128xi1>, vector<1x1x2x128xf32>
      %157 = arith.select %153, %135, %156 : vector<1x1x2x128xi1>, vector<1x1x2x128xf32>
      %158 = arith.select %151, %135, %157 : vector<1x1x2x128xi1>, vector<1x1x2x128xf32>
      %159 = arith.select %149, %139, %158 : vector<1x1x2x128xi1>, vector<1x1x2x128xf32>
      %160 = arith.select %147, %72, %159 : vector<1x1x2x128xi1>, vector<1x1x2x128xf32>
      %c0_114 = arith.constant 0 : index
      %c0_115 = arith.constant 0 : index
      %c0_116 = arith.constant 0 : index
      %c0_117 = arith.constant 0 : index
      %161 = vector.load %arg5[%c0_114, %c0_115, %c0_116, %c0_117] : memref<1x1x2x128xf32, #tpu.memory_space<vmem>>, vector<1x1x2x128xf32>
      tpu.vector_store %arg5[%c0_114, %c0_115, %c0_116, %c0_117], %160 {strides = array<i32>} : memref<1x1x2x128xf32, #tpu.memory_space<vmem>>, vector<1x1x2x128xf32>,
      %162 = arith.select %155, %135, %135 : vector<1x1x2x128xi1>, vector<1x1x2x128xf32>
      %163 = arith.select %153, %139, %162 : vector<1x1x2x128xi1>, vector<1x1x2x128xf32>
      %164 = arith.select %151, %72, %163 : vector<1x1x2x128xi1>, vector<1x1x2x128xf32>
      %165 = arith.select %149, %72, %164 : vector<1x1x2x128xi1>, vector<1x1x2x128xf32>
      %166 = arith.select %147, %145, %165 : vector<1x1x2x128xi1>, vector<1x1x2x128xf32>
      %c0_118 = arith.constant 0 : index
      %c0_119 = arith.constant 0 : index
      %c0_120 = arith.constant 0 : index
      %c0_121 = arith.constant 0 : index
      %167 = vector.load %arg6[%c0_118, %c0_119, %c0_120, %c0_121] : memref<1x1x2x128xf32, #tpu.memory_space<vmem>>, vector<1x1x2x128xf32>
      tpu.vector_store %arg6[%c0_118, %c0_119, %c0_120, %c0_121], %166 {strides = array<i32>} : memref<1x1x2x128xf32, #tpu.memory_space<vmem>>, vector<1x1x2x128xf32>,
      %168 = arith.select %155, %72, %139 : vector<1x1x2x128xi1>, vector<1x1x2x128xf32>
      %169 = arith.select %153, %72, %168 : vector<1x1x2x128xi1>, vector<1x1x2x128xf32>
      %170 = arith.select %151, %145, %169 : vector<1x1x2x128xi1>, vector<1x1x2x128xf32>
      %171 = arith.select %149, %135, %170 : vector<1x1x2x128xi1>, vector<1x1x2x128xf32>
      %172 = arith.select %147, %135, %171 : vector<1x1x2x128xi1>, vector<1x1x2x128xf32>
      %c0_122 = arith.constant 0 : index
      %c0_123 = arith.constant 0 : index
      %c0_124 = arith.constant 0 : index
      %c0_125 = arith.constant 0 : index
      %173 = vector.load %arg7[%c0_122, %c0_123, %c0_124, %c0_125] : memref<1x1x2x128xf32, #tpu.memory_space<vmem>>, vector<1x1x2x128xf32>
      tpu.vector_store %arg7[%c0_122, %c0_123, %c0_124, %c0_125], %172 {strides = array<i32>} : memref<1x1x2x128xf32, #tpu.memory_space<vmem>>, vector<1x1x2x128xf32>,
    } else {
    }
    %c3_47 = arith.constant 3 : index
    %49 = memref.load %arg1[%c3_47] : memref<4xi32, #tpu.memory_space<smem>>
    %c0_i32_48 = arith.constant 0 : i32
    %50 = arith.cmpi eq, %49, %c0_i32_48 : i32
    %51 = arith.extui %50 : i1 to i32
    %c0_i32_49 = arith.constant 0 : i32
    %52 = arith.cmpi ne, %51, %c0_i32_49 : i32
    scf.if %52 {
      %c0_80 = arith.constant 0 : index
      %c0_81 = arith.constant 0 : index
      %c0_82 = arith.constant 0 : index
      %c0_83 = arith.constant 0 : index
      %68 = vector.load %arg5[%c0_80, %c0_81, %c0_82, %c0_83] : memref<1x1x2x128xf32, #tpu.memory_space<vmem>>, vector<1x1x2x128xf32>
      %69 = vector.broadcast %6 : f32 to vector<1x1x2x128xf32>
      %70 = arith.mulf %68, %69 : vector<1x1x2x128xf32>
      %cst = arith.constant 0.000000e+00 : f32
      %cst_84 = arith.constant 1.000000e+00 : f32
      %71 = vector.broadcast %cst : f32 to vector<1x1x2x128xf32>
      %72 = arith.maximumf %71, %70 : vector<1x1x2x128xf32>
      %73 = vector.broadcast %cst_84 : f32 to vector<1x1x2x128xf32>
      %74 = arith.minimumf %73, %72 : vector<1x1x2x128xf32>
      %c0_85 = arith.constant 0 : index
      %c0_86 = arith.constant 0 : index
      %c0_87 = arith.constant 0 : index
      %c0_88 = arith.constant 0 : index
      %75 = vector.load %arg5[%c0_85, %c0_86, %c0_87, %c0_88] : memref<1x1x2x128xf32, #tpu.memory_space<vmem>>, vector<1x1x2x128xf32>
      tpu.vector_store %arg5[%c0_85, %c0_86, %c0_87, %c0_88], %74 {strides = array<i32>} : memref<1x1x2x128xf32, #tpu.memory_space<vmem>>, vector<1x1x2x128xf32>,
      %c0_89 = arith.constant 0 : index
      %c0_90 = arith.constant 0 : index
      %c0_91 = arith.constant 0 : index
      %c0_92 = arith.constant 0 : index
      %76 = vector.load %arg6[%c0_89, %c0_90, %c0_91, %c0_92] : memref<1x1x2x128xf32, #tpu.memory_space<vmem>>, vector<1x1x2x128xf32>
      %77 = vector.broadcast %6 : f32 to vector<1x1x2x128xf32>
      %78 = arith.mulf %76, %77 : vector<1x1x2x128xf32>
      %cst_93 = arith.constant 0.000000e+00 : f32
      %cst_94 = arith.constant 1.000000e+00 : f32
      %79 = vector.broadcast %cst_93 : f32 to vector<1x1x2x128xf32>
      %80 = arith.maximumf %79, %78 : vector<1x1x2x128xf32>
      %81 = vector.broadcast %cst_94 : f32 to vector<1x1x2x128xf32>
      %82 = arith.minimumf %81, %80 : vector<1x1x2x128xf32>
      %c0_95 = arith.constant 0 : index
      %c0_96 = arith.constant 0 : index
      %c0_97 = arith.constant 0 : index
      %c0_98 = arith.constant 0 : index
      %83 = vector.load %arg6[%c0_95, %c0_96, %c0_97, %c0_98] : memref<1x1x2x128xf32, #tpu.memory_space<vmem>>, vector<1x1x2x128xf32>
      tpu.vector_store %arg6[%c0_95, %c0_96, %c0_97, %c0_98], %82 {strides = array<i32>} : memref<1x1x2x128xf32, #tpu.memory_space<vmem>>, vector<1x1x2x128xf32>,
      %c0_99 = arith.constant 0 : index
      %c0_100 = arith.constant 0 : index
      %c0_101 = arith.constant 0 : index
      %c0_102 = arith.constant 0 : index
      %84 = vector.load %arg7[%c0_99, %c0_100, %c0_101, %c0_102] : memref<1x1x2x128xf32, #tpu.memory_space<vmem>>, vector<1x1x2x128xf32>
      %85 = vector.broadcast %6 : f32 to vector<1x1x2x128xf32>
      %86 = arith.mulf %84, %85 : vector<1x1x2x128xf32>
      %cst_103 = arith.constant 0.000000e+00 : f32
      %cst_104 = arith.constant 1.000000e+00 : f32
      %87 = vector.broadcast %cst_103 : f32 to vector<1x1x2x128xf32>
      %88 = arith.maximumf %87, %86 : vector<1x1x2x128xf32>
      %89 = vector.broadcast %cst_104 : f32 to vector<1x1x2x128xf32>
      %90 = arith.minimumf %89, %88 : vector<1x1x2x128xf32>
      %c0_105 = arith.constant 0 : index
      %c0_106 = arith.constant 0 : index
      %c0_107 = arith.constant 0 : index
      %c0_108 = arith.constant 0 : index
      %91 = vector.load %arg7[%c0_105, %c0_106, %c0_107, %c0_108] : memref<1x1x2x128xf32, #tpu.memory_space<vmem>>, vector<1x1x2x128xf32>
      tpu.vector_store %arg7[%c0_105, %c0_106, %c0_107, %c0_108], %90 {strides = array<i32>} : memref<1x1x2x128xf32, #tpu.memory_space<vmem>>, vector<1x1x2x128xf32>,
    } else {
    }
    %c1_i32_50 = arith.constant 1 : i32
    %53 = arith.cmpi eq, %49, %c1_i32_50 : i32
    %54 = arith.extui %53 : i1 to i32
    %c0_i32_51 = arith.constant 0 : i32
    %55 = arith.cmpi ne, %54, %c0_i32_51 : i32
    scf.if %55 {
      %c0_80 = arith.constant 0 : index
      %c0_81 = arith.constant 0 : index
      %c0_82 = arith.constant 0 : index
      %c0_83 = arith.constant 0 : index
      %68 = vector.load %arg5[%c0_80, %c0_81, %c0_82, %c0_83] : memref<1x1x2x128xf32, #tpu.memory_space<vmem>>, vector<1x1x2x128xf32>
      %c0_84 = arith.constant 0 : index
      %c0_85 = arith.constant 0 : index
      %c0_86 = arith.constant 0 : index
      %c0_87 = arith.constant 0 : index
      %69 = vector.load %arg6[%c0_84, %c0_85, %c0_86, %c0_87] : memref<1x1x2x128xf32, #tpu.memory_space<vmem>>, vector<1x1x2x128xf32>
      %c0_88 = arith.constant 0 : index
      %c0_89 = arith.constant 0 : index
      %c0_90 = arith.constant 0 : index
      %c0_91 = arith.constant 0 : index
      %70 = vector.load %arg7[%c0_88, %c0_89, %c0_90, %c0_91] : memref<1x1x2x128xf32, #tpu.memory_space<vmem>>, vector<1x1x2x128xf32>
      %cst = arith.constant 2.989000e-01 : f32
      %71 = vector.broadcast %cst : f32 to vector<1x1x2x128xf32>
      %72 = arith.mulf %71, %68 : vector<1x1x2x128xf32>
      %cst_92 = arith.constant 5.870000e-01 : f32
      %73 = vector.broadcast %cst_92 : f32 to vector<1x1x2x128xf32>
      %74 = arith.mulf %73, %69 : vector<1x1x2x128xf32>
      %75 = arith.addf %72, %74 : vector<1x1x2x128xf32>
      %cst_93 = arith.constant 1.140000e-01 : f32
      %76 = vector.broadcast %cst_93 : f32 to vector<1x1x2x128xf32>
      %77 = arith.mulf %76, %70 : vector<1x1x2x128xf32>
      %78 = arith.addf %75, %77 : vector<1x1x2x128xf32>
      %cst_94 = arith.constant dense<0.000000e+00> : vector<1x1x2xf32>
      %79 = vector.multi_reduction <add>, %78, %cst_94 [3] : vector<1x1x2x128xf32> to vector<1x1x2xf32>
      %80 = vector.shape_cast %79 : vector<1x1x2xf32> to vector<1x1x2x1xf32>
      %cst_95 = arith.constant dense<0.000000e+00> : vector<1x1x1xf32>
      %81 = vector.multi_reduction <add>, %80, %cst_95 [2] : vector<1x1x2x1xf32> to vector<1x1x1xf32>
      %82 = vector.shape_cast %81 : vector<1x1x1xf32> to vector<1x1x1x1xf32>
      %cst_96 = arith.constant 3.906250e-03 : f32
      %83 = vector.broadcast %cst_96 : f32 to vector<1x1x1x1xf32>
      %84 = arith.mulf %82, %83 : vector<1x1x1x1xf32>
      %cst_97 = arith.constant 1.000000e+00 : f32
      %85 = arith.subf %cst_97, %7 : f32
      %86 = vector.broadcast %7 : f32 to vector<1x1x2x128xf32>
      %87 = arith.mulf %86, %68 : vector<1x1x2x128xf32>
      %88 = vector.broadcast %85 : f32 to vector<1x1x1x1xf32>
      %89 = arith.mulf %88, %84 : vector<1x1x1x1xf32>
      %90 = vector.broadcast %89 : vector<1x1x1x1xf32> to vector<1x1x2x128xf32>
      %91 = arith.addf %87, %90 : vector<1x1x2x128xf32>
      %cst_98 = arith.constant 0.000000e+00 : f32
      %cst_99 = arith.constant 1.000000e+00 : f32
      %92 = vector.broadcast %cst_98 : f32 to vector<1x1x2x128xf32>
      %93 = arith.maximumf %92, %91 : vector<1x1x2x128xf32>
      %94 = vector.broadcast %cst_99 : f32 to vector<1x1x2x128xf32>
      %95 = arith.minimumf %94, %93 : vector<1x1x2x128xf32>
      %c0_100 = arith.constant 0 : index
      %c0_101 = arith.constant 0 : index
      %c0_102 = arith.constant 0 : index
      %c0_103 = arith.constant 0 : index
      %96 = vector.load %arg5[%c0_100, %c0_101, %c0_102, %c0_103] : memref<1x1x2x128xf32, #tpu.memory_space<vmem>>, vector<1x1x2x128xf32>
      tpu.vector_store %arg5[%c0_100, %c0_101, %c0_102, %c0_103], %95 {strides = array<i32>} : memref<1x1x2x128xf32, #tpu.memory_space<vmem>>, vector<1x1x2x128xf32>,
      %97 = vector.broadcast %7 : f32 to vector<1x1x2x128xf32>
      %98 = arith.mulf %97, %69 : vector<1x1x2x128xf32>
      %99 = vector.broadcast %85 : f32 to vector<1x1x1x1xf32>
      %100 = arith.mulf %99, %84 : vector<1x1x1x1xf32>
      %101 = vector.broadcast %100 : vector<1x1x1x1xf32> to vector<1x1x2x128xf32>
      %102 = arith.addf %98, %101 : vector<1x1x2x128xf32>
      %cst_104 = arith.constant 0.000000e+00 : f32
      %cst_105 = arith.constant 1.000000e+00 : f32
      %103 = vector.broadcast %cst_104 : f32 to vector<1x1x2x128xf32>
      %104 = arith.maximumf %103, %102 : vector<1x1x2x128xf32>
      %105 = vector.broadcast %cst_105 : f32 to vector<1x1x2x128xf32>
      %106 = arith.minimumf %105, %104 : vector<1x1x2x128xf32>
      %c0_106 = arith.constant 0 : index
      %c0_107 = arith.constant 0 : index
      %c0_108 = arith.constant 0 : index
      %c0_109 = arith.constant 0 : index
      %107 = vector.load %arg6[%c0_106, %c0_107, %c0_108, %c0_109] : memref<1x1x2x128xf32, #tpu.memory_space<vmem>>, vector<1x1x2x128xf32>
      tpu.vector_store %arg6[%c0_106, %c0_107, %c0_108, %c0_109], %106 {strides = array<i32>} : memref<1x1x2x128xf32, #tpu.memory_space<vmem>>, vector<1x1x2x128xf32>,
      %108 = vector.broadcast %7 : f32 to vector<1x1x2x128xf32>
      %109 = arith.mulf %108, %70 : vector<1x1x2x128xf32>
      %110 = vector.broadcast %85 : f32 to vector<1x1x1x1xf32>
      %111 = arith.mulf %110, %84 : vector<1x1x1x1xf32>
      %112 = vector.broadcast %111 : vector<1x1x1x1xf32> to vector<1x1x2x128xf32>
      %113 = arith.addf %109, %112 : vector<1x1x2x128xf32>
      %cst_110 = arith.constant 0.000000e+00 : f32
      %cst_111 = arith.constant 1.000000e+00 : f32
      %114 = vector.broadcast %cst_110 : f32 to vector<1x1x2x128xf32>
      %115 = arith.maximumf %114, %113 : vector<1x1x2x128xf32>
      %116 = vector.broadcast %cst_111 : f32 to vector<1x1x2x128xf32>
      %117 = arith.minimumf %116, %115 : vector<1x1x2x128xf32>
      %c0_112 = arith.constant 0 : index
      %c0_113 = arith.constant 0 : index
      %c0_114 = arith.constant 0 : index
      %c0_115 = arith.constant 0 : index
      %118 = vector.load %arg7[%c0_112, %c0_113, %c0_114, %c0_115] : memref<1x1x2x128xf32, #tpu.memory_space<vmem>>, vector<1x1x2x128xf32>
      tpu.vector_store %arg7[%c0_112, %c0_113, %c0_114, %c0_115], %117 {strides = array<i32>} : memref<1x1x2x128xf32, #tpu.memory_space<vmem>>, vector<1x1x2x128xf32>,
    } else {
    }
    %c2_i32_52 = arith.constant 2 : i32
    %56 = arith.cmpi eq, %49, %c2_i32_52 : i32
    %57 = arith.extui %56 : i1 to i32
    %c0_i32_53 = arith.constant 0 : i32
    %58 = arith.cmpi ne, %57, %c0_i32_53 : i32
    scf.if %58 {
      %c0_80 = arith.constant 0 : index
      %c0_81 = arith.constant 0 : index
      %c0_82 = arith.constant 0 : index
      %c0_83 = arith.constant 0 : index
      %68 = vector.load %arg5[%c0_80, %c0_81, %c0_82, %c0_83] : memref<1x1x2x128xf32, #tpu.memory_space<vmem>>, vector<1x1x2x128xf32>
      %c0_84 = arith.constant 0 : index
      %c0_85 = arith.constant 0 : index
      %c0_86 = arith.constant 0 : index
      %c0_87 = arith.constant 0 : index
      %69 = vector.load %arg6[%c0_84, %c0_85, %c0_86, %c0_87] : memref<1x1x2x128xf32, #tpu.memory_space<vmem>>, vector<1x1x2x128xf32>
      %c0_88 = arith.constant 0 : index
      %c0_89 = arith.constant 0 : index
      %c0_90 = arith.constant 0 : index
      %c0_91 = arith.constant 0 : index
      %70 = vector.load %arg7[%c0_88, %c0_89, %c0_90, %c0_91] : memref<1x1x2x128xf32, #tpu.memory_space<vmem>>, vector<1x1x2x128xf32>
      %cst = arith.constant 2.989000e-01 : f32
      %71 = vector.broadcast %cst : f32 to vector<1x1x2x128xf32>
      %72 = arith.mulf %71, %68 : vector<1x1x2x128xf32>
      %cst_92 = arith.constant 5.870000e-01 : f32
      %73 = vector.broadcast %cst_92 : f32 to vector<1x1x2x128xf32>
      %74 = arith.mulf %73, %69 : vector<1x1x2x128xf32>
      %75 = arith.addf %72, %74 : vector<1x1x2x128xf32>
      %cst_93 = arith.constant 1.140000e-01 : f32
      %76 = vector.broadcast %cst_93 : f32 to vector<1x1x2x128xf32>
      %77 = arith.mulf %76, %70 : vector<1x1x2x128xf32>
      %78 = arith.addf %75, %77 : vector<1x1x2x128xf32>
      %cst_94 = arith.constant 1.000000e+00 : f32
      %79 = arith.subf %cst_94, %8 : f32
      %80 = vector.broadcast %8 : f32 to vector<1x1x2x128xf32>
      %81 = arith.mulf %80, %68 : vector<1x1x2x128xf32>
      %82 = vector.broadcast %79 : f32 to vector<1x1x2x128xf32>
      %83 = arith.mulf %82, %78 : vector<1x1x2x128xf32>
      %84 = arith.addf %81, %83 : vector<1x1x2x128xf32>
      %cst_95 = arith.constant 0.000000e+00 : f32
      %cst_96 = arith.constant 1.000000e+00 : f32
      %85 = vector.broadcast %cst_95 : f32 to vector<1x1x2x128xf32>
      %86 = arith.maximumf %85, %84 : vector<1x1x2x128xf32>
      %87 = vector.broadcast %cst_96 : f32 to vector<1x1x2x128xf32>
      %88 = arith.minimumf %87, %86 : vector<1x1x2x128xf32>
      %c0_97 = arith.constant 0 : index
      %c0_98 = arith.constant 0 : index
      %c0_99 = arith.constant 0 : index
      %c0_100 = arith.constant 0 : index
      %89 = vector.load %arg5[%c0_97, %c0_98, %c0_99, %c0_100] : memref<1x1x2x128xf32, #tpu.memory_space<vmem>>, vector<1x1x2x128xf32>
      tpu.vector_store %arg5[%c0_97, %c0_98, %c0_99, %c0_100], %88 {strides = array<i32>} : memref<1x1x2x128xf32, #tpu.memory_space<vmem>>, vector<1x1x2x128xf32>,
      %90 = vector.broadcast %8 : f32 to vector<1x1x2x128xf32>
      %91 = arith.mulf %90, %69 : vector<1x1x2x128xf32>
      %92 = vector.broadcast %79 : f32 to vector<1x1x2x128xf32>
      %93 = arith.mulf %92, %78 : vector<1x1x2x128xf32>
      %94 = arith.addf %91, %93 : vector<1x1x2x128xf32>
      %cst_101 = arith.constant 0.000000e+00 : f32
      %cst_102 = arith.constant 1.000000e+00 : f32
      %95 = vector.broadcast %cst_101 : f32 to vector<1x1x2x128xf32>
      %96 = arith.maximumf %95, %94 : vector<1x1x2x128xf32>
      %97 = vector.broadcast %cst_102 : f32 to vector<1x1x2x128xf32>
      %98 = arith.minimumf %97, %96 : vector<1x1x2x128xf32>
      %c0_103 = arith.constant 0 : index
      %c0_104 = arith.constant 0 : index
      %c0_105 = arith.constant 0 : index
      %c0_106 = arith.constant 0 : index
      %99 = vector.load %arg6[%c0_103, %c0_104, %c0_105, %c0_106] : memref<1x1x2x128xf32, #tpu.memory_space<vmem>>, vector<1x1x2x128xf32>
      tpu.vector_store %arg6[%c0_103, %c0_104, %c0_105, %c0_106], %98 {strides = array<i32>} : memref<1x1x2x128xf32, #tpu.memory_space<vmem>>, vector<1x1x2x128xf32>,
      %100 = vector.broadcast %8 : f32 to vector<1x1x2x128xf32>
      %101 = arith.mulf %100, %70 : vector<1x1x2x128xf32>
      %102 = vector.broadcast %79 : f32 to vector<1x1x2x128xf32>
      %103 = arith.mulf %102, %78 : vector<1x1x2x128xf32>
      %104 = arith.addf %101, %103 : vector<1x1x2x128xf32>
      %cst_107 = arith.constant 0.000000e+00 : f32
      %cst_108 = arith.constant 1.000000e+00 : f32
      %105 = vector.broadcast %cst_107 : f32 to vector<1x1x2x128xf32>
      %106 = arith.maximumf %105, %104 : vector<1x1x2x128xf32>
      %107 = vector.broadcast %cst_108 : f32 to vector<1x1x2x128xf32>
      %108 = arith.minimumf %107, %106 : vector<1x1x2x128xf32>
      %c0_109 = arith.constant 0 : index
      %c0_110 = arith.constant 0 : index
      %c0_111 = arith.constant 0 : index
      %c0_112 = arith.constant 0 : index
      %109 = vector.load %arg7[%c0_109, %c0_110, %c0_111, %c0_112] : memref<1x1x2x128xf32, #tpu.memory_space<vmem>>, vector<1x1x2x128xf32>
      tpu.vector_store %arg7[%c0_109, %c0_110, %c0_111, %c0_112], %108 {strides = array<i32>} : memref<1x1x2x128xf32, #tpu.memory_space<vmem>>, vector<1x1x2x128xf32>,
    } else {
    }
    %c3_i32_54 = arith.constant 3 : i32
    %59 = arith.cmpi eq, %49, %c3_i32_54 : i32
    %60 = arith.extui %59 : i1 to i32
    %c0_i32_55 = arith.constant 0 : i32
    %61 = arith.cmpi ne, %60, %c0_i32_55 : i32
    scf.if %61 {
      %c0_80 = arith.constant 0 : index
      %c0_81 = arith.constant 0 : index
      %c0_82 = arith.constant 0 : index
      %c0_83 = arith.constant 0 : index
      %68 = vector.load %arg5[%c0_80, %c0_81, %c0_82, %c0_83] : memref<1x1x2x128xf32, #tpu.memory_space<vmem>>, vector<1x1x2x128xf32>
      %c0_84 = arith.constant 0 : index
      %c0_85 = arith.constant 0 : index
      %c0_86 = arith.constant 0 : index
      %c0_87 = arith.constant 0 : index
      %69 = vector.load %arg6[%c0_84, %c0_85, %c0_86, %c0_87] : memref<1x1x2x128xf32, #tpu.memory_space<vmem>>, vector<1x1x2x128xf32>
      %c0_88 = arith.constant 0 : index
      %c0_89 = arith.constant 0 : index
      %c0_90 = arith.constant 0 : index
      %c0_91 = arith.constant 0 : index
      %70 = vector.load %arg7[%c0_88, %c0_89, %c0_90, %c0_91] : memref<1x1x2x128xf32, #tpu.memory_space<vmem>>, vector<1x1x2x128xf32>
      %71 = arith.maximumf %68, %69 : vector<1x1x2x128xf32>
      %72 = arith.maximumf %71, %70 : vector<1x1x2x128xf32>
      %73 = arith.minimumf %68, %69 : vector<1x1x2x128xf32>
      %74 = arith.minimumf %73, %70 : vector<1x1x2x128xf32>
      %75 = arith.cmpf oeq, %72, %74 : vector<1x1x2x128xf32>
      %76 = arith.subf %72, %74 : vector<1x1x2x128xf32>
      %cst = arith.constant 1.000000e+00 : f32
      %77 = vector.broadcast %cst : f32 to vector<1x1x2x128xf32>
      %78 = arith.select %75, %77, %72 : vector<1x1x2x128xi1>, vector<1x1x2x128xf32>
      %79 = tpu.reciprocal %78 {approx = true} : vector<1x1x2x128xf32> -> vector<1x1x2x128xf32>
      %cst_92 = arith.constant 1.000000e+00 : f32
      %80 = vector.broadcast %cst_92 : f32 to vector<1x1x2x128xf32>
      %81 = arith.select %75, %80, %76 : vector<1x1x2x128xi1>, vector<1x1x2x128xf32>
      %82 = tpu.reciprocal %81 {approx = true} : vector<1x1x2x128xf32> -> vector<1x1x2x128xf32>
      %83 = arith.mulf %76, %79 : vector<1x1x2x128xf32>
      %cst_93 = arith.constant 1.000000e+00 : f32
      %84 = vector.broadcast %cst_93 : f32 to vector<1x1x2x128xf32>
      %85 = arith.minimumf %83, %84 : vector<1x1x2x128xf32>
      %86 = arith.subf %72, %68 : vector<1x1x2x128xf32>
      %87 = arith.mulf %86, %82 : vector<1x1x2x128xf32>
      %88 = arith.subf %72, %69 : vector<1x1x2x128xf32>
      %89 = arith.mulf %88, %82 : vector<1x1x2x128xf32>
      %90 = arith.subf %72, %70 : vector<1x1x2x128xf32>
      %91 = arith.mulf %90, %82 : vector<1x1x2x128xf32>
      %92 = arith.cmpf oeq, %72, %68 : vector<1x1x2x128xf32>
      %93 = arith.cmpf oeq, %72, %69 : vector<1x1x2x128xf32>
      %94 = arith.subf %91, %89 : vector<1x1x2x128xf32>
      %cst_94 = arith.constant 0.000000e+00 : f32
      %95 = vector.broadcast %cst_94 : f32 to vector<1x1x2x128xf32>
      %96 = arith.select %92, %94, %95 : vector<1x1x2x128xi1>, vector<1x1x2x128xf32>
      %cst_95 = arith.constant dense<true> : vector<1x1x2x128xi1>
      %97 = arith.xori %92, %cst_95 : vector<1x1x2x128xi1>
      %98 = arith.andi %93, %97 : vector<1x1x2x128xi1>
      %cst_96 = arith.constant 2.000000e+00 : f32
      %99 = vector.broadcast %cst_96 : f32 to vector<1x1x2x128xf32>
      %100 = arith.addf %99, %87 : vector<1x1x2x128xf32>
      %101 = arith.subf %100, %91 : vector<1x1x2x128xf32>
      %cst_97 = arith.constant 0.000000e+00 : f32
      %102 = vector.broadcast %cst_97 : f32 to vector<1x1x2x128xf32>
      %103 = arith.select %98, %101, %102 : vector<1x1x2x128xi1>, vector<1x1x2x128xf32>
      %cst_98 = arith.constant dense<true> : vector<1x1x2x128xi1>
      %104 = arith.xori %93, %cst_98 : vector<1x1x2x128xi1>
      %cst_99 = arith.constant dense<true> : vector<1x1x2x128xi1>
      %105 = arith.xori %92, %cst_99 : vector<1x1x2x128xi1>
      %106 = arith.andi %104, %105 : vector<1x1x2x128xi1>
      %cst_100 = arith.constant 4.000000e+00 : f32
      %107 = vector.broadcast %cst_100 : f32 to vector<1x1x2x128xf32>
      %108 = arith.addf %107, %89 : vector<1x1x2x128xf32>
      %109 = arith.subf %108, %87 : vector<1x1x2x128xf32>
      %cst_101 = arith.constant 0.000000e+00 : f32
      %110 = vector.broadcast %cst_101 : f32 to vector<1x1x2x128xf32>
      %111 = arith.select %106, %109, %110 : vector<1x1x2x128xi1>, vector<1x1x2x128xf32>
      %112 = arith.addf %96, %103 : vector<1x1x2x128xf32>
      %113 = arith.addf %112, %111 : vector<1x1x2x128xf32>
      %cst_102 = arith.constant 0.166666672 : f32
      %114 = vector.broadcast %cst_102 : f32 to vector<1x1x2x128xf32>
      %115 = arith.mulf %113, %114 : vector<1x1x2x128xf32>
      %cst_103 = arith.constant 1.000000e+00 : f32
      %116 = vector.broadcast %cst_103 : f32 to vector<1x1x2x128xf32>
      %117 = arith.addf %115, %116 : vector<1x1x2x128xf32>
      %118 = math.floor %117 : vector<1x1x2x128xf32>
      %119 = arith.subf %117, %118 : vector<1x1x2x128xf32>
      %120 = vector.broadcast %9 : f32 to vector<1x1x2x128xf32>
      %121 = arith.addf %119, %120 : vector<1x1x2x128xf32>
      %122 = math.floor %121 : vector<1x1x2x128xf32>
      %123 = arith.subf %121, %122 : vector<1x1x2x128xf32>
      %cst_104 = arith.constant 6.000000e+00 : f32
      %124 = vector.broadcast %cst_104 : f32 to vector<1x1x2x128xf32>
      %125 = arith.mulf %123, %124 : vector<1x1x2x128xf32>
      %126 = math.floor %125 : vector<1x1x2x128xf32>
      %127 = arith.subf %125, %126 : vector<1x1x2x128xf32>
      %128 = arith.fptosi %126 : vector<1x1x2x128xf32> to vector<1x1x2x128xi32>
      %c5_i32 = arith.constant 5 : i32
      %129 = vector.broadcast %c5_i32 : i32 to vector<1x1x2x128xi32>
      %130 = arith.cmpi sgt, %128, %129 : vector<1x1x2x128xi32>
      %c0_i32_105 = arith.constant 0 : i32
      %131 = vector.broadcast %c0_i32_105 : i32 to vector<1x1x2x128xi32>
      %132 = arith.select %130, %131, %128 : vector<1x1x2x128xi1>, vector<1x1x2x128xi32>
      %cst_106 = arith.constant 1.000000e+00 : f32
      %133 = vector.broadcast %cst_106 : f32 to vector<1x1x2x128xf32>
      %134 = arith.subf %133, %85 : vector<1x1x2x128xf32>
      %135 = arith.mulf %72, %134 : vector<1x1x2x128xf32>
      %136 = arith.mulf %85, %127 : vector<1x1x2x128xf32>
      %cst_107 = arith.constant 1.000000e+00 : f32
      %137 = vector.broadcast %cst_107 : f32 to vector<1x1x2x128xf32>
      %138 = arith.subf %137, %136 : vector<1x1x2x128xf32>
      %139 = arith.mulf %72, %138 : vector<1x1x2x128xf32>
      %cst_108 = arith.constant 1.000000e+00 : f32
      %140 = vector.broadcast %cst_108 : f32 to vector<1x1x2x128xf32>
      %141 = arith.subf %140, %127 : vector<1x1x2x128xf32>
      %142 = arith.mulf %85, %141 : vector<1x1x2x128xf32>
      %cst_109 = arith.constant 1.000000e+00 : f32
      %143 = vector.broadcast %cst_109 : f32 to vector<1x1x2x128xf32>
      %144 = arith.subf %143, %142 : vector<1x1x2x128xf32>
      %145 = arith.mulf %72, %144 : vector<1x1x2x128xf32>
      %c0_i32_110 = arith.constant 0 : i32
      %146 = vector.broadcast %c0_i32_110 : i32 to vector<1x1x2x128xi32>
      %147 = arith.cmpi eq, %132, %146 : vector<1x1x2x128xi32>
      %c1_i32_111 = arith.constant 1 : i32
      %148 = vector.broadcast %c1_i32_111 : i32 to vector<1x1x2x128xi32>
      %149 = arith.cmpi eq, %132, %148 : vector<1x1x2x128xi32>
      %c2_i32_112 = arith.constant 2 : i32
      %150 = vector.broadcast %c2_i32_112 : i32 to vector<1x1x2x128xi32>
      %151 = arith.cmpi eq, %132, %150 : vector<1x1x2x128xi32>
      %c3_i32_113 = arith.constant 3 : i32
      %152 = vector.broadcast %c3_i32_113 : i32 to vector<1x1x2x128xi32>
      %153 = arith.cmpi eq, %132, %152 : vector<1x1x2x128xi32>
      %c4_i32 = arith.constant 4 : i32
      %154 = vector.broadcast %c4_i32 : i32 to vector<1x1x2x128xi32>
      %155 = arith.cmpi eq, %132, %154 : vector<1x1x2x128xi32>
      %156 = arith.select %155, %145, %72 : vector<1x1x2x128xi1>, vector<1x1x2x128xf32>
      %157 = arith.select %153, %135, %156 : vector<1x1x2x128xi1>, vector<1x1x2x128xf32>
      %158 = arith.select %151, %135, %157 : vector<1x1x2x128xi1>, vector<1x1x2x128xf32>
      %159 = arith.select %149, %139, %158 : vector<1x1x2x128xi1>, vector<1x1x2x128xf32>
      %160 = arith.select %147, %72, %159 : vector<1x1x2x128xi1>, vector<1x1x2x128xf32>
      %c0_114 = arith.constant 0 : index
      %c0_115 = arith.constant 0 : index
      %c0_116 = arith.constant 0 : index
      %c0_117 = arith.constant 0 : index
      %161 = vector.load %arg5[%c0_114, %c0_115, %c0_116, %c0_117] : memref<1x1x2x128xf32, #tpu.memory_space<vmem>>, vector<1x1x2x128xf32>
      tpu.vector_store %arg5[%c0_114, %c0_115, %c0_116, %c0_117], %160 {strides = array<i32>} : memref<1x1x2x128xf32, #tpu.memory_space<vmem>>, vector<1x1x2x128xf32>,
      %162 = arith.select %155, %135, %135 : vector<1x1x2x128xi1>, vector<1x1x2x128xf32>
      %163 = arith.select %153, %139, %162 : vector<1x1x2x128xi1>, vector<1x1x2x128xf32>
      %164 = arith.select %151, %72, %163 : vector<1x1x2x128xi1>, vector<1x1x2x128xf32>
      %165 = arith.select %149, %72, %164 : vector<1x1x2x128xi1>, vector<1x1x2x128xf32>
      %166 = arith.select %147, %145, %165 : vector<1x1x2x128xi1>, vector<1x1x2x128xf32>
      %c0_118 = arith.constant 0 : index
      %c0_119 = arith.constant 0 : index
      %c0_120 = arith.constant 0 : index
      %c0_121 = arith.constant 0 : index
      %167 = vector.load %arg6[%c0_118, %c0_119, %c0_120, %c0_121] : memref<1x1x2x128xf32, #tpu.memory_space<vmem>>, vector<1x1x2x128xf32>
      tpu.vector_store %arg6[%c0_118, %c0_119, %c0_120, %c0_121], %166 {strides = array<i32>} : memref<1x1x2x128xf32, #tpu.memory_space<vmem>>, vector<1x1x2x128xf32>,
      %168 = arith.select %155, %72, %139 : vector<1x1x2x128xi1>, vector<1x1x2x128xf32>
      %169 = arith.select %153, %72, %168 : vector<1x1x2x128xi1>, vector<1x1x2x128xf32>
      %170 = arith.select %151, %145, %169 : vector<1x1x2x128xi1>, vector<1x1x2x128xf32>
      %171 = arith.select %149, %135, %170 : vector<1x1x2x128xi1>, vector<1x1x2x128xf32>
      %172 = arith.select %147, %135, %171 : vector<1x1x2x128xi1>, vector<1x1x2x128xf32>
      %c0_122 = arith.constant 0 : index
      %c0_123 = arith.constant 0 : index
      %c0_124 = arith.constant 0 : index
      %c0_125 = arith.constant 0 : index
      %173 = vector.load %arg7[%c0_122, %c0_123, %c0_124, %c0_125] : memref<1x1x2x128xf32, #tpu.memory_space<vmem>>, vector<1x1x2x128xf32>
      tpu.vector_store %arg7[%c0_122, %c0_123, %c0_124, %c0_125], %172 {strides = array<i32>} : memref<1x1x2x128xf32, #tpu.memory_space<vmem>>, vector<1x1x2x128xf32>,
    } else {
    }
    %c0_56 = arith.constant 0 : index
    %c0_57 = arith.constant 0 : index
    %c0_58 = arith.constant 0 : index
    %c0_59 = arith.constant 0 : index
    %62 = vector.load %arg5[%c0_56, %c0_57, %c0_58, %c0_59] : memref<1x1x2x128xf32, #tpu.memory_space<vmem>>, vector<1x1x2x128xf32>
    %c0_60 = arith.constant 0 : index
    %c0_61 = arith.constant 0 : index
    %c0_62 = arith.constant 0 : index
    %c0_63 = arith.constant 0 : index
    %63 = vector.load %arg4[%c0_60, %c0_61, %c0_62, %c0_63] : memref<1x3x2x128xf32, #tpu.memory_space<vmem>>, vector<1x1x2x128xf32>
    tpu.vector_store %arg4[%c0_60, %c0_61, %c0_62, %c0_63], %62 {strides = array<i32>} : memref<1x3x2x128xf32, #tpu.memory_space<vmem>>, vector<1x1x2x128xf32>,
    %c0_64 = arith.constant 0 : index
    %c0_65 = arith.constant 0 : index
    %c0_66 = arith.constant 0 : index
    %c0_67 = arith.constant 0 : index
    %64 = vector.load %arg6[%c0_64, %c0_65, %c0_66, %c0_67] : memref<1x1x2x128xf32, #tpu.memory_space<vmem>>, vector<1x1x2x128xf32>
    %c0_68 = arith.constant 0 : index
    %c1_69 = arith.constant 1 : index
    %c0_70 = arith.constant 0 : index
    %c0_71 = arith.constant 0 : index
    %65 = vector.load %arg4[%c0_68, %c1_69, %c0_70, %c0_71] : memref<1x3x2x128xf32, #tpu.memory_space<vmem>>, vector<1x1x2x128xf32>
    tpu.vector_store %arg4[%c0_68, %c1_69, %c0_70, %c0_71], %64 {strides = array<i32>} : memref<1x3x2x128xf32, #tpu.memory_space<vmem>>, vector<1x1x2x128xf32>,
    %c0_72 = arith.constant 0 : index
    %c0_73 = arith.constant 0 : index
    %c0_74 = arith.constant 0 : index
    %c0_75 = arith.constant 0 : index
    %66 = vector.load %arg7[%c0_72, %c0_73, %c0_74, %c0_75] : memref<1x1x2x128xf32, #tpu.memory_space<vmem>>, vector<1x1x2x128xf32>
    %c0_76 = arith.constant 0 : index
    %c2_77 = arith.constant 2 : index
    %c0_78 = arith.constant 0 : index
    %c0_79 = arith.constant 0 : index
    %67 = vector.load %arg4[%c0_76, %c2_77, %c0_78, %c0_79] : memref<1x3x2x128xf32, #tpu.memory_space<vmem>>, vector<1x1x2x128xf32>
    tpu.vector_store %arg4[%c0_76, %c2_77, %c0_78, %c0_79], %66 {strides = array<i32>} : memref<1x3x2x128xf32, #tpu.memory_space<vmem>>, vector<1x1x2x128xf32>,
    return
  }
  func.func @transform_0(%arg0: i32) -> i32 {
    %c0_i32 = arith.constant 0 : i32
    %c0_i32_0 = arith.constant 0 : i32
    return %c0_i32 : i32
  }
  func.func @transform_1(%arg0: i32) -> i32 {
    %c0_i32 = arith.constant 0 : i32
    %c0_i32_0 = arith.constant 0 : i32
    return %c0_i32 : i32
  }
  func.func @transform_2(%arg0: i32) -> (i32, i32, i32, i32) {
    %c0_i32 = arith.constant 0 : i32
    %c0_i32_0 = arith.constant 0 : i32
    %c0_i32_1 = arith.constant 0 : i32
    %c0_i32_2 = arith.constant 0 : i32
    return %arg0, %c0_i32, %c0_i32_0, %c0_i32_1 : i32, i32, i32, i32
  }
  func.func @transform_3(%arg0: i32) -> (i32, i32, i32, i32) {
    %c0_i32 = arith.constant 0 : i32
    %c0_i32_0 = arith.constant 0 : i32
    %c0_i32_1 = arith.constant 0 : i32
    %c0_i32_2 = arith.constant 0 : i32
    return %arg0, %c0_i32, %c0_i32_0, %c0_i32_1 : i32, i32, i32, i32
  }
}

</mosaic_0001>

<bundles_post_ra>
// kernel: branch_1_fun.1
= control target key start
LH: loop header
LB: loop body
LE: loop exit
PB: predicated region body
PF: predicated region fallthrough
CT: control target
= control target key end

     0   :  { %8 = vsyncpa [#allocation6], 0  ;;  %s1393_s0 = inlined_call_operand.vmem [shape: s32[4], index: 0, kind: input, shape index: {}]   ;;  %s1394_s1 = inlined_call_operand.vmem [shape: f32[4], index: 1, kind: input, shape index: {}]   ;;  %s1395_s2 = inlined_call_operand.vmem [shape: f32[2,3,2,128], index: 2, kind: input, shape index: {}]   ;;  %s1396_s3 = inlined_call_operand.vmem [shape: f32[2,3,2,128], index: 3, kind: output, shape index: {}]  }
   0x1   :  { %9 = vsyncpa [#allocation8], 0  ;;  %s1188_s12 = smov 0  }
   0x2 LB: > { %s1019_s13 = sadd.s32 4294967295, %s1160_s12   ;;  %p1021_p0 = scmp.ge.s32.totalorder %s1160_s12, 1  ;;  %s1160_s12 = sphi %s1188_s12, %s15_s12  }
   0x3   : > { %p114_p1 = scmp.lt.s32.totalorder %s1160_s12, 3  ;;  %s126_s16 = sshll.u32 %s1393_s0, 4  ;;  %s127_s16 = int_to_ptr.vmem [resolvable:$true] %s126_s16 }
   0x4   : > { %p1082_p3 = scmp.eq.s32.totalorder %s1019_s13, 0  ;;  %s136_s19 = sshll.u32 %s1394_s1, 4  ;;  %s137_s19 = int_to_ptr.vmem [resolvable:$true] %s136_s19 }
   0x5   : > { %p115_p2 = pnand %p1021_p0, %p114_p1  ;;  %s1162_s20 = smov [#allocation5]  }
   0x6   : > { %s1163_s21 = smov [#allocation7]  }
   0x7   : > { %p1075_p4 = pneg %p115_p2 }
   0x8   : > { %157 = sbr.rel (%p115_p2) target bundleno = 1118 (0x45e), region = 32 }
   0x9   : > { %p1076_p5 = pnand %p1082_p3, %p1075_p4 }
   0xb   : > { %1078 = dma.vmem_to_smem (!%p1076_p5), %s127_s16, 16, %s1162_s20, [#allocation6]  }
   0xc   : > { %1081 = dma.vmem_to_smem (!%p1076_p5), %s137_s19, 16, %s1163_s21, [#allocation8]  }
   0xd   : > { %1151 = dma.done.wait (%p1082_p3), [#allocation6], 16  }
   0xe   : > { %1153 = vsyncadd (%p1082_p3), [#allocation6], 4294967280 }
   0xf   : > { %1155 = dma.done.wait (%p1082_p3), [#allocation8], 16  }
  0x10   : > { %1157 = vsyncadd (%p1082_p3), [#allocation8], 4294967280 }
  0x11   : > { %169 = sfence }
  0x12   : > { %p188_p6 = scmp.lt.s32.totalorder %s1019_s13, 1  ;;  %s1207_s22 = sld [smem:[#allocation7]] }
  0x13   : > { %s1209_s23 = sld [smem:[#allocation7 + $0x1]] }
  0x14   : > { %s1398_s13 = smov (!%p188_p6, %s1019_s13), 1  ;;  %s1211_s24 = sld [smem:[#allocation7 + $0x2]] }
  0x15   : > { %s1058_s25 = smul.u32 6, %s1398_s13  ;;  %s1213_s26 = sld [smem:[#allocation7 + $0x3]] }
  0x16   : > { %s1215_s27 = sld [smem:[#allocation5]] }
  0x17   : > { %s192_s30 = scalar_lea.vmem %s1395_s2, %s1058_s25  ;;  %s1223_s6 = scalar_lea.vmem %s1396_s3, %s1058_s25 }
  0x18   : > { %v198_v0 = vld [vmem:[%s192_s30] sm:$0x3]  ;;  %v1030_v1 = vld [vmem:[%s192_s30 + $0x2] sm:$0x3]  ;;  %v1031_v2 = vld [vmem:[%s192_s30 + $0x4] sm:$0x3] }
  0x19   : > { %199 = vst [vmem:[#allocation2] sm:$0x3] %v198_v0 }
  0x1a   : > { %202 = vst [vmem:[#allocation3] sm:$0x3] %v1030_v1 }
  0x1b   : > { %205 = vst [vmem:[#allocation4] sm:$0x3] %v1031_v2 }
  0x1c   : > { %p1035_p7 = scmp.ne.s32.totalorder %s1215_s27, 0 }
  0x1e   : > { %214 = sbr.rel (%p1035_p7) target bundleno = 45 (0x2d), region = 44 }
  0x23   : > { %v215_v3 = vld [vmem:[#allocation2] sm:$0x3]  ;;  %v216_v4 = vstv %s1207_s22  ;;  %v221_v5 = vld [vmem:[#allocation3] sm:$0x3]  ;;  %v226_v6 = vld [vmem:[#allocation4] sm:$0x3] }
  0x24   : > { %v217_v7 = vmul.f32 %v216_v4, %v215_v3  ;;  %v222_v8 = vmul.f32 %v221_v5, %v216_v4  ;;  %v227_v9 = vmul.f32 %v226_v6, %v216_v4 }
  0x26   : > { %v218_v10 = vmax.f32 %v217_v7, 0.0  ;;  %v223_v11 = vmax.f32 %v222_v8, 0.0  ;;  %v228_v12 = vmax.f32 %v227_v9, 0.0 }
  0x28   : > { %v219_v13 = vmin.f32 %v218_v10, 1.0  ;;  %v224_v14 = vmin.f32 %v223_v11, 1.0  ;;  %v229_v15 = vmin.f32 %v228_v12, 1.0 }
  0x2a   : > { %220 = vst [vmem:[#allocation2] sm:$0x3] %v219_v13 }
  0x2b   : > { %225 = vst [vmem:[#allocation3] sm:$0x3] %v224_v14 }
  0x2c   : > { %230 = vst [vmem:[#allocation4] sm:$0x3] %v229_v15 }
  0x2d PF: > { %p1036_p8 = scmp.ne.s32.totalorder %s1215_s27, 1 }
  0x2e   : > { %s255_s7 = ssub.f32 (!%p1036_p8), 1.0, %s1209_s23 }
  0x2f   : > { %234 = sbr.rel (%p1036_p8) target bundleno = 202 (0xca), region = 48 }
  0x34   : > { %v235_v16 = vld [vmem:[#allocation2] sm:$0x3]  ;;  %v236_v17 = vld [vmem:[#allocation3] sm:$0x3]  ;;  %v237_v18 = vld [vmem:[#allocation4] sm:$0x3]  ;;  %v256_v32 = vstv %s1209_s23  ;;  %v258_v34 = vstv %s255_s7 }
  0x35   : > { %v238_v19 = vmul.f32 0.2989, %v235_v16  ;;  %v239_v20 = vmul.f32 0.587, %v236_v17  ;;  %v241_v21 = vmul.f32 0.114, %v237_v18  ;;  %v257_v35 = vmul.f32 %v256_v32, %v235_v16 }
  0x36   : > { %vm243_vm0 = vcmask 1041408   ;;  %v264_v36 = vmul.f32 %v256_v32, %v236_v17  ;;  %v269_v37 = vmul.f32 %v256_v32, %v237_v18 }
  0x37   : > { %v240_v22 = vadd.f32 %v239_v20, %v238_v19 }
  0x39   : > { %v242_v23 = vadd.f32 %v241_v21, %v240_v22 }
  0x3b   : > { %v244_v24 = vsel %vm243_vm0, %v242_v23, 0.0 }
  0x3c   : > { %245 = vadd.xlane.f32.xlu0 %v244_v24 }
  0xaf   : > { %v246_v25 = vpop.xlane.xlu0 %245 }
  0xb0   : > { %v247_v26 = vsel %vm243_vm0, %v246_v25, 0.0 }
  0xb1   : > { %v248_v27 = vrot.slane %v247_v26, 4 }
  0xb3   : > { %v249_v28 = vadd.f32 %v248_v27, %v247_v26 }
  0xb5   : > { %v250_v29 = vrot.slane %v249_v28, 2 }
  0xb7   : > { %v251_v30 = vadd.f32 %v250_v29, %v249_v28 }
  0xb9   : > { %v252_v31 = vrot.slane %v251_v30, 1 }
  0xbb   : > { %v253_v33 = vadd.f32 %v252_v31, %v251_v30 }
  0xbd   : > { %v254_v38 = vmul.f32 0.00390625, %v253_v33 }
  0xbf   : > { %v259_v39 = vmul.f32 %v258_v34, %v254_v38 }
  0xc1   : > { %v260_v40 = vadd.f32 %v259_v39, %v257_v35  ;;  %v265_v41 = vadd.f32 %v264_v36, %v259_v39  ;;  %v270_v42 = vadd.f32 %v269_v37, %v259_v39 }
  0xc3   : > { %v261_v43 = vmax.f32 %v260_v40, 0.0  ;;  %v266_v44 = vmax.f32 %v265_v41, 0.0  ;;  %v271_v45 = vmax.f32 %v270_v42, 0.0 }
  0xc5   : > { %v262_v46 = vmin.f32 %v261_v43, 1.0  ;;  %v267_v47 = vmin.f32 %v266_v44, 1.0  ;;  %v272_v48 = vmin.f32 %v271_v45, 1.0 }
  0xc7   : > { %263 = vst [vmem:[#allocation2] sm:$0x3] %v262_v46 }
  0xc8   : > { %268 = vst [vmem:[#allocation3] sm:$0x3] %v267_v47 }
  0xc9   : > { %273 = vst [vmem:[#allocation4] sm:$0x3] %v272_v48 }
  0xca PF: > { %p1037_p9 = scmp.ne.s32.totalorder %s1215_s27, 2 }
  0xcb   : > { %s286_s8 = ssub.f32 (!%p1037_p9), 1.0, %s1211_s24 }
  0xcc   : > { %277 = sbr.rel (%p1037_p9) target bundleno = 227 (0xe3), region = 52 }
  0xd1   : > { %v278_v49 = vld [vmem:[#allocation2] sm:$0x3]  ;;  %v279_v50 = vld [vmem:[#allocation3] sm:$0x3]  ;;  %v280_v51 = vld [vmem:[#allocation4] sm:$0x3]  ;;  %v287_v55 = vstv %s1211_s24  ;;  %v289_v57 = vstv %s286_s8 }
  0xd2   : > { %v281_v52 = vmul.f32 0.2989, %v278_v49  ;;  %v282_v53 = vmul.f32 0.587, %v279_v50  ;;  %v284_v54 = vmul.f32 0.114, %v280_v51  ;;  %v288_v59 = vmul.f32 %v287_v55, %v278_v49 }
  0xd3   : > { %v295_v60 = vmul.f32 %v287_v55, %v279_v50  ;;  %v300_v61 = vmul.f32 %v287_v55, %v280_v51 }
  0xd4   : > { %v283_v56 = vadd.f32 %v282_v53, %v281_v52 }
  0xd6   : > { %v285_v58 = vadd.f32 %v284_v54, %v283_v56 }
  0xd8   : > { %v290_v62 = vmul.f32 %v289_v57, %v285_v58 }
  0xda   : > { %v291_v63 = vadd.f32 %v290_v62, %v288_v59  ;;  %v296_v0 = vadd.f32 %v295_v60, %v290_v62  ;;  %v301_v1 = vadd.f32 %v300_v61, %v290_v62 }
  0xdc   : > { %v292_v2 = vmax.f32 %v291_v63, 0.0  ;;  %v297_v3 = vmax.f32 %v296_v0, 0.0  ;;  %v302_v4 = vmax.f32 %v301_v1, 0.0 }
  0xde   : > { %v293_v5 = vmin.f32 %v292_v2, 1.0  ;;  %v298_v6 = vmin.f32 %v297_v3, 1.0  ;;  %v303_v7 = vmin.f32 %v302_v4, 1.0 }
  0xe0   : > { %294 = vst [vmem:[#allocation2] sm:$0x3] %v293_v5 }
  0xe1   : > { %299 = vst [vmem:[#allocation3] sm:$0x3] %v298_v6 }
  0xe2   : > { %304 = vst [vmem:[#allocation4] sm:$0x3] %v303_v7 }
  0xe3 PF: > { %p1038_p10 = scmp.ne.s32.totalorder %s1215_s27, 3 }
  0xe5   : > { %308 = sbr.rel (%p1038_p10) target bundleno = 294 (0x126), region = 56 }
  0xea   : > { %v309_v8 = vld [vmem:[#allocation2] sm:$0x3]  ;;  %v310_v9 = vld [vmem:[#allocation3] sm:$0x3]  ;;  %v311_v10 = vld [vmem:[#allocation4] sm:$0x3]  ;;  %v350_v38 = vstv %s1213_s26 }
  0xeb   : > { %v312_v11 = vmax.f32 %v309_v8, %v310_v9  ;;  %v314_v12 = vmin.f32 %v309_v8, %v310_v9  ;;  %vm1164_vm4 = vmmov 1  }
  0xed   : > { %v1234_v13 = vmax.f32 %v312_v11, %v311_v10  ;;  %v315_v14 = vmin.f32 %v314_v12, %v311_v10 }
  0xef   : > { %vm316_vm1 = vcmp.eq.f32.partialorder %v1234_v13, %v315_v14  ;;  %v317_v15 = vsub.f32 %v1234_v13, %v315_v14  ;;  %v324_v17 = vsub.f32 %v1234_v13, %v309_v8  ;;  %v326_v18 = vsub.f32 %v1234_v13, %v310_v9 }
  0xf0   : > { %v328_v19 = vsub.f32 %v1234_v13, %v311_v10  ;;  %vm330_vm2 = vcmp.eq.f32.partialorder %v1234_v13, %v309_v8  ;;  %vm331_vm3 = vcmp.eq.f32.partialorder %v1234_v13, %v310_v9  ;;  %v318_v34 = vsel %vm316_vm1, 1.0, %v1234_v13 }
  0xf1   : > { %v320_v16 = vsel %vm316_vm1, 1.0, %v317_v15  ;;  %vm334_vm5 = vmxor %vm330_vm2, %vm1164_vm4 }
  0xf2   : > { %1100 = vrcp.f32 %v320_v16  ;;  %vm339_vm6 = vmxor %vm331_vm3, %vm1164_vm4 }
  0xf3   : > { %vm335_vm7 = vmand %vm331_vm3, %vm334_vm5  ;;  %1102 = vrcp.f32 %v318_v34 }
  0xf4   : > { %vm340_vm8 = vmand %vm339_vm6, %vm334_vm5 }
  0xf8   : > { %v1101_v20 = vpop.eup %1100 }
  0xf9   : > { %v325_v21 = vmul.f32 %v1101_v20, %v324_v17  ;;  %v327_v22 = vmul.f32 %v1101_v20, %v326_v18  ;;  %v329_v23 = vmul.f32 %v1101_v20, %v328_v19  ;;  %v1103_v41 = vpop.eup %1102 }
  0xfa   : > { %v322_v43 = vmul.f32 %v1103_v41, %v317_v15 }
  0xfb   : > { %v332_v24 = vsub.f32 %v329_v23, %v327_v22  ;;  %v336_v25 = vadd.f32 2.0, %v325_v21  ;;  %v341_v26 = vadd.f32 4.0, %v327_v22 }
  0xfc   : > { %v323_v46 = vmin.f32 %v322_v43, 1.0 }
  0xfd   : > { %v333_v27 = vsel %vm330_vm2, %v332_v24, 0.0  ;;  %v337_v28 = vsub.f32 %v336_v25, %v329_v23  ;;  %v342_v29 = vsub.f32 %v341_v26, %v325_v21 }
  0xfe   : > { %v360_v50 = vsub.f32 1.0, %v323_v46 }
  0xff   : > { %v338_v30 = vsel %vm335_vm7, %v337_v28, 0.0  ;;  %v343_v31 = vsel %vm340_vm8, %v342_v29, 0.0 }
 0x100   : > { %v344_v32 = vadd.f32 %v338_v30, %v333_v27  ;;  %v361_v54 = vmul.f32 %v360_v50, %v1234_v13 }
 0x102   : > { %v345_v33 = vadd.f32 %v344_v32, %v343_v31 }
 0x104   : > { %v346_v35 = vmul.f32 0.16666667, %v345_v33 }
 0x106   : > { %v347_v36 = vadd.f32 1.0, %v346_v35 }
 0x108   : > { %v348_v37 = vfloor.f32 %v347_v36 }
 0x10a   : > { %v349_v39 = vsub.f32 %v347_v36, %v348_v37 }
 0x10c   : > { %v351_v40 = vadd.f32 %v350_v38, %v349_v39 }
 0x10e   : > { %v352_v42 = vfloor.f32 %v351_v40 }
 0x110   : > { %v353_v44 = vsub.f32 %v351_v40, %v352_v42 }
 0x112   : > { %v354_v45 = vmul.f32 6.0, %v353_v44 }
 0x114   : > { %v355_v47 = vfloor.f32 %v354_v45 }
 0x116   : > { %v356_v48 = vsub.f32 %v354_v45, %v355_v47  ;;  %v1060_v49 = vcvt.f32.s32 %v355_v47 }
 0x118   : > { %vm358_vm9 = vcmp.gt.s32.totalorder %v1060_v49, 5  ;;  %v362_v51 = vmul.f32 %v356_v48, %v323_v46  ;;  %v365_v52 = vsub.f32 1.0, %v356_v48 }
 0x119   : > { %v359_v53 = vsel %vm358_vm9, 0, %v1060_v49 }
 0x11a   : > { %v363_v55 = vsub.f32 1.0, %v362_v51  ;;  %v366_v56 = vmul.f32 %v365_v52, %v323_v46  ;;  %vm372_vm10 = vcmp.eq.s32.totalorder %v359_v53, 3  ;;  %vm373_vm11 = vcmp.eq.s32.totalorder %v359_v53, 4 }
 0x11b   : > { %vm371_vm12 = vcmp.eq.s32.totalorder %v359_v53, 2  ;;  %vm370_vm13 = vcmp.eq.s32.totalorder %v359_v53, 1  ;;  %vm369_vm14 = vcmp.eq.s32.totalorder %v359_v53, 0 }
 0x11c   : > { %v364_v57 = vmul.f32 %v363_v55, %v1234_v13  ;;  %v367_v58 = vsub.f32 1.0, %v366_v56 }
 0x11e   : > { %v368_v59 = vmul.f32 %v367_v58, %v1234_v13  ;;  %v380_v60 = vsel %vm372_vm10, %v364_v57, %v361_v54  ;;  %v385_v61 = vsel %vm373_vm11, %v1234_v13, %v364_v57 }
 0x11f   : > { %v381_v62 = vsel %vm371_vm12, %v1234_v13, %v380_v60  ;;  %v386_v63 = vsel %vm372_vm10, %v1234_v13, %v385_v61 }
 0x120   : > { %v374_v0 = vsel %vm373_vm11, %v368_v59, %v1234_v13  ;;  %v382_v1 = vsel %vm370_vm13, %v1234_v13, %v381_v62  ;;  %v387_v2 = vsel %vm371_vm12, %v368_v59, %v386_v63 }
 0x121   : > { %v375_v3 = vsel %vm372_vm10, %v361_v54, %v374_v0  ;;  %v383_v4 = vsel %vm369_vm14, %v368_v59, %v382_v1  ;;  %v388_v5 = vsel %vm370_vm13, %v361_v54, %v387_v2 }
 0x122   : > { %v376_v6 = vsel %vm371_vm12, %v361_v54, %v375_v3  ;;  %384 = vst [vmem:[#allocation3] sm:$0x3] %v383_v4  ;;  %v389_v7 = vsel %vm369_vm14, %v361_v54, %v388_v5 }
 0x123   : > { %v377_v8 = vsel %vm370_vm13, %v364_v57, %v376_v6  ;;  %390 = vst [vmem:[#allocation4] sm:$0x3] %v389_v7 }
 0x124   : > { %v378_v9 = vsel %vm369_vm14, %v1234_v13, %v377_v8 }
 0x125   : > { %379 = vst [vmem:[#allocation2] sm:$0x3] %v378_v9 }
 0x126 PF: > { %s1264_s9 = sld [smem:[#allocation5 + $0x1]] }
 0x12c   : > { %p1040_p11 = scmp.ne.s32.totalorder %s1264_s9, 0 }
 0x12e   : > { %395 = sbr.rel (%p1040_p11) target bundleno = 317 (0x13d), region = 60 }
 0x133   : > { %v396_v10 = vld [vmem:[#allocation2] sm:$0x3]  ;;  %v397_v11 = vstv %s1207_s22  ;;  %v402_v12 = vld [vmem:[#allocation3] sm:$0x3]  ;;  %v407_v14 = vld [vmem:[#allocation4] sm:$0x3] }
 0x134   : > { %v398_v15 = vmul.f32 %v397_v11, %v396_v10  ;;  %v403_v16 = vmul.f32 %v402_v12, %v397_v11  ;;  %v408_v17 = vmul.f32 %v407_v14, %v397_v11 }
 0x136   : > { %v399_v18 = vmax.f32 %v398_v15, 0.0  ;;  %v404_v19 = vmax.f32 %v403_v16, 0.0  ;;  %v409_v20 = vmax.f32 %v408_v17, 0.0 }
 0x138   : > { %v400_v21 = vmin.f32 %v399_v18, 1.0  ;;  %v405_v13 = vmin.f32 %v404_v19, 1.0  ;;  %v410_v22 = vmin.f32 %v409_v20, 1.0 }
 0x13a   : > { %401 = vst [vmem:[#allocation2] sm:$0x3] %v400_v21 }
 0x13b   : > { %406 = vst [vmem:[#allocation3] sm:$0x3] %v405_v13 }
 0x13c   : > { %411 = vst [vmem:[#allocation4] sm:$0x3] %v410_v22 }
 0x13d PF: > { %p1041_p12 = scmp.ne.s32.totalorder %s1264_s9, 1 }
 0x13e   : > { %s436_s10 = ssub.f32 (!%p1041_p12), 1.0, %s1209_s23 }
 0x13f   : > { %415 = sbr.rel (%p1041_p12) target bundleno = 474 (0x1da), region = 64 }
 0x144   : > { %v416_v23 = vld [vmem:[#allocation2] sm:$0x3]  ;;  %v417_v24 = vld [vmem:[#allocation3] sm:$0x3]  ;;  %v418_v25 = vld [vmem:[#allocation4] sm:$0x3]  ;;  %v437_v39 = vstv %s1209_s23  ;;  %v439_v41 = vstv %s436_s10 }
 0x145   : > { %v419_v26 = vmul.f32 0.2989, %v416_v23  ;;  %v420_v27 = vmul.f32 0.587, %v417_v24  ;;  %v422_v28 = vmul.f32 0.114, %v418_v25  ;;  %v438_v42 = vmul.f32 %v437_v39, %v416_v23 }
 0x146   : > { %vm424_vm15 = vcmask 1041408   ;;  %v445_v43 = vmul.f32 %v437_v39, %v417_v24  ;;  %v450_v44 = vmul.f32 %v437_v39, %v418_v25 }
 0x147   : > { %v421_v29 = vadd.f32 %v420_v27, %v419_v26 }
 0x149   : > { %v423_v30 = vadd.f32 %v422_v28, %v421_v29 }
 0x14b   : > { %v425_v31 = vsel %vm424_vm15, %v423_v30, 0.0 }
 0x14c   : > { %426 = vadd.xlane.f32.xlu0 %v425_v31 }
 0x1bf   : > { %v427_v32 = vpop.xlane.xlu0 %426 }
 0x1c0   : > { %v428_v33 = vsel %vm424_vm15, %v427_v32, 0.0 }
 0x1c1   : > { %v429_v34 = vrot.slane %v428_v33, 4 }
 0x1c3   : > { %v430_v35 = vadd.f32 %v429_v34, %v428_v33 }
 0x1c5   : > { %v431_v36 = vrot.slane %v430_v35, 2 }
 0x1c7   : > { %v432_v37 = vadd.f32 %v431_v36, %v430_v35 }
 0x1c9   : > { %v433_v38 = vrot.slane %v432_v37, 1 }
 0x1cb   : > { %v434_v40 = vadd.f32 %v433_v38, %v432_v37 }
 0x1cd   : > { %v435_v45 = vmul.f32 0.00390625, %v434_v40 }
 0x1cf   : > { %v440_v46 = vmul.f32 %v439_v41, %v435_v45 }
 0x1d1   : > { %v441_v47 = vadd.f32 %v440_v46, %v438_v42  ;;  %v446_v48 = vadd.f32 %v445_v43, %v440_v46  ;;  %v451_v49 = vadd.f32 %v450_v44, %v440_v46 }
 0x1d3   : > { %v442_v50 = vmax.f32 %v441_v47, 0.0  ;;  %v447_v51 = vmax.f32 %v446_v48, 0.0  ;;  %v452_v52 = vmax.f32 %v451_v49, 0.0 }
 0x1d5   : > { %v443_v53 = vmin.f32 %v442_v50, 1.0  ;;  %v448_v54 = vmin.f32 %v447_v51, 1.0  ;;  %v453_v55 = vmin.f32 %v452_v52, 1.0 }
 0x1d7   : > { %444 = vst [vmem:[#allocation2] sm:$0x3] %v443_v53 }
 0x1d8   : > { %449 = vst [vmem:[#allocation3] sm:$0x3] %v448_v54 }
 0x1d9   : > { %454 = vst [vmem:[#allocation4] sm:$0x3] %v453_v55 }
 0x1da PF: > { %p1042_p13 = scmp.ne.s32.totalorder %s1264_s9, 2 }
 0x1db   : > { %s467_s11 = ssub.f32 (!%p1042_p13), 1.0, %s1211_s24 }
 0x1dc   : > { %458 = sbr.rel (%p1042_p13) target bundleno = 499 (0x1f3), region = 68 }
 0x1e1   : > { %v459_v56 = vld [vmem:[#allocation2] sm:$0x3]  ;;  %v460_v57 = vld [vmem:[#allocation3] sm:$0x3]  ;;  %v461_v58 = vld [vmem:[#allocation4] sm:$0x3]  ;;  %v468_v62 = vstv %s1211_s24  ;;  %v470_v0 = vstv %s467_s11 }
 0x1e2   : > { %v462_v59 = vmul.f32 0.2989, %v459_v56  ;;  %v463_v60 = vmul.f32 0.587, %v460_v57  ;;  %v465_v61 = vmul.f32 0.114, %v461_v58  ;;  %v469_v2 = vmul.f32 %v468_v62, %v459_v56 }
 0x1e3   : > { %v476_v3 = vmul.f32 %v468_v62, %v460_v57  ;;  %v481_v4 = vmul.f32 %v468_v62, %v461_v58 }
 0x1e4   : > { %v464_v63 = vadd.f32 %v463_v60, %v462_v59 }
 0x1e6   : > { %v466_v1 = vadd.f32 %v465_v61, %v464_v63 }
 0x1e8   : > { %v471_v5 = vmul.f32 %v470_v0, %v466_v1 }
 0x1ea   : > { %v472_v6 = vadd.f32 %v471_v5, %v469_v2  ;;  %v477_v7 = vadd.f32 %v476_v3, %v471_v5  ;;  %v482_v8 = vadd.f32 %v481_v4, %v471_v5 }
 0x1ec   : > { %v473_v9 = vmax.f32 %v472_v6, 0.0  ;;  %v478_v10 = vmax.f32 %v477_v7, 0.0  ;;  %v483_v11 = vmax.f32 %v482_v8, 0.0 }
 0x1ee   : > { %v474_v12 = vmin.f32 %v473_v9, 1.0  ;;  %v479_v14 = vmin.f32 %v478_v10, 1.0  ;;  %v484_v15 = vmin.f32 %v483_v11, 1.0 }
 0x1f0   : > { %475 = vst [vmem:[#allocation2] sm:$0x3] %v474_v12 }
 0x1f1   : > { %480 = vst [vmem:[#allocation3] sm:$0x3] %v479_v14 }
 0x1f2   : > { %485 = vst [vmem:[#allocation4] sm:$0x3] %v484_v15 }
 0x1f3 PF: > { %p1043_p0 = scmp.ne.s32.totalorder %s1264_s9, 3 }
 0x1f5   : > { %489 = sbr.rel (%p1043_p0) target bundleno = 566 (0x236), region = 72 }
 0x1fa   : > { %v490_v16 = vld [vmem:[#allocation2] sm:$0x3]  ;;  %v491_v17 = vld [vmem:[#allocation3] sm:$0x3]  ;;  %v492_v18 = vld [vmem:[#allocation4] sm:$0x3]  ;;  %v531_v45 = vstv %s1213_s26 }
 0x1fb   : > { %v493_v19 = vmax.f32 %v490_v16, %v491_v17  ;;  %v495_v20 = vmin.f32 %v490_v16, %v491_v17  ;;  %vm1165_vm3 = vmmov 1  }
 0x1fd   : > { %v1275_v21 = vmax.f32 %v493_v19, %v492_v18  ;;  %v496_v13 = vmin.f32 %v495_v20, %v492_v18 }
 0x1ff   : > { %vm497_vm0 = vcmp.eq.f32.partialorder %v1275_v21, %v496_v13  ;;  %v498_v22 = vsub.f32 %v1275_v21, %v496_v13  ;;  %v505_v24 = vsub.f32 %v1275_v21, %v490_v16  ;;  %v507_v25 = vsub.f32 %v1275_v21, %v491_v17 }
 0x200   : > { %v509_v26 = vsub.f32 %v1275_v21, %v492_v18  ;;  %vm511_vm1 = vcmp.eq.f32.partialorder %v1275_v21, %v490_v16  ;;  %vm512_vm2 = vcmp.eq.f32.partialorder %v1275_v21, %v491_v17  ;;  %v499_v41 = vsel %vm497_vm0, 1.0, %v1275_v21 }
 0x201   : > { %v501_v23 = vsel %vm497_vm0, 1.0, %v498_v22  ;;  %vm515_vm4 = vmxor %vm511_vm1, %vm1165_vm3 }
 0x202   : > { %1104 = vrcp.f32 %v501_v23  ;;  %vm520_vm5 = vmxor %vm512_vm2, %vm1165_vm3 }
 0x203   : > { %vm516_vm6 = vmand %vm512_vm2, %vm515_vm4  ;;  %1106 = vrcp.f32 %v499_v41 }
 0x204   : > { %vm521_vm7 = vmand %vm520_vm5, %vm515_vm4 }
 0x208   : > { %v1105_v27 = vpop.eup %1104 }
 0x209   : > { %v506_v28 = vmul.f32 %v1105_v27, %v505_v24  ;;  %v508_v29 = vmul.f32 %v1105_v27, %v507_v25  ;;  %v510_v30 = vmul.f32 %v1105_v27, %v509_v26  ;;  %v1107_v48 = vpop.eup %1106 }
 0x20a   : > { %v503_v50 = vmul.f32 %v1107_v48, %v498_v22 }
 0x20b   : > { %v513_v31 = vsub.f32 %v510_v30, %v508_v29  ;;  %v517_v32 = vadd.f32 2.0, %v506_v28  ;;  %v522_v33 = vadd.f32 4.0, %v508_v29 }
 0x20c   : > { %v504_v53 = vmin.f32 %v503_v50, 1.0 }
 0x20d   : > { %v514_v34 = vsel %vm511_vm1, %v513_v31, 0.0  ;;  %v518_v35 = vsub.f32 %v517_v32, %v510_v30  ;;  %v523_v36 = vsub.f32 %v522_v33, %v506_v28 }
 0x20e   : > { %v541_v57 = vsub.f32 1.0, %v504_v53 }
 0x20f   : > { %v519_v37 = vsel %vm516_vm6, %v518_v35, 0.0  ;;  %v524_v38 = vsel %vm521_vm7, %v523_v36, 0.0 }
 0x210   : > { %v525_v39 = vadd.f32 %v519_v37, %v514_v34  ;;  %v542_v61 = vmul.f32 %v541_v57, %v1275_v21 }
 0x212   : > { %v526_v40 = vadd.f32 %v525_v39, %v524_v38 }
 0x214   : > { %v527_v42 = vmul.f32 0.16666667, %v526_v40 }
 0x216   : > { %v528_v43 = vadd.f32 1.0, %v527_v42 }
 0x218   : > { %v529_v44 = vfloor.f32 %v528_v43 }
 0x21a   : > { %v530_v46 = vsub.f32 %v528_v43, %v529_v44 }
 0x21c   : > { %v532_v47 = vadd.f32 %v531_v45, %v530_v46 }
 0x21e   : > { %v533_v49 = vfloor.f32 %v532_v47 }
 0x220   : > { %v534_v51 = vsub.f32 %v532_v47, %v533_v49 }
 0x222   : > { %v535_v52 = vmul.f32 6.0, %v534_v51 }
 0x224   : > { %v536_v54 = vfloor.f32 %v535_v52 }
 0x226   : > { %v537_v55 = vsub.f32 %v535_v52, %v536_v54  ;;  %v1062_v56 = vcvt.f32.s32 %v536_v54 }
 0x228   : > { %vm539_vm8 = vcmp.gt.s32.totalorder %v1062_v56, 5  ;;  %v543_v58 = vmul.f32 %v537_v55, %v504_v53  ;;  %v546_v59 = vsub.f32 1.0, %v537_v55 }
 0x229   : > { %v540_v60 = vsel %vm539_vm8, 0, %v1062_v56 }
 0x22a   : > { %v544_v62 = vsub.f32 1.0, %v543_v58  ;;  %v547_v63 = vmul.f32 %v546_v59, %v504_v53  ;;  %vm553_vm9 = vcmp.eq.s32.totalorder %v540_v60, 3  ;;  %vm554_vm10 = vcmp.eq.s32.totalorder %v540_v60, 4 }
 0x22b   : > { %vm552_vm11 = vcmp.eq.s32.totalorder %v540_v60, 2  ;;  %vm551_vm12 = vcmp.eq.s32.totalorder %v540_v60, 1  ;;  %vm550_vm13 = vcmp.eq.s32.totalorder %v540_v60, 0 }
 0x22c   : > { %v545_v0 = vmul.f32 %v544_v62, %v1275_v21  ;;  %v548_v1 = vsub.f32 1.0, %v547_v63 }
 0x22e   : > { %v549_v2 = vmul.f32 %v548_v1, %v1275_v21  ;;  %v561_v3 = vsel %vm553_vm9, %v545_v0, %v542_v61  ;;  %v566_v4 = vsel %vm554_vm10, %v1275_v21, %v545_v0 }
 0x22f   : > { %v562_v5 = vsel %vm552_vm11, %v1275_v21, %v561_v3  ;;  %v567_v6 = vsel %vm553_vm9, %v1275_v21, %v566_v4 }
 0x230   : > { %v555_v7 = vsel %vm554_vm10, %v549_v2, %v1275_v21  ;;  %v563_v8 = vsel %vm551_vm12, %v1275_v21, %v562_v5  ;;  %v568_v9 = vsel %vm552_vm11, %v549_v2, %v567_v6 }
 0x231   : > { %v556_v10 = vsel %vm553_vm9, %v542_v61, %v555_v7  ;;  %v564_v11 = vsel %vm550_vm13, %v549_v2, %v563_v8  ;;  %v569_v12 = vsel %vm551_vm12, %v542_v61, %v568_v9 }
 0x232   : > { %v557_v14 = vsel %vm552_vm11, %v542_v61, %v556_v10  ;;  %565 = vst [vmem:[#allocation3] sm:$0x3] %v564_v11  ;;  %v570_v15 = vsel %vm550_vm13, %v542_v61, %v569_v12 }
 0x233   : > { %v558_v16 = vsel %vm551_vm12, %v545_v0, %v557_v14  ;;  %571 = vst [vmem:[#allocation4] sm:$0x3] %v570_v15 }
 0x234   : > { %v559_v17 = vsel %vm550_vm13, %v1275_v21, %v558_v16 }
 0x235   : > { %560 = vst [vmem:[#allocation2] sm:$0x3] %v559_v17 }
 0x236 PF: > { %s1305_s13 = sld [smem:[#allocation5 + $0x2]] }
 0x23c   : > { %p1045_p1 = scmp.ne.s32.totalorder %s1305_s13, 0 }
 0x23e   : > { %576 = sbr.rel (%p1045_p1) target bundleno = 589 (0x24d), region = 76 }
 0x243   : > { %v577_v18 = vld [vmem:[#allocation2] sm:$0x3]  ;;  %v578_v19 = vstv %s1207_s22  ;;  %v583_v20 = vld [vmem:[#allocation3] sm:$0x3]  ;;  %v588_v13 = vld [vmem:[#allocation4] sm:$0x3] }
 0x244   : > { %v579_v22 = vmul.f32 %v578_v19, %v577_v18  ;;  %v584_v23 = vmul.f32 %v583_v20, %v578_v19  ;;  %v589_v24 = vmul.f32 %v588_v13, %v578_v19 }
 0x246   : > { %v580_v25 = vmax.f32 %v579_v22, 0.0  ;;  %v585_v26 = vmax.f32 %v584_v23, 0.0  ;;  %v590_v27 = vmax.f32 %v589_v24, 0.0 }
 0x248   : > { %v581_v28 = vmin.f32 %v580_v25, 1.0  ;;  %v586_v21 = vmin.f32 %v585_v26, 1.0  ;;  %v591_v29 = vmin.f32 %v590_v27, 1.0 }
 0x24a   : > { %582 = vst [vmem:[#allocation2] sm:$0x3] %v581_v28 }
 0x24b   : > { %587 = vst [vmem:[#allocation3] sm:$0x3] %v586_v21 }
 0x24c   : > { %592 = vst [vmem:[#allocation4] sm:$0x3] %v591_v29 }
 0x24d PF: > { %p1046_p2 = scmp.ne.s32.totalorder %s1305_s13, 1 }
 0x24e   : > { %s617_s14 = ssub.f32 (!%p1046_p2), 1.0, %s1209_s23 }
 0x24f   : > { %596 = sbr.rel (%p1046_p2) target bundleno = 746 (0x2ea), region = 80 }
 0x254   : > { %v597_v30 = vld [vmem:[#allocation2] sm:$0x3]  ;;  %v598_v31 = vld [vmem:[#allocation3] sm:$0x3]  ;;  %v599_v32 = vld [vmem:[#allocation4] sm:$0x3]  ;;  %v618_v46 = vstv %s1209_s23  ;;  %v620_v48 = vstv %s617_s14 }
 0x255   : > { %v600_v33 = vmul.f32 0.2989, %v597_v30  ;;  %v601_v34 = vmul.f32 0.587, %v598_v31  ;;  %v603_v35 = vmul.f32 0.114, %v599_v32  ;;  %v619_v49 = vmul.f32 %v618_v46, %v597_v30 }
 0x256   : > { %vm605_vm14 = vcmask 1041408   ;;  %v626_v50 = vmul.f32 %v618_v46, %v598_v31  ;;  %v631_v51 = vmul.f32 %v618_v46, %v599_v32 }
 0x257   : > { %v602_v36 = vadd.f32 %v601_v34, %v600_v33 }
 0x259   : > { %v604_v37 = vadd.f32 %v603_v35, %v602_v36 }
 0x25b   : > { %v606_v38 = vsel %vm605_vm14, %v604_v37, 0.0 }
 0x25c   : > { %607 = vadd.xlane.f32.xlu0 %v606_v38 }
 0x2cf   : > { %v608_v39 = vpop.xlane.xlu0 %607 }
 0x2d0   : > { %v609_v40 = vsel %vm605_vm14, %v608_v39, 0.0 }
 0x2d1   : > { %v610_v41 = vrot.slane %v609_v40, 4 }
 0x2d3   : > { %v611_v42 = vadd.f32 %v610_v41, %v609_v40 }
 0x2d5   : > { %v612_v43 = vrot.slane %v611_v42, 2 }
 0x2d7   : > { %v613_v44 = vadd.f32 %v612_v43, %v611_v42 }
 0x2d9   : > { %v614_v45 = vrot.slane %v613_v44, 1 }
 0x2db   : > { %v615_v47 = vadd.f32 %v614_v45, %v613_v44 }
 0x2dd   : > { %v616_v52 = vmul.f32 0.00390625, %v615_v47 }
 0x2df   : > { %v621_v53 = vmul.f32 %v620_v48, %v616_v52 }
 0x2e1   : > { %v622_v54 = vadd.f32 %v621_v53, %v619_v49  ;;  %v627_v55 = vadd.f32 %v626_v50, %v621_v53  ;;  %v632_v56 = vadd.f32 %v631_v51, %v621_v53 }
 0x2e3   : > { %v623_v57 = vmax.f32 %v622_v54, 0.0  ;;  %v628_v58 = vmax.f32 %v627_v55, 0.0  ;;  %v633_v59 = vmax.f32 %v632_v56, 0.0 }
 0x2e5   : > { %v624_v60 = vmin.f32 %v623_v57, 1.0  ;;  %v629_v61 = vmin.f32 %v628_v58, 1.0  ;;  %v634_v62 = vmin.f32 %v633_v59, 1.0 }
 0x2e7   : > { %625 = vst [vmem:[#allocation2] sm:$0x3] %v624_v60 }
 0x2e8   : > { %630 = vst [vmem:[#allocation3] sm:$0x3] %v629_v61 }
 0x2e9   : > { %635 = vst [vmem:[#allocation4] sm:$0x3] %v634_v62 }
 0x2ea PF: > { %p1047_p3 = scmp.ne.s32.totalorder %s1305_s13, 2 }
 0x2eb   : > { %s648_s15 = ssub.f32 (!%p1047_p3), 1.0, %s1211_s24 }
 0x2ec   : > { %639 = sbr.rel (%p1047_p3) target bundleno = 771 (0x303), region = 84 }
 0x2f1   : > { %v640_v63 = vld [vmem:[#allocation2] sm:$0x3]  ;;  %v641_v0 = vld [vmem:[#allocation3] sm:$0x3]  ;;  %v642_v1 = vld [vmem:[#allocation4] sm:$0x3]  ;;  %v649_v5 = vstv %s1211_s24  ;;  %v651_v7 = vstv %s648_s15 }
 0x2f2   : > { %v643_v2 = vmul.f32 0.2989, %v640_v63  ;;  %v644_v3 = vmul.f32 0.587, %v641_v0  ;;  %v646_v4 = vmul.f32 0.114, %v642_v1  ;;  %v650_v9 = vmul.f32 %v649_v5, %v640_v63 }
 0x2f3   : > { %v657_v10 = vmul.f32 %v649_v5, %v641_v0  ;;  %v662_v11 = vmul.f32 %v649_v5, %v642_v1 }
 0x2f4   : > { %v645_v6 = vadd.f32 %v644_v3, %v643_v2 }
 0x2f6   : > { %v647_v8 = vadd.f32 %v646_v4, %v645_v6 }
 0x2f8   : > { %v652_v12 = vmul.f32 %v651_v7, %v647_v8 }
 0x2fa   : > { %v653_v14 = vadd.f32 %v652_v12, %v650_v9  ;;  %v658_v15 = vadd.f32 %v657_v10, %v652_v12  ;;  %v663_v16 = vadd.f32 %v662_v11, %v652_v12 }
 0x2fc   : > { %v654_v17 = vmax.f32 %v653_v14, 0.0  ;;  %v659_v18 = vmax.f32 %v658_v15, 0.0  ;;  %v664_v19 = vmax.f32 %v663_v16, 0.0 }
 0x2fe   : > { %v655_v20 = vmin.f32 %v654_v17, 1.0  ;;  %v660_v13 = vmin.f32 %v659_v18, 1.0  ;;  %v665_v22 = vmin.f32 %v664_v19, 1.0 }
 0x300   : > { %656 = vst [vmem:[#allocation2] sm:$0x3] %v655_v20 }
 0x301   : > { %661 = vst [vmem:[#allocation3] sm:$0x3] %v660_v13 }
 0x302   : > { %666 = vst [vmem:[#allocation4] sm:$0x3] %v665_v22 }
 0x303 PF: > { %p1048_p4 = scmp.ne.s32.totalorder %s1305_s13, 3 }
 0x305   : > { %670 = sbr.rel (%p1048_p4) target bundleno = 838 (0x346), region = 88 }
 0x30a   : > { %v671_v23 = vld [vmem:[#allocation2] sm:$0x3]  ;;  %v672_v24 = vld [vmem:[#allocation3] sm:$0x3]  ;;  %v673_v25 = vld [vmem:[#allocation4] sm:$0x3]  ;;  %v712_v52 = vstv %s1213_s26 }
 0x30b   : > { %v674_v26 = vmax.f32 %v671_v23, %v672_v24  ;;  %v676_v27 = vmin.f32 %v671_v23, %v672_v24  ;;  %vm1166_vm2 = vmmov 1  }
 0x30d   : > { %v1316_v28 = vmax.f32 %v674_v26, %v673_v25  ;;  %v677_v21 = vmin.f32 %v676_v27, %v673_v25 }
 0x30f   : > { %vm678_vm15 = vcmp.eq.f32.partialorder %v1316_v28, %v677_v21  ;;  %v679_v29 = vsub.f32 %v1316_v28, %v677_v21  ;;  %v686_v31 = vsub.f32 %v1316_v28, %v671_v23  ;;  %v688_v32 = vsub.f32 %v1316_v28, %v672_v24 }
 0x310   : > { %v690_v33 = vsub.f32 %v1316_v28, %v673_v25  ;;  %vm692_vm0 = vcmp.eq.f32.partialorder %v1316_v28, %v671_v23  ;;  %vm693_vm1 = vcmp.eq.f32.partialorder %v1316_v28, %v672_v24  ;;  %v680_v48 = vsel %vm678_vm15, 1.0, %v1316_v28 }
 0x311   : > { %v682_v30 = vsel %vm678_vm15, 1.0, %v679_v29  ;;  %vm696_vm3 = vmxor %vm692_vm0, %vm1166_vm2 }
 0x312   : > { %1108 = vrcp.f32 %v682_v30  ;;  %vm701_vm4 = vmxor %vm693_vm1, %vm1166_vm2 }
 0x313   : > { %vm697_vm5 = vmand %vm693_vm1, %vm696_vm3  ;;  %1110 = vrcp.f32 %v680_v48 }
 0x314   : > { %vm702_vm6 = vmand %vm701_vm4, %vm696_vm3 }
 0x318   : > { %v1109_v34 = vpop.eup %1108 }
 0x319   : > { %v687_v35 = vmul.f32 %v1109_v34, %v686_v31  ;;  %v689_v36 = vmul.f32 %v1109_v34, %v688_v32  ;;  %v691_v37 = vmul.f32 %v1109_v34, %v690_v33  ;;  %v1111_v55 = vpop.eup %1110 }
 0x31a   : > { %v684_v57 = vmul.f32 %v1111_v55, %v679_v29 }
 0x31b   : > { %v694_v38 = vsub.f32 %v691_v37, %v689_v36  ;;  %v698_v39 = vadd.f32 2.0, %v687_v35  ;;  %v703_v40 = vadd.f32 4.0, %v689_v36 }
 0x31c   : > { %v685_v60 = vmin.f32 %v684_v57, 1.0 }
 0x31d   : > { %v695_v41 = vsel %vm692_vm0, %v694_v38, 0.0  ;;  %v699_v42 = vsub.f32 %v698_v39, %v691_v37  ;;  %v704_v43 = vsub.f32 %v703_v40, %v687_v35 }
 0x31e   : > { %v722_v0 = vsub.f32 1.0, %v685_v60 }
 0x31f   : > { %v700_v44 = vsel %vm697_vm5, %v699_v42, 0.0  ;;  %v705_v45 = vsel %vm702_vm6, %v704_v43, 0.0 }
 0x320   : > { %v706_v46 = vadd.f32 %v700_v44, %v695_v41  ;;  %v723_v4 = vmul.f32 %v722_v0, %v1316_v28 }
 0x322   : > { %v707_v47 = vadd.f32 %v706_v46, %v705_v45 }
 0x324   : > { %v708_v49 = vmul.f32 0.16666667, %v707_v47 }
 0x326   : > { %v709_v50 = vadd.f32 1.0, %v708_v49 }
 0x328   : > { %v710_v51 = vfloor.f32 %v709_v50 }
 0x32a   : > { %v711_v53 = vsub.f32 %v709_v50, %v710_v51 }
 0x32c   : > { %v713_v54 = vadd.f32 %v712_v52, %v711_v53 }
 0x32e   : > { %v714_v56 = vfloor.f32 %v713_v54 }
 0x330   : > { %v715_v58 = vsub.f32 %v713_v54, %v714_v56 }
 0x332   : > { %v716_v59 = vmul.f32 6.0, %v715_v58 }
 0x334   : > { %v717_v61 = vfloor.f32 %v716_v59 }
 0x336   : > { %v718_v62 = vsub.f32 %v716_v59, %v717_v61  ;;  %v1064_v63 = vcvt.f32.s32 %v717_v61 }
 0x338   : > { %vm720_vm7 = vcmp.gt.s32.totalorder %v1064_v63, 5  ;;  %v724_v1 = vmul.f32 %v718_v62, %v685_v60  ;;  %v727_v2 = vsub.f32 1.0, %v718_v62 }
 0x339   : > { %v721_v3 = vsel %vm720_vm7, 0, %v1064_v63 }
 0x33a   : > { %v725_v5 = vsub.f32 1.0, %v724_v1  ;;  %v728_v6 = vmul.f32 %v727_v2, %v685_v60  ;;  %vm734_vm8 = vcmp.eq.s32.totalorder %v721_v3, 3  ;;  %vm735_vm9 = vcmp.eq.s32.totalorder %v721_v3, 4 }
 0x33b   : > { %vm733_vm10 = vcmp.eq.s32.totalorder %v721_v3, 2  ;;  %vm732_vm11 = vcmp.eq.s32.totalorder %v721_v3, 1  ;;  %vm731_vm12 = vcmp.eq.s32.totalorder %v721_v3, 0 }
 0x33c   : > { %v726_v7 = vmul.f32 %v725_v5, %v1316_v28  ;;  %v729_v8 = vsub.f32 1.0, %v728_v6 }
 0x33e   : > { %v730_v9 = vmul.f32 %v729_v8, %v1316_v28  ;;  %v742_v10 = vsel %vm734_vm8, %v726_v7, %v723_v4  ;;  %v747_v11 = vsel %vm735_vm9, %v1316_v28, %v726_v7 }
 0x33f   : > { %v743_v12 = vsel %vm733_vm10, %v1316_v28, %v742_v10  ;;  %v748_v14 = vsel %vm734_vm8, %v1316_v28, %v747_v11 }
 0x340   : > { %v736_v15 = vsel %vm735_vm9, %v730_v9, %v1316_v28  ;;  %v744_v16 = vsel %vm732_vm11, %v1316_v28, %v743_v12  ;;  %v749_v17 = vsel %vm733_vm10, %v730_v9, %v748_v14 }
 0x341   : > { %v737_v18 = vsel %vm734_vm8, %v723_v4, %v736_v15  ;;  %v745_v19 = vsel %vm731_vm12, %v730_v9, %v744_v16  ;;  %v750_v20 = vsel %vm732_vm11, %v723_v4, %v749_v17 }
 0x342   : > { %v738_v13 = vsel %vm733_vm10, %v723_v4, %v737_v18  ;;  %746 = vst [vmem:[#allocation3] sm:$0x3] %v745_v19  ;;  %v751_v22 = vsel %vm731_vm12, %v723_v4, %v750_v20 }
 0x343   : > { %v739_v23 = vsel %vm732_vm11, %v726_v7, %v738_v13  ;;  %752 = vst [vmem:[#allocation4] sm:$0x3] %v751_v22 }
 0x344   : > { %v740_v24 = vsel %vm731_vm12, %v1316_v28, %v739_v23 }
 0x345   : > { %741 = vst [vmem:[#allocation2] sm:$0x3] %v740_v24 }
 0x346 PF: > { %s1346_s16 = sld [smem:[#allocation5 + $0x3]] }
 0x34c   : > { %p1050_p5 = scmp.ne.s32.totalorder %s1346_s16, 0 }
 0x34e   : > { %757 = sbr.rel (%p1050_p5) target bundleno = 861 (0x35d), region = 92 }
 0x353   : > { %v758_v25 = vld [vmem:[#allocation2] sm:$0x3]  ;;  %v759_v26 = vstv %s1207_s22  ;;  %v764_v27 = vld [vmem:[#allocation3] sm:$0x3]  ;;  %v769_v21 = vld [vmem:[#allocation4] sm:$0x3] }
 0x354   : > { %v760_v29 = vmul.f32 %v759_v26, %v758_v25  ;;  %v765_v30 = vmul.f32 %v764_v27, %v759_v26  ;;  %v770_v31 = vmul.f32 %v769_v21, %v759_v26 }
 0x356   : > { %v761_v32 = vmax.f32 %v760_v29, 0.0  ;;  %v766_v33 = vmax.f32 %v765_v30, 0.0  ;;  %v771_v34 = vmax.f32 %v770_v31, 0.0 }
 0x358   : > { %v762_v35 = vmin.f32 %v761_v32, 1.0  ;;  %v767_v28 = vmin.f32 %v766_v33, 1.0  ;;  %v772_v36 = vmin.f32 %v771_v34, 1.0 }
 0x35a   : > { %763 = vst [vmem:[#allocation2] sm:$0x3] %v762_v35 }
 0x35b   : > { %768 = vst [vmem:[#allocation3] sm:$0x3] %v767_v28 }
 0x35c   : > { %773 = vst [vmem:[#allocation4] sm:$0x3] %v772_v36 }
 0x35d PF: > { %p1051_p6 = scmp.ne.s32.totalorder %s1346_s16, 1 }
 0x35e   : > { %s798_s17 = ssub.f32 (!%p1051_p6), 1.0, %s1209_s23 }
 0x35f   : > { %777 = sbr.rel (%p1051_p6) target bundleno = 1018 (0x3fa), region = 96 }
 0x364   : > { %v778_v37 = vld [vmem:[#allocation2] sm:$0x3]  ;;  %v779_v38 = vld [vmem:[#allocation3] sm:$0x3]  ;;  %v780_v39 = vld [vmem:[#allocation4] sm:$0x3]  ;;  %v799_v53 = vstv %s1209_s23  ;;  %v801_v55 = vstv %s798_s17 }
 0x365   : > { %v781_v40 = vmul.f32 0.2989, %v778_v37  ;;  %v782_v41 = vmul.f32 0.587, %v779_v38  ;;  %v784_v42 = vmul.f32 0.114, %v780_v39  ;;  %v800_v56 = vmul.f32 %v799_v53, %v778_v37 }
 0x366   : > { %vm786_vm13 = vcmask 1041408   ;;  %v807_v57 = vmul.f32 %v799_v53, %v779_v38  ;;  %v812_v58 = vmul.f32 %v799_v53, %v780_v39 }
 0x367   : > { %v783_v43 = vadd.f32 %v782_v41, %v781_v40 }
 0x369   : > { %v785_v44 = vadd.f32 %v784_v42, %v783_v43 }
 0x36b   : > { %v787_v45 = vsel %vm786_vm13, %v785_v44, 0.0 }
 0x36c   : > { %788 = vadd.xlane.f32.xlu0 %v787_v45 }
 0x3df   : > { %v789_v46 = vpop.xlane.xlu0 %788 }
 0x3e0   : > { %v790_v47 = vsel %vm786_vm13, %v789_v46, 0.0 }
 0x3e1   : > { %v791_v48 = vrot.slane %v790_v47, 4 }
 0x3e3   : > { %v792_v49 = vadd.f32 %v791_v48, %v790_v47 }
 0x3e5   : > { %v793_v50 = vrot.slane %v792_v49, 2 }
 0x3e7   : > { %v794_v51 = vadd.f32 %v793_v50, %v792_v49 }
 0x3e9   : > { %v795_v52 = vrot.slane %v794_v51, 1 }
 0x3eb   : > { %v796_v54 = vadd.f32 %v795_v52, %v794_v51 }
 0x3ed   : > { %v797_v59 = vmul.f32 0.00390625, %v796_v54 }
 0x3ef   : > { %v802_v60 = vmul.f32 %v801_v55, %v797_v59 }
 0x3f1   : > { %v803_v61 = vadd.f32 %v802_v60, %v800_v56  ;;  %v808_v62 = vadd.f32 %v807_v57, %v802_v60  ;;  %v813_v63 = vadd.f32 %v812_v58, %v802_v60 }
 0x3f3   : > { %v804_v0 = vmax.f32 %v803_v61, 0.0  ;;  %v809_v1 = vmax.f32 %v808_v62, 0.0  ;;  %v814_v2 = vmax.f32 %v813_v63, 0.0 }
 0x3f5   : > { %v805_v3 = vmin.f32 %v804_v0, 1.0  ;;  %v810_v4 = vmin.f32 %v809_v1, 1.0  ;;  %v815_v5 = vmin.f32 %v814_v2, 1.0 }
 0x3f7   : > { %806 = vst [vmem:[#allocation2] sm:$0x3] %v805_v3 }
 0x3f8   : > { %811 = vst [vmem:[#allocation3] sm:$0x3] %v810_v4 }
 0x3f9   : > { %816 = vst [vmem:[#allocation4] sm:$0x3] %v815_v5 }
 0x3fa PF: > { %p1052_p7 = scmp.ne.s32.totalorder %s1346_s16, 2 }
 0x3fb   : > { %s829_s18 = ssub.f32 (!%p1052_p7), 1.0, %s1211_s24 }
 0x3fc   : > { %820 = sbr.rel (%p1052_p7) target bundleno = 1043 (0x413), region = 100 }
 0x401   : > { %v821_v6 = vld [vmem:[#allocation2] sm:$0x3]  ;;  %v822_v7 = vld [vmem:[#allocation3] sm:$0x3]  ;;  %v823_v8 = vld [vmem:[#allocation4] sm:$0x3]  ;;  %v830_v12 = vstv %s1211_s24  ;;  %v832_v15 = vstv %s829_s18 }
 0x402   : > { %v824_v9 = vmul.f32 0.2989, %v821_v6  ;;  %v825_v10 = vmul.f32 0.587, %v822_v7  ;;  %v827_v11 = vmul.f32 0.114, %v823_v8  ;;  %v831_v17 = vmul.f32 %v830_v12, %v821_v6 }
 0x403   : > { %v838_v18 = vmul.f32 %v830_v12, %v822_v7  ;;  %v843_v19 = vmul.f32 %v830_v12, %v823_v8 }
 0x404   : > { %v826_v14 = vadd.f32 %v825_v10, %v824_v9 }
 0x406   : > { %v828_v16 = vadd.f32 %v827_v11, %v826_v14 }
 0x408   : > { %v833_v20 = vmul.f32 %v832_v15, %v828_v16 }
 0x40a   : > { %v834_v13 = vadd.f32 %v833_v20, %v831_v17  ;;  %v839_v22 = vadd.f32 %v838_v18, %v833_v20  ;;  %v844_v23 = vadd.f32 %v843_v19, %v833_v20 }
 0x40c   : > { %v835_v24 = vmax.f32 %v834_v13, 0.0  ;;  %v840_v25 = vmax.f32 %v839_v22, 0.0  ;;  %v845_v26 = vmax.f32 %v844_v23, 0.0 }
 0x40e   : > { %v836_v27 = vmin.f32 %v835_v24, 1.0  ;;  %v841_v21 = vmin.f32 %v840_v25, 1.0  ;;  %v846_v29 = vmin.f32 %v845_v26, 1.0 }
 0x410   : > { %837 = vst [vmem:[#allocation2] sm:$0x3] %v836_v27 }
 0x411   : > { %842 = vst [vmem:[#allocation3] sm:$0x3] %v841_v21 }
 0x412   : > { %847 = vst [vmem:[#allocation4] sm:$0x3] %v846_v29 }
 0x413 PF: > { %p1053_p8 = scmp.ne.s32.totalorder %s1346_s16, 3 }
 0x415   : > { %851 = sbr.rel (%p1053_p8) target bundleno = 1110 (0x456), region = 104 }
 0x41a   : > { %v852_v30 = vld [vmem:[#allocation2] sm:$0x3]  ;;  %v853_v31 = vld [vmem:[#allocation3] sm:$0x3]  ;;  %v854_v32 = vld [vmem:[#allocation4] sm:$0x3]  ;;  %v893_v59 = vstv %s1213_s26 }
 0x41b   : > { %v855_v33 = vmax.f32 %v852_v30, %v853_v31  ;;  %v857_v34 = vmin.f32 %v852_v30, %v853_v31  ;;  %vm1167_vm1 = vmmov 1  }
 0x41d   : > { %v1357_v35 = vmax.f32 %v855_v33, %v854_v32  ;;  %v858_v28 = vmin.f32 %v857_v34, %v854_v32 }
 0x41f   : > { %vm859_vm14 = vcmp.eq.f32.partialorder %v1357_v35, %v858_v28  ;;  %v860_v36 = vsub.f32 %v1357_v35, %v858_v28  ;;  %v867_v38 = vsub.f32 %v1357_v35, %v852_v30  ;;  %v869_v39 = vsub.f32 %v1357_v35, %v853_v31 }
 0x420   : > { %v871_v40 = vsub.f32 %v1357_v35, %v854_v32  ;;  %vm873_vm15 = vcmp.eq.f32.partialorder %v1357_v35, %v852_v30  ;;  %vm874_vm0 = vcmp.eq.f32.partialorder %v1357_v35, %v853_v31  ;;  %v861_v55 = vsel %vm859_vm14, 1.0, %v1357_v35 }
 0x421   : > { %v863_v37 = vsel %vm859_vm14, 1.0, %v860_v36  ;;  %vm877_vm2 = vmxor %vm873_vm15, %vm1167_vm1 }
 0x422   : > { %1112 = vrcp.f32 %v863_v37  ;;  %vm882_vm3 = vmxor %vm874_vm0, %vm1167_vm1 }
 0x423   : > { %vm878_vm4 = vmand %vm874_vm0, %vm877_vm2  ;;  %1114 = vrcp.f32 %v861_v55 }
 0x424   : > { %vm883_vm5 = vmand %vm882_vm3, %vm877_vm2 }
 0x428   : > { %v1113_v41 = vpop.eup %1112 }
 0x429   : > { %v868_v42 = vmul.f32 %v1113_v41, %v867_v38  ;;  %v870_v43 = vmul.f32 %v1113_v41, %v869_v39  ;;  %v872_v44 = vmul.f32 %v1113_v41, %v871_v40  ;;  %v1115_v62 = vpop.eup %1114 }
 0x42a   : > { %v865_v0 = vmul.f32 %v1115_v62, %v860_v36 }
 0x42b   : > { %v875_v45 = vsub.f32 %v872_v44, %v870_v43  ;;  %v879_v46 = vadd.f32 2.0, %v868_v42  ;;  %v884_v47 = vadd.f32 4.0, %v870_v43 }
 0x42c   : > { %v866_v3 = vmin.f32 %v865_v0, 1.0 }
 0x42d   : > { %v876_v48 = vsel %vm873_vm15, %v875_v45, 0.0  ;;  %v880_v49 = vsub.f32 %v879_v46, %v872_v44  ;;  %v885_v50 = vsub.f32 %v884_v47, %v868_v42 }
 0x42e   : > { %v903_v7 = vsub.f32 1.0, %v866_v3 }
 0x42f   : > { %v881_v51 = vsel %vm878_vm4, %v880_v49, 0.0  ;;  %v886_v52 = vsel %vm883_vm5, %v885_v50, 0.0 }
 0x430   : > { %v887_v53 = vadd.f32 %v881_v51, %v876_v48  ;;  %v904_v11 = vmul.f32 %v903_v7, %v1357_v35 }
 0x432   : > { %v888_v54 = vadd.f32 %v887_v53, %v886_v52 }
 0x434   : > { %v889_v56 = vmul.f32 0.16666667, %v888_v54 }
 0x436   : > { %v890_v57 = vadd.f32 1.0, %v889_v56 }
 0x438   : > { %v891_v58 = vfloor.f32 %v890_v57 }
 0x43a   : > { %v892_v60 = vsub.f32 %v890_v57, %v891_v58 }
 0x43c   : > { %v894_v61 = vadd.f32 %v893_v59, %v892_v60 }
 0x43e   : > { %v895_v63 = vfloor.f32 %v894_v61 }
 0x440   : > { %v896_v1 = vsub.f32 %v894_v61, %v895_v63 }
 0x442   : > { %v897_v2 = vmul.f32 6.0, %v896_v1 }
 0x444   : > { %v898_v4 = vfloor.f32 %v897_v2 }
 0x446   : > { %v899_v5 = vsub.f32 %v897_v2, %v898_v4  ;;  %v1066_v6 = vcvt.f32.s32 %v898_v4 }
 0x448   : > { %vm901_vm6 = vcmp.gt.s32.totalorder %v1066_v6, 5  ;;  %v905_v8 = vmul.f32 %v899_v5, %v866_v3  ;;  %v908_v9 = vsub.f32 1.0, %v899_v5 }
 0x449   : > { %v902_v10 = vsel %vm901_vm6, 0, %v1066_v6 }
 0x44a   : > { %v906_v12 = vsub.f32 1.0, %v905_v8  ;;  %v909_v14 = vmul.f32 %v908_v9, %v866_v3  ;;  %vm915_vm7 = vcmp.eq.s32.totalorder %v902_v10, 3  ;;  %vm916_vm8 = vcmp.eq.s32.totalorder %v902_v10, 4 }
 0x44b   : > { %vm914_vm9 = vcmp.eq.s32.totalorder %v902_v10, 2  ;;  %vm913_vm10 = vcmp.eq.s32.totalorder %v902_v10, 1  ;;  %vm912_vm11 = vcmp.eq.s32.totalorder %v902_v10, 0 }
 0x44c   : > { %v907_v15 = vmul.f32 %v906_v12, %v1357_v35  ;;  %v910_v16 = vsub.f32 1.0, %v909_v14 }
 0x44e   : > { %v911_v17 = vmul.f32 %v910_v16, %v1357_v35  ;;  %v923_v18 = vsel %vm915_vm7, %v907_v15, %v904_v11  ;;  %v928_v19 = vsel %vm916_vm8, %v1357_v35, %v907_v15 }
 0x44f   : > { %v924_v20 = vsel %vm914_vm9, %v1357_v35, %v923_v18  ;;  %v929_v13 = vsel %vm915_vm7, %v1357_v35, %v928_v19 }
 0x450   : > { %v917_v22 = vsel %vm916_vm8, %v911_v17, %v1357_v35  ;;  %v925_v23 = vsel %vm913_vm10, %v1357_v35, %v924_v20  ;;  %v930_v24 = vsel %vm914_vm9, %v911_v17, %v929_v13 }
 0x451   : > { %v918_v25 = vsel %vm915_vm7, %v904_v11, %v917_v22  ;;  %v926_v26 = vsel %vm912_vm11, %v911_v17, %v925_v23  ;;  %v931_v27 = vsel %vm913_vm10, %v904_v11, %v930_v24 }
 0x452   : > { %v919_v21 = vsel %vm914_vm9, %v904_v11, %v918_v25  ;;  %927 = vst [vmem:[#allocation3] sm:$0x3] %v926_v26  ;;  %v932_v29 = vsel %vm912_vm11, %v904_v11, %v931_v27 }
 0x453   : > { %v920_v30 = vsel %vm913_vm10, %v907_v15, %v919_v21  ;;  %933 = vst [vmem:[#allocation4] sm:$0x3] %v932_v29 }
 0x454   : > { %v921_v31 = vsel %vm912_vm11, %v1357_v35, %v920_v30 }
 0x455   : > { %922 = vst [vmem:[#allocation2] sm:$0x3] %v921_v31 }
 0x456 PF:  {}
 0x459   : > { %v936_v33 = vld [vmem:[#allocation3] sm:$0x3] }
 0x45a   : > { %v939_v34 = vld [vmem:[#allocation4] sm:$0x3]  ;;  %1054 = vst [vmem:[%s1223_s6 + $0x2] sm:$0x3] %v936_v33 }
 0x45b   : > { %1055 = vst [vmem:[%s1223_s6 + $0x4] sm:$0x3] %v939_v34 }
 0x45c   : > { %v934_v32 = vld [vmem:[#allocation2] sm:$0x3] }
 0x45d   : > { %935 = vst [vmem:[%s1223_s6] sm:$0x3] %v934_v32 }
 0x45e PF: > { %s15_s12 = sadd.s32 1, %s1160_s12  }
 0x45f   : > { %p12_p9 = scmp.ge.s32.totalorder %s15_s12, 4  }
 0x461   :  { %14 = sbr.rel (!%p12_p9) target bundleno = 2 (0x2), region = 139 }
 0x466   :  { %963 = vsyncpa [#allocation6], 1 }
 0x467   :  { %965 = vsyncpa [#allocation6 + $0x1], 1 }
 0x468   :  { %966 = vsyncpa [#allocation8], 1 }

</bundles_post_ra>
